<compile_context>
chip_gen: v7x
topology: tpu7x:2x2x1
jax: 0.10.0
libtpu: 0.0.40
codegen_flags: <defaults>
</compile_context>

<pallas_src>
import functools
import numpy as np

import jax
import jax.numpy as jnp
from jax.experimental import pallas as pl
from jax.experimental.pallas import tpu as pltpu


# ----------------------------------------------------------------------------
# Fused kernel: whole network for one batch tile
# ----------------------------------------------------------------------------
def unet_kernel(a0_ref, m_ref, w1_ref, w2_ref, w3_ref, w4_ref, b_ref,
                o_ref, p_ref, *, W):
    L = a0_ref.shape[-1]

    # Tap order must match the wrapper's (Cout, tap-major, channel-minor)
    # weight reshape: row-major over (dy, dx) in {-1,0,1}^2.
    # Center tap needs no mask; the others use precomputed mask rows 0..7.
    taps = []
    mrow = 0
    for dy in (-1, 0, 1):
        for dx in (-1, 0, 1):
            s = dy * W + dx
            if dy == 0 and dx == 0:
                taps.append((s, None))
            else:
                taps.append((s, mrow))
                mrow += 1

    def build_patch(act):
        # im2col: patch rows [tap*Cin : (tap+1)*Cin] = rolled + masked act.
        # XLU lane rotation (pltpu.roll) instead of concat-with-zeros; the
        # precomputed border masks zero every wrapped / out-of-image lane.
        cin = act.shape[0]
        for tap, (s, mi) in enumerate(taps):
            sh = act if s == 0 else pltpu.roll(act, shift=(-s) % L, axis=1)
            if mi is not None:
                sh = sh * m_ref[mi:mi + 1, :]
            p_ref[tap * cin:(tap + 1) * cin, :] = sh
        return cin

    def conv3x3(act, w_ref_l, layer, relu):
        cin = build_patch(act)
        cout = w_ref_l.shape[0]
        out = jnp.dot(w_ref_l[...], p_ref[0:9 * cin, :],
                      preferred_element_type=jnp.float32)       # (cout, L)
        out = out + b_ref[0:cout, layer:layer + 1]               # lane bcast
        if relu:
            out = jnp.maximum(out, 0.0)
        return out

    a0 = a0_ref[...]                             # (8, L): img, t, 6 zero rows
    a1 = conv3x3(a0, w1_ref, 0, relu=True)       # (32, L)
    a2 = conv3x3(a1, w2_ref, 1, relu=True)       # (64, L)
    a3 = conv3x3(a2, w3_ref, 2, relu=True)       # (32, L)

    # Final Cout=1 layer: weight zero-padded to 8 rows so the matmul and the
    # output store are full sublane tiles; the wrapper keeps row 0 only.
    cin = build_patch(a3)
    out4 = jnp.dot(w4_ref[...], p_ref[0:9 * cin, :],
                   preferred_element_type=jnp.float32)           # (8, L)
    o_ref[...] = out4 + b_ref[0:1, 3:4]


# ----------------------------------------------------------------------------
# Wrapper helpers
# ----------------------------------------------------------------------------
def sinusoidal_embedding(t, dim):
    half = dim // 2
    scale = np.log(10000.0) / (half - 1)
    freqs = jnp.exp(jnp.arange(half, dtype=jnp.float32) * -scale)
    emb = t[:, None] * freqs[None, :]
    return jnp.concatenate([jnp.sin(emb), jnp.cos(emb)], axis=1)   # (B, dim)


def _reshape_weight(w_hwio, pad_cin=None):
    """HWIO (3,3,Cin,Cout) -> (Cout, 9*Cin); rows tap-major, channel-minor."""
    kh, kw, cin, cout = w_hwio.shape
    if pad_cin is not None and pad_cin > cin:
        w_hwio = jnp.pad(w_hwio, ((0, 0), (0, 0), (0, pad_cin - cin), (0, 0)))
        cin = pad_cin
    return jnp.transpose(w_hwio.reshape(kh * kw, cin, cout),
                         (2, 0, 1)).reshape(cout, kh * kw * cin)


def _pick_bt(B):
    """Images folded into the lane axis per grid step; prefer >=2 grid steps
    so both v7x TensorCores get work under dimension_semantics=('parallel',)."""
    for bt in (8, 4, 2, 1):
        if B % bt == 0 and B // bt >= 2:
            return bt
    for bt in (8, 4, 2, 1):
        if B % bt == 0:
            return bt
    return 1


def _border_masks(H, W, n_img):
    """(8, n_img*H*W) f32 validity masks for the 8 non-center 3x3 taps.
    Image-local indices, so rolled taps never leak across image seams."""
    HW = H * W
    q = np.arange(n_img * HW) % HW
    row, col = q // W, q % W
    rows = []
    for dy in (-1, 0, 1):
        for dx in (-1, 0, 1):
            if dy == 0 and dx == 0:
                continue
            ok = np.ones(n_img * HW, dtype=bool)
            if dy == -1:
                ok &= row >= 1
            if dy == 1:
                ok &= row <= H - 2
            if dx == -1:
                ok &= col >= 1
            if dx == 1:
                ok &= col <= W - 2
            rows.append(ok.astype(np.float32))
    return np.stack(rows, axis=0)


# ----------------------------------------------------------------------------
# Wrapper
# ----------------------------------------------------------------------------
@jax.jit
def unet_forward(x_nchw, t, params):
    B, _, H, Wd = x_nchw.shape
    HW = H * Wd
    Bt = _pick_bt(B)
    L = Bt * HW
    n_blocks = B // Bt

    # Time embedding (tiny) in plain XLA; reduced to one scalar per image.
    emb = sinusoidal_embedding(t.astype(jnp.float32), 64)            # (B, 64)
    t_scalar = (emb @ params["wt"] + params["bt"]).mean(axis=-1)     # (B,)

    # Lane-dense, batch-folded, 8-sublane-padded input block:
    # row 0 = image, row 1 = constant time channel, rows 2..7 = zeros.
    x_flat = x_nchw.reshape(1, B * HW)
    t_flat = jnp.broadcast_to(t_scalar[:, None], (B, HW)).reshape(1, B * HW)
    a0_all = jnp.concatenate(
        [x_flat, t_flat, jnp.zeros((6, B * HW), jnp.float32)], axis=0)

    masks = jnp.asarray(_border_masks(H, Wd, Bt))                    # (8, L)

    # Conv weights as (Cout, 9*Cin) MXU operands; layer-1 Cin padded 2->8 and
    # layer-4 Cout padded 1->8 so every sublane slice is a whole tile.
    w1r = _reshape_weight(params["w1"], pad_cin=8)                   # (32, 72)
    w2r = _reshape_weight(params["w2"])                              # (64, 288)
    w3r = _reshape_weight(params["w3"])                              # (32, 576)
    w4r = _reshape_weight(params["w4"])                              # (1, 288)
    w4r = jnp.concatenate([w4r, jnp.zeros((7, w4r.shape[1]), w4r.dtype)],
                          axis=0)                                    # (8, 288)

    # Pack all biases into one (64, 4) block: column l = bias of layer l.
    bp = jnp.zeros((64, 4), jnp.float32)
    bp = bp.at[:32, 0].set(params["b1"])
    bp = bp.at[:64, 1].set(params["b2"])
    bp = bp.at[:32, 2].set(params["b3"])
    bp = bp.at[:1, 3].set(params["b4"])

    kern = functools.partial(unet_kernel, W=Wd)
    const = lambda b: (0, 0)
    out = pl.pallas_call(
        kern,
        out_shape=jax.ShapeDtypeStruct((8, B * HW), jnp.float32),
        grid=(n_blocks,),
        in_specs=[
            pl.BlockSpec((8, L), lambda b: (0, b)),     # padded input block
            pl.BlockSpec((8, L), const),                # border masks
            pl.BlockSpec(w1r.shape, const),
            pl.BlockSpec(w2r.shape, const),
            pl.BlockSpec(w3r.shape, const),
            pl.BlockSpec(w4r.shape, const),
            pl.BlockSpec(bp.shape, const),
        ],
        out_specs=pl.BlockSpec((8, L), lambda b: (0, b)),
        scratch_shapes=[pltpu.VMEM((9 * 64, L), jnp.float32)],       # im2col
        compiler_params=pltpu.CompilerParams(
            dimension_semantics=("parallel",)),
    )(a0_all, masks, w1r, w2r, w3r, w4r, bp)

    # Row 0 of the padded output holds the real Cout=1 result.
    return out[0].reshape(B, 1, H, Wd)


# ----------------------------------------------------------------------------
# Pure-JAX reference (for correctness check)
# ----------------------------------------------------------------------------
def ref_forward(x_nchw, t, params):
    emb = sinusoidal_embedding(t.astype(jnp.float32), 64)
    te = emb @ params["wt"] + params["bt"]
    t_scalar = te.mean(axis=-1)
    B, _, H, Wd = x_nchw.shape
    t_map = jnp.broadcast_to(t_scalar[:, None, None, None], (B, 1, H, Wd))
    h = jnp.concatenate([x_nchw, t_map], axis=1)

    def conv(x, w_hwio, b, relu):
        y = jax.lax.conv_general_dilated(
            x, w_hwio, window_strides=(1, 1), padding="SAME",
            dimension_numbers=("NCHW", "HWIO", "NCHW"),
            precision=jax.lax.Precision.HIGHEST)
        y = y + b[None, :, None, None]
        return jnp.maximum(y, 0.0) if relu else y

    h = conv(h, params["w1"], params["b1"], True)
    h = conv(h, params["w2"], params["b2"], True)
    h = conv(h, params["w3"], params["b3"], True)
    return conv(h, params["w4"], params["b4"], False)


# ----------------------------------------------------------------------------
# Main
# ----------------------------------------------------------------------------
if __name__ == "__main__":
    key = jax.random.PRNGKey(0)
    ks = jax.random.split(key, 12)

    def init(k, shape, scale=0.1):
        return jax.random.normal(k, shape, jnp.float32) * scale

    params = {
        "wt": init(ks[0], (64, 128), 0.05),   # time_embed weight (in, out)
        "bt": init(ks[1], (128,), 0.05),
        "w1": init(ks[2], (3, 3, 2, 32)),     # HWIO
        "b1": init(ks[3], (32,)),
        "w2": init(ks[4], (3, 3, 32, 64)),
        "b2": init(ks[5], (64,)),
        "w3": init(ks[6], (3, 3, 64, 32)),
        "b3": init(ks[7], (32,)),
        "w4": init(ks[8], (3, 3, 32, 1)),
        "b4": init(ks[9], (1,)),
    }

    x = jax.random.normal(ks[10], (2, 1, 16, 16), jnp.float32)   # NCHW
    t = jnp.array([3.0, 7.0], dtype=jnp.float32)

    out = unet_forward(x, t, params)
    out = jax.block_until_ready(out)

    ref = jax.block_until_ready(ref_forward(x, t, params))
    assert out.shape == (2, 1, 16, 16), out.shape
    np.testing.assert_allclose(np.asarray(out), np.asarray(ref),
                               rtol=1e-3, atol=1e-3)

    print("KERNEL_OK")
</pallas_src>

<mosaic_0001>
module attributes {stable_mosaic.version = 11 : i64} {
  func.func @unet_kernel(%arg0: i32, %arg1: memref<8x256xf32, #tpu.memory_space<vmem>>, %arg2: memref<8x256xf32, #tpu.memory_space<vmem>>, %arg3: memref<32x72xf32, #tpu.memory_space<vmem>>, %arg4: memref<64x288xf32, #tpu.memory_space<vmem>>, %arg5: memref<32x576xf32, #tpu.memory_space<vmem>>, %arg6: memref<8x288xf32, #tpu.memory_space<vmem>>, %arg7: memref<64x4xf32, #tpu.memory_space<vmem>>, %arg8: memref<8x256xf32, #tpu.memory_space<vmem>>, %arg9: memref<576x256xf32, #tpu.memory_space<vmem>>) attributes {dimension_semantics = [#tpu.dimension_semantics<parallel>], iteration_bounds = array<i64: 2>, scalar_prefetch = 0 : i64, scratch_operands = 1 : i64, tpu.core_type = #tpu.core_type<tc>, window_params = [{transform_indices = @transform_0, window_bounds = array<i64: 8, 256>}, {pipeline_mode = #tpu.pipeline_mode<synchronous>, transform_indices = @transform_1, window_bounds = array<i64: 8, 256>}, {pipeline_mode = #tpu.pipeline_mode<synchronous>, transform_indices = @transform_2, window_bounds = array<i64: 32, 72>}, {pipeline_mode = #tpu.pipeline_mode<synchronous>, transform_indices = @transform_3, window_bounds = array<i64: 64, 288>}, {pipeline_mode = #tpu.pipeline_mode<synchronous>, transform_indices = @transform_4, window_bounds = array<i64: 32, 576>}, {pipeline_mode = #tpu.pipeline_mode<synchronous>, transform_indices = @transform_5, window_bounds = array<i64: 8, 288>}, {pipeline_mode = #tpu.pipeline_mode<synchronous>, transform_indices = @transform_6, window_bounds = array<i64: 64, 4>}, {transform_indices = @transform_7, window_bounds = array<i64: 8, 256>}]} {
    %c0 = arith.constant 0 : index
    %c0_0 = arith.constant 0 : index
    %0 = vector.load %arg1[%c0, %c0_0] : memref<8x256xf32, #tpu.memory_space<vmem>>, vector<8x256xf32>
    %c17_i32 = arith.constant 17 : i32
    %1 = tpu.dynamic_rotate %0 by %c17_i32 dim 1 : vector<8x256xf32>, i32 -> vector<8x256xf32>
    %c0_1 = arith.constant 0 : index
    %c0_2 = arith.constant 0 : index
    %2 = vector.load %arg2[%c0_1, %c0_2] : memref<8x256xf32, #tpu.memory_space<vmem>>, vector<1x256xf32>
    %3 = vector.broadcast %2 : vector<1x256xf32> to vector<8x256xf32>
    %4 = arith.mulf %1, %3 : vector<8x256xf32>
    %c0_3 = arith.constant 0 : index
    %c0_4 = arith.constant 0 : index
    %5 = vector.load %arg9[%c0_3, %c0_4] : memref<576x256xf32, #tpu.memory_space<vmem>>, vector<8x256xf32>
    tpu.vector_store %arg9[%c0_3, %c0_4], %4 {strides = array<i32>} : memref<576x256xf32, #tpu.memory_space<vmem>>, vector<8x256xf32>,
    %c16_i32 = arith.constant 16 : i32
    %6 = tpu.dynamic_rotate %0 by %c16_i32 dim 1 : vector<8x256xf32>, i32 -> vector<8x256xf32>
    %c1 = arith.constant 1 : index
    %c0_5 = arith.constant 0 : index
    %7 = vector.load %arg2[%c1, %c0_5] : memref<8x256xf32, #tpu.memory_space<vmem>>, vector<1x256xf32>
    %8 = vector.broadcast %7 : vector<1x256xf32> to vector<8x256xf32>
    %9 = arith.mulf %6, %8 : vector<8x256xf32>
    %c8 = arith.constant 8 : index
    %c0_6 = arith.constant 0 : index
    %10 = vector.load %arg9[%c8, %c0_6] : memref<576x256xf32, #tpu.memory_space<vmem>>, vector<8x256xf32>
    tpu.vector_store %arg9[%c8, %c0_6], %9 {strides = array<i32>} : memref<576x256xf32, #tpu.memory_space<vmem>>, vector<8x256xf32>,
    %c15_i32 = arith.constant 15 : i32
    %11 = tpu.dynamic_rotate %0 by %c15_i32 dim 1 : vector<8x256xf32>, i32 -> vector<8x256xf32>
    %c2 = arith.constant 2 : index
    %c0_7 = arith.constant 0 : index
    %12 = vector.load %arg2[%c2, %c0_7] : memref<8x256xf32, #tpu.memory_space<vmem>>, vector<1x256xf32>
    %13 = vector.broadcast %12 : vector<1x256xf32> to vector<8x256xf32>
    %14 = arith.mulf %11, %13 : vector<8x256xf32>
    %c16 = arith.constant 16 : index
    %c0_8 = arith.constant 0 : index
    %15 = vector.load %arg9[%c16, %c0_8] : memref<576x256xf32, #tpu.memory_space<vmem>>, vector<8x256xf32>
    tpu.vector_store %arg9[%c16, %c0_8], %14 {strides = array<i32>} : memref<576x256xf32, #tpu.memory_space<vmem>>, vector<8x256xf32>,
    %c1_i32 = arith.constant 1 : i32
    %16 = tpu.dynamic_rotate %0 by %c1_i32 dim 1 : vector<8x256xf32>, i32 -> vector<8x256xf32>
    %c3 = arith.constant 3 : index
    %c0_9 = arith.constant 0 : index
    %17 = vector.load %arg2[%c3, %c0_9] : memref<8x256xf32, #tpu.memory_space<vmem>>, vector<1x256xf32>
    %18 = vector.broadcast %17 : vector<1x256xf32> to vector<8x256xf32>
    %19 = arith.mulf %16, %18 : vector<8x256xf32>
    %c24 = arith.constant 24 : index
    %c0_10 = arith.constant 0 : index
    %20 = vector.load %arg9[%c24, %c0_10] : memref<576x256xf32, #tpu.memory_space<vmem>>, vector<8x256xf32>
    tpu.vector_store %arg9[%c24, %c0_10], %19 {strides = array<i32>} : memref<576x256xf32, #tpu.memory_space<vmem>>, vector<8x256xf32>,
    %c32 = arith.constant 32 : index
    %c0_11 = arith.constant 0 : index
    %21 = vector.load %arg9[%c32, %c0_11] : memref<576x256xf32, #tpu.memory_space<vmem>>, vector<8x256xf32>
    tpu.vector_store %arg9[%c32, %c0_11], %0 {strides = array<i32>} : memref<576x256xf32, #tpu.memory_space<vmem>>, vector<8x256xf32>,
    %c255_i32 = arith.constant 255 : i32
    %22 = tpu.dynamic_rotate %0 by %c255_i32 dim 1 : vector<8x256xf32>, i32 -> vector<8x256xf32>
    %c4 = arith.constant 4 : index
    %c0_12 = arith.constant 0 : index
    %23 = vector.load %arg2[%c4, %c0_12] : memref<8x256xf32, #tpu.memory_space<vmem>>, vector<1x256xf32>
    %24 = vector.broadcast %23 : vector<1x256xf32> to vector<8x256xf32>
    %25 = arith.mulf %22, %24 : vector<8x256xf32>
    %c40 = arith.constant 40 : index
    %c0_13 = arith.constant 0 : index
    %26 = vector.load %arg9[%c40, %c0_13] : memref<576x256xf32, #tpu.memory_space<vmem>>, vector<8x256xf32>
    tpu.vector_store %arg9[%c40, %c0_13], %25 {strides = array<i32>} : memref<576x256xf32, #tpu.memory_space<vmem>>, vector<8x256xf32>,
    %c241_i32 = arith.constant 241 : i32
    %27 = tpu.dynamic_rotate %0 by %c241_i32 dim 1 : vector<8x256xf32>, i32 -> vector<8x256xf32>
    %c5 = arith.constant 5 : index
    %c0_14 = arith.constant 0 : index
    %28 = vector.load %arg2[%c5, %c0_14] : memref<8x256xf32, #tpu.memory_space<vmem>>, vector<1x256xf32>
    %29 = vector.broadcast %28 : vector<1x256xf32> to vector<8x256xf32>
    %30 = arith.mulf %27, %29 : vector<8x256xf32>
    %c48 = arith.constant 48 : index
    %c0_15 = arith.constant 0 : index
    %31 = vector.load %arg9[%c48, %c0_15] : memref<576x256xf32, #tpu.memory_space<vmem>>, vector<8x256xf32>
    tpu.vector_store %arg9[%c48, %c0_15], %30 {strides = array<i32>} : memref<576x256xf32, #tpu.memory_space<vmem>>, vector<8x256xf32>,
    %c240_i32 = arith.constant 240 : i32
    %32 = tpu.dynamic_rotate %0 by %c240_i32 dim 1 : vector<8x256xf32>, i32 -> vector<8x256xf32>
    %c6 = arith.constant 6 : index
    %c0_16 = arith.constant 0 : index
    %33 = vector.load %arg2[%c6, %c0_16] : memref<8x256xf32, #tpu.memory_space<vmem>>, vector<1x256xf32>
    %34 = vector.broadcast %33 : vector<1x256xf32> to vector<8x256xf32>
    %35 = arith.mulf %32, %34 : vector<8x256xf32>
    %c56 = arith.constant 56 : index
    %c0_17 = arith.constant 0 : index
    %36 = vector.load %arg9[%c56, %c0_17] : memref<576x256xf32, #tpu.memory_space<vmem>>, vector<8x256xf32>
    tpu.vector_store %arg9[%c56, %c0_17], %35 {strides = array<i32>} : memref<576x256xf32, #tpu.memory_space<vmem>>, vector<8x256xf32>,
    %c239_i32 = arith.constant 239 : i32
    %37 = tpu.dynamic_rotate %0 by %c239_i32 dim 1 : vector<8x256xf32>, i32 -> vector<8x256xf32>
    %c7 = arith.constant 7 : index
    %c0_18 = arith.constant 0 : index
    %38 = vector.load %arg2[%c7, %c0_18] : memref<8x256xf32, #tpu.memory_space<vmem>>, vector<1x256xf32>
    %39 = vector.broadcast %38 : vector<1x256xf32> to vector<8x256xf32>
    %40 = arith.mulf %37, %39 : vector<8x256xf32>
    %c64 = arith.constant 64 : index
    %c0_19 = arith.constant 0 : index
    %41 = vector.load %arg9[%c64, %c0_19] : memref<576x256xf32, #tpu.memory_space<vmem>>, vector<8x256xf32>
    tpu.vector_store %arg9[%c64, %c0_19], %40 {strides = array<i32>} : memref<576x256xf32, #tpu.memory_space<vmem>>, vector<8x256xf32>,
    %c0_20 = arith.constant 0 : index
    %c0_21 = arith.constant 0 : index
    %42 = vector.load %arg3[%c0_20, %c0_21] : memref<32x72xf32, #tpu.memory_space<vmem>>, vector<32x72xf32>
    %c0_22 = arith.constant 0 : index
    %c0_23 = arith.constant 0 : index
    %43 = vector.load %arg9[%c0_22, %c0_23] : memref<576x256xf32, #tpu.memory_space<vmem>>, vector<72x256xf32>
    %cst = arith.constant dense<0.000000e+00> : vector<32x256xf32>
    %44 = tpu.matmul %42, %43, %cst {dimension_numbers = #tpu.dot_dimension_numbers<[1], [0], [0], [1], [0, 0, 1, 1], [], []>} : vector<32x72xf32>, vector<72x256xf32>, vector<32x256xf32> -> vector<32x256xf32>
    %c0_24 = arith.constant 0 : index
    %c0_25 = arith.constant 0 : index
    %45 = vector.load %arg7[%c0_24, %c0_25] : memref<64x4xf32, #tpu.memory_space<vmem>>, vector<32x1xf32>
    %46 = vector.broadcast %45 : vector<32x1xf32> to vector<32x256xf32>
    %47 = arith.addf %44, %46 : vector<32x256xf32>
    %cst_26 = arith.constant 0.000000e+00 : f32
    %48 = vector.broadcast %cst_26 : f32 to vector<32x256xf32>
    %49 = arith.maximumf %47, %48 : vector<32x256xf32>
    %c17_i32_27 = arith.constant 17 : i32
    %50 = tpu.dynamic_rotate %49 by %c17_i32_27 dim 1 : vector<32x256xf32>, i32 -> vector<32x256xf32>
    %c0_28 = arith.constant 0 : index
    %c0_29 = arith.constant 0 : index
    %51 = vector.load %arg2[%c0_28, %c0_29] : memref<8x256xf32, #tpu.memory_space<vmem>>, vector<1x256xf32>
    %52 = vector.broadcast %51 : vector<1x256xf32> to vector<32x256xf32>
    %53 = arith.mulf %50, %52 : vector<32x256xf32>
    %c0_30 = arith.constant 0 : index
    %c0_31 = arith.constant 0 : index
    %54 = vector.load %arg9[%c0_30, %c0_31] : memref<576x256xf32, #tpu.memory_space<vmem>>, vector<32x256xf32>
    tpu.vector_store %arg9[%c0_30, %c0_31], %53 {strides = array<i32>} : memref<576x256xf32, #tpu.memory_space<vmem>>, vector<32x256xf32>,
    %c16_i32_32 = arith.constant 16 : i32
    %55 = tpu.dynamic_rotate %49 by %c16_i32_32 dim 1 : vector<32x256xf32>, i32 -> vector<32x256xf32>
    %c1_33 = arith.constant 1 : index
    %c0_34 = arith.constant 0 : index
    %56 = vector.load %arg2[%c1_33, %c0_34] : memref<8x256xf32, #tpu.memory_space<vmem>>, vector<1x256xf32>
    %57 = vector.broadcast %56 : vector<1x256xf32> to vector<32x256xf32>
    %58 = arith.mulf %55, %57 : vector<32x256xf32>
    %c32_35 = arith.constant 32 : index
    %c0_36 = arith.constant 0 : index
    %59 = vector.load %arg9[%c32_35, %c0_36] : memref<576x256xf32, #tpu.memory_space<vmem>>, vector<32x256xf32>
    tpu.vector_store %arg9[%c32_35, %c0_36], %58 {strides = array<i32>} : memref<576x256xf32, #tpu.memory_space<vmem>>, vector<32x256xf32>,
    %c15_i32_37 = arith.constant 15 : i32
    %60 = tpu.dynamic_rotate %49 by %c15_i32_37 dim 1 : vector<32x256xf32>, i32 -> vector<32x256xf32>
    %c2_38 = arith.constant 2 : index
    %c0_39 = arith.constant 0 : index
    %61 = vector.load %arg2[%c2_38, %c0_39] : memref<8x256xf32, #tpu.memory_space<vmem>>, vector<1x256xf32>
    %62 = vector.broadcast %61 : vector<1x256xf32> to vector<32x256xf32>
    %63 = arith.mulf %60, %62 : vector<32x256xf32>
    %c64_40 = arith.constant 64 : index
    %c0_41 = arith.constant 0 : index
    %64 = vector.load %arg9[%c64_40, %c0_41] : memref<576x256xf32, #tpu.memory_space<vmem>>, vector<32x256xf32>
    tpu.vector_store %arg9[%c64_40, %c0_41], %63 {strides = array<i32>} : memref<576x256xf32, #tpu.memory_space<vmem>>, vector<32x256xf32>,
    %c1_i32_42 = arith.constant 1 : i32
    %65 = tpu.dynamic_rotate %49 by %c1_i32_42 dim 1 : vector<32x256xf32>, i32 -> vector<32x256xf32>
    %c3_43 = arith.constant 3 : index
    %c0_44 = arith.constant 0 : index
    %66 = vector.load %arg2[%c3_43, %c0_44] : memref<8x256xf32, #tpu.memory_space<vmem>>, vector<1x256xf32>
    %67 = vector.broadcast %66 : vector<1x256xf32> to vector<32x256xf32>
    %68 = arith.mulf %65, %67 : vector<32x256xf32>
    %c96 = arith.constant 96 : index
    %c0_45 = arith.constant 0 : index
    %69 = vector.load %arg9[%c96, %c0_45] : memref<576x256xf32, #tpu.memory_space<vmem>>, vector<32x256xf32>
    tpu.vector_store %arg9[%c96, %c0_45], %68 {strides = array<i32>} : memref<576x256xf32, #tpu.memory_space<vmem>>, vector<32x256xf32>,
    %c128 = arith.constant 128 : index
    %c0_46 = arith.constant 0 : index
    %70 = vector.load %arg9[%c128, %c0_46] : memref<576x256xf32, #tpu.memory_space<vmem>>, vector<32x256xf32>
    tpu.vector_store %arg9[%c128, %c0_46], %49 {strides = array<i32>} : memref<576x256xf32, #tpu.memory_space<vmem>>, vector<32x256xf32>,
    %c255_i32_47 = arith.constant 255 : i32
    %71 = tpu.dynamic_rotate %49 by %c255_i32_47 dim 1 : vector<32x256xf32>, i32 -> vector<32x256xf32>
    %c4_48 = arith.constant 4 : index
    %c0_49 = arith.constant 0 : index
    %72 = vector.load %arg2[%c4_48, %c0_49] : memref<8x256xf32, #tpu.memory_space<vmem>>, vector<1x256xf32>
    %73 = vector.broadcast %72 : vector<1x256xf32> to vector<32x256xf32>
    %74 = arith.mulf %71, %73 : vector<32x256xf32>
    %c160 = arith.constant 160 : index
    %c0_50 = arith.constant 0 : index
    %75 = vector.load %arg9[%c160, %c0_50] : memref<576x256xf32, #tpu.memory_space<vmem>>, vector<32x256xf32>
    tpu.vector_store %arg9[%c160, %c0_50], %74 {strides = array<i32>} : memref<576x256xf32, #tpu.memory_space<vmem>>, vector<32x256xf32>,
    %c241_i32_51 = arith.constant 241 : i32
    %76 = tpu.dynamic_rotate %49 by %c241_i32_51 dim 1 : vector<32x256xf32>, i32 -> vector<32x256xf32>
    %c5_52 = arith.constant 5 : index
    %c0_53 = arith.constant 0 : index
    %77 = vector.load %arg2[%c5_52, %c0_53] : memref<8x256xf32, #tpu.memory_space<vmem>>, vector<1x256xf32>
    %78 = vector.broadcast %77 : vector<1x256xf32> to vector<32x256xf32>
    %79 = arith.mulf %76, %78 : vector<32x256xf32>
    %c192 = arith.constant 192 : index
    %c0_54 = arith.constant 0 : index
    %80 = vector.load %arg9[%c192, %c0_54] : memref<576x256xf32, #tpu.memory_space<vmem>>, vector<32x256xf32>
    tpu.vector_store %arg9[%c192, %c0_54], %79 {strides = array<i32>} : memref<576x256xf32, #tpu.memory_space<vmem>>, vector<32x256xf32>,
    %c240_i32_55 = arith.constant 240 : i32
    %81 = tpu.dynamic_rotate %49 by %c240_i32_55 dim 1 : vector<32x256xf32>, i32 -> vector<32x256xf32>
    %c6_56 = arith.constant 6 : index
    %c0_57 = arith.constant 0 : index
    %82 = vector.load %arg2[%c6_56, %c0_57] : memref<8x256xf32, #tpu.memory_space<vmem>>, vector<1x256xf32>
    %83 = vector.broadcast %82 : vector<1x256xf32> to vector<32x256xf32>
    %84 = arith.mulf %81, %83 : vector<32x256xf32>
    %c224 = arith.constant 224 : index
    %c0_58 = arith.constant 0 : index
    %85 = vector.load %arg9[%c224, %c0_58] : memref<576x256xf32, #tpu.memory_space<vmem>>, vector<32x256xf32>
    tpu.vector_store %arg9[%c224, %c0_58], %84 {strides = array<i32>} : memref<576x256xf32, #tpu.memory_space<vmem>>, vector<32x256xf32>,
    %c239_i32_59 = arith.constant 239 : i32
    %86 = tpu.dynamic_rotate %49 by %c239_i32_59 dim 1 : vector<32x256xf32>, i32 -> vector<32x256xf32>
    %c7_60 = arith.constant 7 : index
    %c0_61 = arith.constant 0 : index
    %87 = vector.load %arg2[%c7_60, %c0_61] : memref<8x256xf32, #tpu.memory_space<vmem>>, vector<1x256xf32>
    %88 = vector.broadcast %87 : vector<1x256xf32> to vector<32x256xf32>
    %89 = arith.mulf %86, %88 : vector<32x256xf32>
    %c256 = arith.constant 256 : index
    %c0_62 = arith.constant 0 : index
    %90 = vector.load %arg9[%c256, %c0_62] : memref<576x256xf32, #tpu.memory_space<vmem>>, vector<32x256xf32>
    tpu.vector_store %arg9[%c256, %c0_62], %89 {strides = array<i32>} : memref<576x256xf32, #tpu.memory_space<vmem>>, vector<32x256xf32>,
    %c0_63 = arith.constant 0 : index
    %c0_64 = arith.constant 0 : index
    %91 = vector.load %arg4[%c0_63, %c0_64] : memref<64x288xf32, #tpu.memory_space<vmem>>, vector<64x288xf32>
    %c0_65 = arith.constant 0 : index
    %c0_66 = arith.constant 0 : index
    %92 = vector.load %arg9[%c0_65, %c0_66] : memref<576x256xf32, #tpu.memory_space<vmem>>, vector<288x256xf32>
    %cst_67 = arith.constant dense<0.000000e+00> : vector<64x256xf32>
    %93 = tpu.matmul %91, %92, %cst_67 {dimension_numbers = #tpu.dot_dimension_numbers<[1], [0], [0], [1], [0, 0, 1, 1], [], []>} : vector<64x288xf32>, vector<288x256xf32>, vector<64x256xf32> -> vector<64x256xf32>
    %c0_68 = arith.constant 0 : index
    %c1_69 = arith.constant 1 : index
    %94 = vector.load %arg7[%c0_68, %c1_69] : memref<64x4xf32, #tpu.memory_space<vmem>>, vector<64x1xf32>
    %95 = vector.broadcast %94 : vector<64x1xf32> to vector<64x256xf32>
    %96 = arith.addf %93, %95 : vector<64x256xf32>
    %cst_70 = arith.constant 0.000000e+00 : f32
    %97 = vector.broadcast %cst_70 : f32 to vector<64x256xf32>
    %98 = arith.maximumf %96, %97 : vector<64x256xf32>
    %c17_i32_71 = arith.constant 17 : i32
    %99 = tpu.dynamic_rotate %98 by %c17_i32_71 dim 1 : vector<64x256xf32>, i32 -> vector<64x256xf32>
    %c0_72 = arith.constant 0 : index
    %c0_73 = arith.constant 0 : index
    %100 = vector.load %arg2[%c0_72, %c0_73] : memref<8x256xf32, #tpu.memory_space<vmem>>, vector<1x256xf32>
    %101 = vector.broadcast %100 : vector<1x256xf32> to vector<64x256xf32>
    %102 = arith.mulf %99, %101 : vector<64x256xf32>
    %c0_74 = arith.constant 0 : index
    %c0_75 = arith.constant 0 : index
    %103 = vector.load %arg9[%c0_74, %c0_75] : memref<576x256xf32, #tpu.memory_space<vmem>>, vector<64x256xf32>
    tpu.vector_store %arg9[%c0_74, %c0_75], %102 {strides = array<i32>} : memref<576x256xf32, #tpu.memory_space<vmem>>, vector<64x256xf32>,
    %c16_i32_76 = arith.constant 16 : i32
    %104 = tpu.dynamic_rotate %98 by %c16_i32_76 dim 1 : vector<64x256xf32>, i32 -> vector<64x256xf32>
    %c1_77 = arith.constant 1 : index
    %c0_78 = arith.constant 0 : index
    %105 = vector.load %arg2[%c1_77, %c0_78] : memref<8x256xf32, #tpu.memory_space<vmem>>, vector<1x256xf32>
    %106 = vector.broadcast %105 : vector<1x256xf32> to vector<64x256xf32>
    %107 = arith.mulf %104, %106 : vector<64x256xf32>
    %c64_79 = arith.constant 64 : index
    %c0_80 = arith.constant 0 : index
    %108 = vector.load %arg9[%c64_79, %c0_80] : memref<576x256xf32, #tpu.memory_space<vmem>>, vector<64x256xf32>
    tpu.vector_store %arg9[%c64_79, %c0_80], %107 {strides = array<i32>} : memref<576x256xf32, #tpu.memory_space<vmem>>, vector<64x256xf32>,
    %c15_i32_81 = arith.constant 15 : i32
    %109 = tpu.dynamic_rotate %98 by %c15_i32_81 dim 1 : vector<64x256xf32>, i32 -> vector<64x256xf32>
    %c2_82 = arith.constant 2 : index
    %c0_83 = arith.constant 0 : index
    %110 = vector.load %arg2[%c2_82, %c0_83] : memref<8x256xf32, #tpu.memory_space<vmem>>, vector<1x256xf32>
    %111 = vector.broadcast %110 : vector<1x256xf32> to vector<64x256xf32>
    %112 = arith.mulf %109, %111 : vector<64x256xf32>
    %c128_84 = arith.constant 128 : index
    %c0_85 = arith.constant 0 : index
    %113 = vector.load %arg9[%c128_84, %c0_85] : memref<576x256xf32, #tpu.memory_space<vmem>>, vector<64x256xf32>
    tpu.vector_store %arg9[%c128_84, %c0_85], %112 {strides = array<i32>} : memref<576x256xf32, #tpu.memory_space<vmem>>, vector<64x256xf32>,
    %c1_i32_86 = arith.constant 1 : i32
    %114 = tpu.dynamic_rotate %98 by %c1_i32_86 dim 1 : vector<64x256xf32>, i32 -> vector<64x256xf32>
    %c3_87 = arith.constant 3 : index
    %c0_88 = arith.constant 0 : index
    %115 = vector.load %arg2[%c3_87, %c0_88] : memref<8x256xf32, #tpu.memory_space<vmem>>, vector<1x256xf32>
    %116 = vector.broadcast %115 : vector<1x256xf32> to vector<64x256xf32>
    %117 = arith.mulf %114, %116 : vector<64x256xf32>
    %c192_89 = arith.constant 192 : index
    %c0_90 = arith.constant 0 : index
    %118 = vector.load %arg9[%c192_89, %c0_90] : memref<576x256xf32, #tpu.memory_space<vmem>>, vector<64x256xf32>
    tpu.vector_store %arg9[%c192_89, %c0_90], %117 {strides = array<i32>} : memref<576x256xf32, #tpu.memory_space<vmem>>, vector<64x256xf32>,
    %c256_91 = arith.constant 256 : index
    %c0_92 = arith.constant 0 : index
    %119 = vector.load %arg9[%c256_91, %c0_92] : memref<576x256xf32, #tpu.memory_space<vmem>>, vector<64x256xf32>
    tpu.vector_store %arg9[%c256_91, %c0_92], %98 {strides = array<i32>} : memref<576x256xf32, #tpu.memory_space<vmem>>, vector<64x256xf32>,
    %c255_i32_93 = arith.constant 255 : i32
    %120 = tpu.dynamic_rotate %98 by %c255_i32_93 dim 1 : vector<64x256xf32>, i32 -> vector<64x256xf32>
    %c4_94 = arith.constant 4 : index
    %c0_95 = arith.constant 0 : index
    %121 = vector.load %arg2[%c4_94, %c0_95] : memref<8x256xf32, #tpu.memory_space<vmem>>, vector<1x256xf32>
    %122 = vector.broadcast %121 : vector<1x256xf32> to vector<64x256xf32>
    %123 = arith.mulf %120, %122 : vector<64x256xf32>
    %c320 = arith.constant 320 : index
    %c0_96 = arith.constant 0 : index
    %124 = vector.load %arg9[%c320, %c0_96] : memref<576x256xf32, #tpu.memory_space<vmem>>, vector<64x256xf32>
    tpu.vector_store %arg9[%c320, %c0_96], %123 {strides = array<i32>} : memref<576x256xf32, #tpu.memory_space<vmem>>, vector<64x256xf32>,
    %c241_i32_97 = arith.constant 241 : i32
    %125 = tpu.dynamic_rotate %98 by %c241_i32_97 dim 1 : vector<64x256xf32>, i32 -> vector<64x256xf32>
    %c5_98 = arith.constant 5 : index
    %c0_99 = arith.constant 0 : index
    %126 = vector.load %arg2[%c5_98, %c0_99] : memref<8x256xf32, #tpu.memory_space<vmem>>, vector<1x256xf32>
    %127 = vector.broadcast %126 : vector<1x256xf32> to vector<64x256xf32>
    %128 = arith.mulf %125, %127 : vector<64x256xf32>
    %c384 = arith.constant 384 : index
    %c0_100 = arith.constant 0 : index
    %129 = vector.load %arg9[%c384, %c0_100] : memref<576x256xf32, #tpu.memory_space<vmem>>, vector<64x256xf32>
    tpu.vector_store %arg9[%c384, %c0_100], %128 {strides = array<i32>} : memref<576x256xf32, #tpu.memory_space<vmem>>, vector<64x256xf32>,
    %c240_i32_101 = arith.constant 240 : i32
    %130 = tpu.dynamic_rotate %98 by %c240_i32_101 dim 1 : vector<64x256xf32>, i32 -> vector<64x256xf32>
    %c6_102 = arith.constant 6 : index
    %c0_103 = arith.constant 0 : index
    %131 = vector.load %arg2[%c6_102, %c0_103] : memref<8x256xf32, #tpu.memory_space<vmem>>, vector<1x256xf32>
    %132 = vector.broadcast %131 : vector<1x256xf32> to vector<64x256xf32>
    %133 = arith.mulf %130, %132 : vector<64x256xf32>
    %c448 = arith.constant 448 : index
    %c0_104 = arith.constant 0 : index
    %134 = vector.load %arg9[%c448, %c0_104] : memref<576x256xf32, #tpu.memory_space<vmem>>, vector<64x256xf32>
    tpu.vector_store %arg9[%c448, %c0_104], %133 {strides = array<i32>} : memref<576x256xf32, #tpu.memory_space<vmem>>, vector<64x256xf32>,
    %c239_i32_105 = arith.constant 239 : i32
    %135 = tpu.dynamic_rotate %98 by %c239_i32_105 dim 1 : vector<64x256xf32>, i32 -> vector<64x256xf32>
    %c7_106 = arith.constant 7 : index
    %c0_107 = arith.constant 0 : index
    %136 = vector.load %arg2[%c7_106, %c0_107] : memref<8x256xf32, #tpu.memory_space<vmem>>, vector<1x256xf32>
    %137 = vector.broadcast %136 : vector<1x256xf32> to vector<64x256xf32>
    %138 = arith.mulf %135, %137 : vector<64x256xf32>
    %c512 = arith.constant 512 : index
    %c0_108 = arith.constant 0 : index
    %139 = vector.load %arg9[%c512, %c0_108] : memref<576x256xf32, #tpu.memory_space<vmem>>, vector<64x256xf32>
    tpu.vector_store %arg9[%c512, %c0_108], %138 {strides = array<i32>} : memref<576x256xf32, #tpu.memory_space<vmem>>, vector<64x256xf32>,
    %c0_109 = arith.constant 0 : index
    %c0_110 = arith.constant 0 : index
    %140 = vector.load %arg5[%c0_109, %c0_110] : memref<32x576xf32, #tpu.memory_space<vmem>>, vector<32x576xf32>
    %c0_111 = arith.constant 0 : index
    %c0_112 = arith.constant 0 : index
    %141 = vector.load %arg9[%c0_111, %c0_112] : memref<576x256xf32, #tpu.memory_space<vmem>>, vector<576x256xf32>
    %cst_113 = arith.constant dense<0.000000e+00> : vector<32x256xf32>
    %142 = tpu.matmul %140, %141, %cst_113 {dimension_numbers = #tpu.dot_dimension_numbers<[1], [0], [0], [1], [0, 0, 1, 1], [], []>} : vector<32x576xf32>, vector<576x256xf32>, vector<32x256xf32> -> vector<32x256xf32>
    %c0_114 = arith.constant 0 : index
    %c2_115 = arith.constant 2 : index
    %143 = vector.load %arg7[%c0_114, %c2_115] : memref<64x4xf32, #tpu.memory_space<vmem>>, vector<32x1xf32>
    %144 = vector.broadcast %143 : vector<32x1xf32> to vector<32x256xf32>
    %145 = arith.addf %142, %144 : vector<32x256xf32>
    %cst_116 = arith.constant 0.000000e+00 : f32
    %146 = vector.broadcast %cst_116 : f32 to vector<32x256xf32>
    %147 = arith.maximumf %145, %146 : vector<32x256xf32>
    %c17_i32_117 = arith.constant 17 : i32
    %148 = tpu.dynamic_rotate %147 by %c17_i32_117 dim 1 : vector<32x256xf32>, i32 -> vector<32x256xf32>
    %c0_118 = arith.constant 0 : index
    %c0_119 = arith.constant 0 : index
    %149 = vector.load %arg2[%c0_118, %c0_119] : memref<8x256xf32, #tpu.memory_space<vmem>>, vector<1x256xf32>
    %150 = vector.broadcast %149 : vector<1x256xf32> to vector<32x256xf32>
    %151 = arith.mulf %148, %150 : vector<32x256xf32>
    %c0_120 = arith.constant 0 : index
    %c0_121 = arith.constant 0 : index
    %152 = vector.load %arg9[%c0_120, %c0_121] : memref<576x256xf32, #tpu.memory_space<vmem>>, vector<32x256xf32>
    tpu.vector_store %arg9[%c0_120, %c0_121], %151 {strides = array<i32>} : memref<576x256xf32, #tpu.memory_space<vmem>>, vector<32x256xf32>,
    %c16_i32_122 = arith.constant 16 : i32
    %153 = tpu.dynamic_rotate %147 by %c16_i32_122 dim 1 : vector<32x256xf32>, i32 -> vector<32x256xf32>
    %c1_123 = arith.constant 1 : index
    %c0_124 = arith.constant 0 : index
    %154 = vector.load %arg2[%c1_123, %c0_124] : memref<8x256xf32, #tpu.memory_space<vmem>>, vector<1x256xf32>
    %155 = vector.broadcast %154 : vector<1x256xf32> to vector<32x256xf32>
    %156 = arith.mulf %153, %155 : vector<32x256xf32>
    %c32_125 = arith.constant 32 : index
    %c0_126 = arith.constant 0 : index
    %157 = vector.load %arg9[%c32_125, %c0_126] : memref<576x256xf32, #tpu.memory_space<vmem>>, vector<32x256xf32>
    tpu.vector_store %arg9[%c32_125, %c0_126], %156 {strides = array<i32>} : memref<576x256xf32, #tpu.memory_space<vmem>>, vector<32x256xf32>,
    %c15_i32_127 = arith.constant 15 : i32
    %158 = tpu.dynamic_rotate %147 by %c15_i32_127 dim 1 : vector<32x256xf32>, i32 -> vector<32x256xf32>
    %c2_128 = arith.constant 2 : index
    %c0_129 = arith.constant 0 : index
    %159 = vector.load %arg2[%c2_128, %c0_129] : memref<8x256xf32, #tpu.memory_space<vmem>>, vector<1x256xf32>
    %160 = vector.broadcast %159 : vector<1x256xf32> to vector<32x256xf32>
    %161 = arith.mulf %158, %160 : vector<32x256xf32>
    %c64_130 = arith.constant 64 : index
    %c0_131 = arith.constant 0 : index
    %162 = vector.load %arg9[%c64_130, %c0_131] : memref<576x256xf32, #tpu.memory_space<vmem>>, vector<32x256xf32>
    tpu.vector_store %arg9[%c64_130, %c0_131], %161 {strides = array<i32>} : memref<576x256xf32, #tpu.memory_space<vmem>>, vector<32x256xf32>,
    %c1_i32_132 = arith.constant 1 : i32
    %163 = tpu.dynamic_rotate %147 by %c1_i32_132 dim 1 : vector<32x256xf32>, i32 -> vector<32x256xf32>
    %c3_133 = arith.constant 3 : index
    %c0_134 = arith.constant 0 : index
    %164 = vector.load %arg2[%c3_133, %c0_134] : memref<8x256xf32, #tpu.memory_space<vmem>>, vector<1x256xf32>
    %165 = vector.broadcast %164 : vector<1x256xf32> to vector<32x256xf32>
    %166 = arith.mulf %163, %165 : vector<32x256xf32>
    %c96_135 = arith.constant 96 : index
    %c0_136 = arith.constant 0 : index
    %167 = vector.load %arg9[%c96_135, %c0_136] : memref<576x256xf32, #tpu.memory_space<vmem>>, vector<32x256xf32>
    tpu.vector_store %arg9[%c96_135, %c0_136], %166 {strides = array<i32>} : memref<576x256xf32, #tpu.memory_space<vmem>>, vector<32x256xf32>,
    %c128_137 = arith.constant 128 : index
    %c0_138 = arith.constant 0 : index
    %168 = vector.load %arg9[%c128_137, %c0_138] : memref<576x256xf32, #tpu.memory_space<vmem>>, vector<32x256xf32>
    tpu.vector_store %arg9[%c128_137, %c0_138], %147 {strides = array<i32>} : memref<576x256xf32, #tpu.memory_space<vmem>>, vector<32x256xf32>,
    %c255_i32_139 = arith.constant 255 : i32
    %169 = tpu.dynamic_rotate %147 by %c255_i32_139 dim 1 : vector<32x256xf32>, i32 -> vector<32x256xf32>
    %c4_140 = arith.constant 4 : index
    %c0_141 = arith.constant 0 : index
    %170 = vector.load %arg2[%c4_140, %c0_141] : memref<8x256xf32, #tpu.memory_space<vmem>>, vector<1x256xf32>
    %171 = vector.broadcast %170 : vector<1x256xf32> to vector<32x256xf32>
    %172 = arith.mulf %169, %171 : vector<32x256xf32>
    %c160_142 = arith.constant 160 : index
    %c0_143 = arith.constant 0 : index
    %173 = vector.load %arg9[%c160_142, %c0_143] : memref<576x256xf32, #tpu.memory_space<vmem>>, vector<32x256xf32>
    tpu.vector_store %arg9[%c160_142, %c0_143], %172 {strides = array<i32>} : memref<576x256xf32, #tpu.memory_space<vmem>>, vector<32x256xf32>,
    %c241_i32_144 = arith.constant 241 : i32
    %174 = tpu.dynamic_rotate %147 by %c241_i32_144 dim 1 : vector<32x256xf32>, i32 -> vector<32x256xf32>
    %c5_145 = arith.constant 5 : index
    %c0_146 = arith.constant 0 : index
    %175 = vector.load %arg2[%c5_145, %c0_146] : memref<8x256xf32, #tpu.memory_space<vmem>>, vector<1x256xf32>
    %176 = vector.broadcast %175 : vector<1x256xf32> to vector<32x256xf32>
    %177 = arith.mulf %174, %176 : vector<32x256xf32>
    %c192_147 = arith.constant 192 : index
    %c0_148 = arith.constant 0 : index
    %178 = vector.load %arg9[%c192_147, %c0_148] : memref<576x256xf32, #tpu.memory_space<vmem>>, vector<32x256xf32>
    tpu.vector_store %arg9[%c192_147, %c0_148], %177 {strides = array<i32>} : memref<576x256xf32, #tpu.memory_space<vmem>>, vector<32x256xf32>,
    %c240_i32_149 = arith.constant 240 : i32
    %179 = tpu.dynamic_rotate %147 by %c240_i32_149 dim 1 : vector<32x256xf32>, i32 -> vector<32x256xf32>
    %c6_150 = arith.constant 6 : index
    %c0_151 = arith.constant 0 : index
    %180 = vector.load %arg2[%c6_150, %c0_151] : memref<8x256xf32, #tpu.memory_space<vmem>>, vector<1x256xf32>
    %181 = vector.broadcast %180 : vector<1x256xf32> to vector<32x256xf32>
    %182 = arith.mulf %179, %181 : vector<32x256xf32>
    %c224_152 = arith.constant 224 : index
    %c0_153 = arith.constant 0 : index
    %183 = vector.load %arg9[%c224_152, %c0_153] : memref<576x256xf32, #tpu.memory_space<vmem>>, vector<32x256xf32>
    tpu.vector_store %arg9[%c224_152, %c0_153], %182 {strides = array<i32>} : memref<576x256xf32, #tpu.memory_space<vmem>>, vector<32x256xf32>,
    %c239_i32_154 = arith.constant 239 : i32
    %184 = tpu.dynamic_rotate %147 by %c239_i32_154 dim 1 : vector<32x256xf32>, i32 -> vector<32x256xf32>
    %c7_155 = arith.constant 7 : index
    %c0_156 = arith.constant 0 : index
    %185 = vector.load %arg2[%c7_155, %c0_156] : memref<8x256xf32, #tpu.memory_space<vmem>>, vector<1x256xf32>
    %186 = vector.broadcast %185 : vector<1x256xf32> to vector<32x256xf32>
    %187 = arith.mulf %184, %186 : vector<32x256xf32>
    %c256_157 = arith.constant 256 : index
    %c0_158 = arith.constant 0 : index
    %188 = vector.load %arg9[%c256_157, %c0_158] : memref<576x256xf32, #tpu.memory_space<vmem>>, vector<32x256xf32>
    tpu.vector_store %arg9[%c256_157, %c0_158], %187 {strides = array<i32>} : memref<576x256xf32, #tpu.memory_space<vmem>>, vector<32x256xf32>,
    %c0_159 = arith.constant 0 : index
    %c0_160 = arith.constant 0 : index
    %189 = vector.load %arg6[%c0_159, %c0_160] : memref<8x288xf32, #tpu.memory_space<vmem>>, vector<8x288xf32>
    %c0_161 = arith.constant 0 : index
    %c0_162 = arith.constant 0 : index
    %190 = vector.load %arg9[%c0_161, %c0_162] : memref<576x256xf32, #tpu.memory_space<vmem>>, vector<288x256xf32>
    %cst_163 = arith.constant dense<0.000000e+00> : vector<8x256xf32>
    %191 = tpu.matmul %189, %190, %cst_163 {dimension_numbers = #tpu.dot_dimension_numbers<[1], [0], [0], [1], [0, 0, 1, 1], [], []>} : vector<8x288xf32>, vector<288x256xf32>, vector<8x256xf32> -> vector<8x256xf32>
    %c0_164 = arith.constant 0 : index
    %c3_165 = arith.constant 3 : index
    %192 = vector.load %arg7[%c0_164, %c3_165] : memref<64x4xf32, #tpu.memory_space<vmem>>, vector<1x1xf32>
    %193 = vector.broadcast %192 : vector<1x1xf32> to vector<8x256xf32>
    %194 = arith.addf %191, %193 : vector<8x256xf32>
    %c0_166 = arith.constant 0 : index
    %c0_167 = arith.constant 0 : index
    %195 = vector.load %arg8[%c0_166, %c0_167] : memref<8x256xf32, #tpu.memory_space<vmem>>, vector<8x256xf32>
    tpu.vector_store %arg8[%c0_166, %c0_167], %194 {strides = array<i32>} : memref<8x256xf32, #tpu.memory_space<vmem>>, vector<8x256xf32>,
    return
  }
  func.func @transform_0(%arg0: i32) -> (i32, i32) {
    %c0_i32 = arith.constant 0 : i32
    %c0_i32_0 = arith.constant 0 : i32
    return %c0_i32, %arg0 : i32, i32
  }
  func.func @transform_1(%arg0: i32) -> (i32, i32) {
    %c0_i32 = arith.constant 0 : i32
    %c0_i32_0 = arith.constant 0 : i32
    %c0_i32_1 = arith.constant 0 : i32
    return %c0_i32, %c0_i32_0 : i32, i32
  }
  func.func @transform_2(%arg0: i32) -> (i32, i32) {
    %c0_i32 = arith.constant 0 : i32
    %c0_i32_0 = arith.constant 0 : i32
    %c0_i32_1 = arith.constant 0 : i32
    return %c0_i32, %c0_i32_0 : i32, i32
  }
  func.func @transform_3(%arg0: i32) -> (i32, i32) {
    %c0_i32 = arith.constant 0 : i32
    %c0_i32_0 = arith.constant 0 : i32
    %c0_i32_1 = arith.constant 0 : i32
    return %c0_i32, %c0_i32_0 : i32, i32
  }
  func.func @transform_4(%arg0: i32) -> (i32, i32) {
    %c0_i32 = arith.constant 0 : i32
    %c0_i32_0 = arith.constant 0 : i32
    %c0_i32_1 = arith.constant 0 : i32
    return %c0_i32, %c0_i32_0 : i32, i32
  }
  func.func @transform_5(%arg0: i32) -> (i32, i32) {
    %c0_i32 = arith.constant 0 : i32
    %c0_i32_0 = arith.constant 0 : i32
    %c0_i32_1 = arith.constant 0 : i32
    return %c0_i32, %c0_i32_0 : i32, i32
  }
  func.func @transform_6(%arg0: i32) -> (i32, i32) {
    %c0_i32 = arith.constant 0 : i32
    %c0_i32_0 = arith.constant 0 : i32
    %c0_i32_1 = arith.constant 0 : i32
    return %c0_i32, %c0_i32_0 : i32, i32
  }
  func.func @transform_7(%arg0: i32) -> (i32, i32) {
    %c0_i32 = arith.constant 0 : i32
    %c0_i32_0 = arith.constant 0 : i32
    return %c0_i32, %arg0 : i32, i32
  }
}

</mosaic_0001>

<bundles_post_ra>
// kernel: squeeze.1
= control target key start
LH: loop header
LB: loop body
LE: loop exit
PB: predicated region body
PF: predicated region fallthrough
CT: control target
= control target key end

     0   :  { %s135_s0 = inlined_call_operand.vmem [shape: f32[512], index: 0, kind: input, shape index: {}]   ;;  %s136_s1 = inlined_call_operand.hbm [shape: f32[2,1,16,16], index: 1, kind: output, shape index: {}]  }
   0x1   :  { %v5_v0 = vld [vmem:[%s135_s0] sm:$0xf] }
   0x2   :  { %6 = vst [vmem:[#allocation2] sm:$0xf] %v5_v0 }
   0x3   :  { %2 = vsyncpa [#allocation1], 0  ;;  %s94_s0 = smov 112   ;;  %s95_s8 = smov 80   ;;  %vm8_vm0 = vcmask 130048  }
   0x4   :  { %s96_s9 = smov 96   ;;  %s97_s10 = smov 64  }
   0x5   :  { %s98_s11 = smov 48   ;;  %s99_s12 = smov 32  }
   0x6   :  { %s100_s13 = smov 16   ;;  %s101_s14 = smov [#allocation0]  }
   0x7   :  { %s56_s15 = sshll.u32 %s101_s14, 4  ;;  %s57_s15 = int_to_ptr.vmem [resolvable:$true] %s56_s15 }
   0x8   :  { %s70_s16 = scalar_lea.vmem %s57_s15, 512  ;;  %p75_p1 = scmp.lt.s32.totalorder %s57_s15, %s57_s15 }
   0x9   :  { %v10_v1 = vld [vmem:[#allocation2] sm:$0xf]   ;;  %p71_p0 = scmp.ne.s32.totalorder %s57_s15, %s70_s16  ;;  %p76_p2 = scmp.lt.s32.totalorder %s70_s16, %s70_s16 }
   0xa   :  { %v22_v2 = vld [vmem:[#allocation2] sm:$0xf]   ;;  %11 = vrot.lane.b32.xlu0 %v10_v1, %s94_s0 }
   0xb   :  { %23 = vrot.lane.b32.xlu1 %v22_v2, %s95_s8  ;;  %v16_v3 = vld [vmem:[#allocation2] sm:$0xf]   ;;  %p77_p3 = por %p76_p2, %p75_p1 }
   0xc   :  { %v28_v4 = vld [vmem:[#allocation2] sm:$0xf]  }
   0xd   :  { %v7_v5 = vld [vmem:[#allocation2] sm:$0xf]   ;;  %p78_p4 = pnand %p77_p3, %p71_p0 }
   0xe   :  { %9 = vst.msk [vmem:[#allocation0] ss:$8 sm:$0xf] %vm8_vm0, %v7_v5   ;;  %17 = vrot.lane.b32.xlu0 %v16_v3, %s96_s9  ;;  %v34_v6 = vld [vmem:[#allocation2] sm:$0xf]  }
   0xf   :  { %29 = vrot.lane.b32.xlu1 %v28_v4, %s97_s10  ;;  %v40_v7 = vld [vmem:[#allocation2] sm:$0xf]  }
  0x10   :  { %v46_v8 = vld [vmem:[#allocation2] sm:$0xf]  }
  0x12   :  { %35 = vrot.lane.b32.xlu0 %v34_v6, %s98_s11 }
  0x13   :  { %41 = vrot.lane.b32.xlu1 %v40_v7, %s99_s12 }
  0x16   :  { %47 = vrot.lane.b32.xlu0 %v46_v8, %s100_s13 }
  0x7c   :  { %v12_v9 = vpop.permute.xlu0 %11  }
  0x7d   :  { %v24_v10 = vpop.permute.xlu1 %23   ;;  %15 = vst.msk [vmem:[#allocation0 + $0x1] ss:$8 sm:$0xf] %vm8_vm0, %v12_v9  }
  0x7e   :  { %27 = vst.msk [vmem:[#allocation0 + $0x3] ss:$8 sm:$0xf] %vm8_vm0, %v24_v10  }
  0x80   :  { %v18_v11 = vpop.permute.xlu0 %17  }
  0x81   :  { %v30_v12 = vpop.permute.xlu1 %29   ;;  %21 = vst.msk [vmem:[#allocation0 + $0x2] ss:$8 sm:$0xf] %vm8_vm0, %v18_v11  }
  0x82   :  { %33 = vst.msk [vmem:[#allocation0 + $0x4] ss:$8 sm:$0xf] %vm8_vm0, %v30_v12  }
  0x84   :  { %v36_v13 = vpop.permute.xlu0 %35  }
  0x85   :  { %v42_v14 = vpop.permute.xlu1 %41   ;;  %39 = vst.msk [vmem:[#allocation0 + $0x5] ss:$8 sm:$0xf] %vm8_vm0, %v36_v13  }
  0x86   :  { %45 = vst.msk [vmem:[#allocation0 + $0x6] ss:$8 sm:$0xf] %vm8_vm0, %v42_v14  }
  0x88   :  { %v48_v15 = vpop.permute.xlu0 %47  }
  0x89   :  { %51 = vst.msk [vmem:[#allocation0 + $0x7] ss:$8 sm:$0xf] %vm8_vm0, %v48_v15  }
  0x8a   :  { %81 = shalt.err (!%p78_p4)
}
  0x8b   :  { %s82_s19 = scalar_lea.hbm %s136_s1, 512 }
  0x8c   :  { %p83_p5 = scmp.ne.s32.totalorder %s136_s1, %s82_s19  ;;  %p86_p6 = scmp.lt.u32.totalorder %s82_s19, %s136_s1 }
  0x8e   :  { %p88_p7 = pnand %p86_p6, %p83_p5 }
  0x90   :  { %91 = shalt.err (!%p88_p7)
}
  0x91   :  { %59 = dma.vmem_to_hbm [thread:$0]  %s57_s15, 512, %s136_s1, [#allocation1]  }
  0x92   :  { %92 = dma.done.wait [#allocation1], 512  }
  0x93   :  { %93 = vsyncadd [#allocation1], 4294966784 }
  0x94   :  { %61 = vsyncpa [#allocation1], 1 }

// kernel: unet_forward.1
= control target key start
LH: loop header
LB: loop body
LE: loop exit
PB: predicated region body
PF: predicated region fallthrough
CT: control target
= control target key end

     0   :  { %s3917_s24 = smov 0   ;;  %s6270_s0 = inlined_call_operand.vmem [shape: f32[8,512], index: 0, kind: input, shape index: {}]   ;;  %s6271_s1 = inlined_call_operand.vmem [shape: f32[8,256], index: 1, kind: input, shape index: {}]   ;;  %s6272_s2 = inlined_call_operand.vmem [shape: f32[32,72], index: 2, kind: input, shape index: {}]   ;;  %s6273_s3 = inlined_call_operand.vmem [shape: f32[64,288], index: 3, kind: input, shape index: {}]   ;;  %s6274_s4 = inlined_call_operand.vmem [shape: f32[32,576], index: 4, kind: input, shape index: {}]   ;;  %s6275_s5 = inlined_call_operand.vmem [shape: f32[8,288], index: 5, kind: input, shape index: {}]   ;;  %s6276_s6 = inlined_call_operand.vmem [shape: f32[64,4], index: 6, kind: input, shape index: {}]   ;;  %s6277_s7 = inlined_call_operand.vmem [shape: f32[8,512], index: 7, kind: output, shape index: {}]  }
   0x1 LB: > { %s3407_s25 = sadd.s32 4294967295, %s3862_s24   ;;  %p3411_p0 = scmp.ge.s32.totalorder %s3862_s24, 1  ;;  %s3862_s24 = sphi %s3917_s24, %s17_s24  }
   0x2   : > { %p238_p1 = scmp.lt.s32.totalorder %s3862_s24, 3 }
   0x4   : > { %p239_p2 = pnand %p3411_p0, %p238_p1 }
   0x6   : > { %242 = sbr.rel (%p239_p2) target bundleno = 1935 (0x78f), region = 48 }
   0xd   : > { %s3412_s26 = sshll.u32 %s3407_s25, 1  ;;  %s3864_s8 = smov 16   ;;  %v6278_v2 = vmov 0.0   ;;  %v3973_v3 = vld [vmem:[%s6276_s6 + $0x8] sm:$0xff]  ;;  %v3978_v4 = vld [vmem:[%s6276_s6] sm:$0xff]  ;;  %v3873_v5 = vmov 0   ;;  %v288_v8 = vlaneseq }
   0xe   : > { %p271_p3 = scmp.lt.s32.totalorder %s3412_s26, 3  ;;  %s3865_s9 = smov 17   ;;  %602 = vmatprep.mubr.f32.mxu0 %v6278_v2  ;;  %3851 = vset.pattern.permute.xlu1 %v3873_v5  ;;  %v3985_v6 = vld [vmem:[%s6276_s6 + $0x10] sm:$0xff]  ;;  %v3990_v7 = vld [vmem:[%s6276_s6 + $0x18] sm:$0xff]  ;;  %vm525_vm8 = vcmask 588800   ;;  %vm1203_vm9 = vcmask 261120  }
   0xf   : > { %s3866_s10 = smov 15   ;;  %s3867_s11 = smov 1   ;;  %3850 = vset.pattern.permute.xlu0 %v3873_v5  ;;  %v296_v9 = vshrl.u32 %v288_v8, 7  ;;  %v3994_v10 = vand.u32 127, %v288_v8  ;;  %vm2410_vm10 = vcmask 523264  }
  0x10   : > { %s6358_s26 = smov (!%p271_p3, %s3412_s26), 3  ;;  %s3868_s12 = smov 127   ;;  %v293_v13 = vld [vmem:[%s6271_s1] ss:$8 sm:$0x3] }
  0x11   : > { %s3413_s27 = sshll.u32 %s6358_s26, 3  ;;  %s3869_s13 = smov 113   ;;  %v3996_v11 = vsub.s32 0, %v296_v9  ;;  %v3998_v12 = vsub.s32 1, %v296_v9  ;;  %vm313_vm0 = vcmp.lt.s32.totalorder %v3994_v10, 16  ;;  %vm290_vm1 = vcmp.lt.s32.totalorder %v3994_v10, 17 }
  0x12   : > { %s274_s30 = scalar_lea.vmem %s6270_s0, %s3413_s27  ;;  %s3871_s14 = smov 112   ;;  %v3416_v14 = vld [vmem:[%s6271_s1 + $0x1] ss:$8 sm:$0x3]  ;;  %vm337_vm2 = vcmp.lt.s32.totalorder %v3994_v10, 15  ;;  %vm361_vm3 = vcmp.lt.s32.totalorder %v3994_v10, 1 }
  0x13   : > { %v3933_v0 = vld [vmem:[%s274_s30] sm:$0xff]  ;;  %v3939_v1 = vld [vmem:[%s274_s30 + $0x8] sm:$0xff]  ;;  %s3872_s15 = smov 111   ;;  %v302_v17 = vrot.slane %v293_v13, %v3998_v12  ;;  %v326_v18 = vrot.slane %v3416_v14, %v3998_v12  ;;  %v298_v19 = vrot.slane %v293_v13, %v3996_v11  ;;  %v322_v20 = vrot.slane %v3416_v14, %v3996_v11  ;;  %s280_s16 = scalar_lea.vmem %s6277_s7, %s3413_s27 }
  0x14   : > { %309 = vrot.lane.b32.xlu1 %v3933_v0, %s3864_s8  ;;  %284 = vrot.lane.b32.xlu0 %v3933_v0, %s3865_s9  ;;  %v3417_v27 = vld [vmem:[%s6271_s1 + $0x2] ss:$8 sm:$0x3]  ;;  %v3418_v32 = vld [vmem:[%s6271_s1 + $0x3] ss:$8 sm:$0x3] }
  0x15   : > { %v346_v37 = vrot.slane %v3417_v27, %v3996_v11  ;;  %v350_v38 = vrot.slane %v3417_v27, %v3998_v12  ;;  %v370_v39 = vrot.slane %v3418_v32, %v3996_v11  ;;  %v374_v40 = vrot.slane %v3418_v32, %v3998_v12  ;;  %v3419_v41 = vld [vmem:[%s6271_s1 + $0x4] ss:$8 sm:$0x3]  ;;  %v3420_v62 = vld [vmem:[%s6271_s1 + $0x5] ss:$8 sm:$0x3] }
  0x16   : > { %vm387_vm4 = vcmp.lt.s32.totalorder %v3994_v10, 127  ;;  %v396_v48 = vrot.slane %v3419_v41, %v3996_v11  ;;  %v400_v49 = vrot.slane %v3419_v41, %v3998_v12  ;;  %v3421_v63 = vld [vmem:[%s6271_s1 + $0x6] ss:$8 sm:$0x3]  ;;  %vm411_vm5 = vcmp.lt.s32.totalorder %v3994_v10, 113 }
  0x17   : > { %v420_v14 = vrot.slane %v3420_v62, %v3996_v11  ;;  %vm435_vm6 = vcmp.lt.s32.totalorder %v3994_v10, 112  ;;  %vm459_vm7 = vcmp.lt.s32.totalorder %v3994_v10, 111 }
  0x18   : > { %311 = vrot.lane.b32.xlu1 %v3939_v1, %s3864_s8  ;;  %286 = vrot.lane.b32.xlu0 %v3939_v1, %s3865_s9 }
  0x1c   : > { %335 = vrot.lane.b32.xlu1 %v3939_v1, %s3866_s10  ;;  %333 = vrot.lane.b32.xlu0 %v3933_v0, %s3866_s10 }
  0x20   : > { %359 = vrot.lane.b32.xlu1 %v3939_v1, %s3867_s11  ;;  %357 = vrot.lane.b32.xlu0 %v3933_v0, %s3867_s11 }
  0x24   : > { %385 = vrot.lane.b32.xlu1 %v3939_v1, %s3868_s12  ;;  %383 = vrot.lane.b32.xlu0 %v3933_v0, %s3868_s12 }
  0x28   : > { %409 = vrot.lane.b32.xlu1 %v3939_v1, %s3869_s13  ;;  %407 = vrot.lane.b32.xlu0 %v3933_v0, %s3869_s13 }
  0x2c   : > { %433 = vrot.lane.b32.xlu1 %v3939_v1, %s3871_s14  ;;  %431 = vrot.lane.b32.xlu0 %v3933_v0, %s3871_s14 }
  0x30   : > { %457 = vrot.lane.b32.xlu1 %v3939_v1, %s3872_s15  ;;  %455 = vrot.lane.b32.xlu0 %v3933_v0, %s3872_s15 }
  0x34   : > { %512 = vperm.xlu1 %3851, %v3973_v3   ;;  %507 = vperm.xlu0 %3850, %v3978_v4  }
  0x38   : > { %517 = vperm.xlu1 %3851, %v3985_v6   ;;  %522 = vperm.xlu0 %3850, %v3990_v7  }
  0x86   : > { %v310_v15 = vpop.permute.xlu1 %309  ;;  %v285_v16 = vpop.permute.xlu0 %284 }
  0x8a   : > { %v312_v21 = vpop.permute.xlu1 %311  ;;  %v287_v22 = vpop.permute.xlu0 %286 }
  0x8b   : > { %v315_v23 = vsel %vm313_vm0, %v312_v21, %v310_v15  ;;  %v292_v24 = vsel %vm290_vm1, %v287_v22, %v285_v16  ;;  %v291_v25 = vsel %vm290_vm1, %v285_v16, %v287_v22  ;;  %v314_v26 = vsel %vm313_vm0, %v310_v15, %v312_v21 }
  0x8c   : > { %v306_v28 = vmul.f32 %v302_v17, %v291_v25  ;;  %v330_v29 = vmul.f32 %v326_v18, %v314_v26  ;;  %v305_v30 = vmul.f32 %v298_v19, %v292_v24  ;;  %v329_v31 = vmul.f32 %v322_v20, %v315_v23  ;;  %v3422_v18 = vld [vmem:[%s6271_s1 + $0x7] ss:$8 sm:$0x3] }
  0x8d   : > { %v424_v15 = vrot.slane %v3420_v62, %v3998_v12  ;;  %v444_v16 = vrot.slane %v3421_v63, %v3996_v11  ;;  %v448_v17 = vrot.slane %v3421_v63, %v3998_v12  ;;  %v472_v23 = vrot.slane %v3422_v18, %v3998_v12 }
  0x8e   : > { %v336_v33 = vpop.permute.xlu1 %335  ;;  %v334_v34 = vpop.permute.xlu0 %333  ;;  %v3463_v35 = vpack.c.bf16 %v330_v29, %v306_v28  ;;  %v3465_v36 = vpack.c.bf16 %v329_v31, %v305_v30  ;;  %v468_v28 = vrot.slane %v3422_v18, %v3996_v11 }
  0x8f   : > { %v338_v42 = vsel %vm337_vm2, %v334_v34, %v336_v33  ;;  %v339_v43 = vsel %vm337_vm2, %v336_v33, %v334_v34 }
  0x90   : > { %3464 = vmatprep.subr.bf16.mxu0 %v3463_v35  ;;  %v353_v50 = vmul.f32 %v346_v37, %v339_v43  ;;  %v354_v51 = vmul.f32 %v350_v38, %v338_v42  ;;  %v479_v37 = vld [vmem:[%s6272_s2] sm:$0xff]  ;;  %v480_v38 = vld [vmem:[%s6272_s2 + $0x8] sm:$0xff] }
  0x91   : > { %3466 = vmatpush1.bf16.msra.mxu0 %v3465_v36 }
  0x92   : > { %v360_v44 = vpop.permute.xlu1 %359  ;;  %v358_v45 = vpop.permute.xlu0 %357 }
  0x93   : > { %v362_v46 = vsel %vm361_vm3, %v358_v45, %v360_v44  ;;  %v363_v47 = vsel %vm361_vm3, %v360_v44, %v358_v45 }
  0x94   : > { %v377_v52 = vmul.f32 %v370_v39, %v363_v47  ;;  %v378_v53 = vmul.f32 %v374_v40, %v362_v46  ;;  %v481_v39 = vld [vmem:[%s6272_s2 + $0x10] sm:$0xff]  ;;  %v482_v40 = vld [vmem:[%s6272_s2 + $0x18] sm:$0xff] }
  0x96   : > { %v386_v54 = vpop.permute.xlu1 %385  ;;  %v384_v55 = vpop.permute.xlu0 %383  ;;  %v3467_v56 = vpack.c.bf16 %v378_v53, %v354_v51  ;;  %v3469_v57 = vpack.c.bf16 %v377_v52, %v353_v50 }
  0x97   : > { %v388_v58 = vsel %vm387_vm4, %v384_v55, %v386_v54  ;;  %v389_v59 = vsel %vm387_vm4, %v386_v54, %v384_v55 }
  0x98   : > { %v403_v60 = vmul.f32 %v396_v48, %v388_v58  ;;  %v404_v61 = vmul.f32 %v400_v49, %v389_v59  ;;  %3468 = vmatprep.subr.bf16.mxu0 %v3467_v56 }
  0x99   : > { %3470 = vmatpush1.bf16.msra.mxu0 %v3469_v57 }
  0x9a   : > { %v410_v5 = vpop.permute.xlu1 %409  ;;  %v408_v8 = vpop.permute.xlu0 %407  ;;  %v3471_v9 = vpack.c.bf16 %v404_v61, %v3939_v1  ;;  %v3473_v13 = vpack.c.bf16 %v403_v60, %v3933_v0 }
  0x9b   : > { %v412_v1 = vsel %vm411_vm5, %v408_v8, %v410_v5  ;;  %v413_v0 = vsel %vm411_vm5, %v410_v5, %v408_v8 }
  0x9c   : > { %3472 = vmatprep.subr.bf16.mxu0 %v3471_v9  ;;  %v427_v24 = vmul.f32 %v420_v14, %v412_v1  ;;  %v428_v25 = vmul.f32 %v424_v15, %v413_v0  ;;  %v1060_v15 = vld [vmem:[%s6273_s3 + $0x8] sm:$0xff] }
  0x9d   : > { %3474 = vmatpush1.bf16.msra.mxu0 %v3473_v13  ;;  %1292 = vmatprep.mubr.f32.mxu1 %v1060_v15 }
  0x9e   : > { %v434_v19 = vpop.permute.xlu1 %433  ;;  %v432_v20 = vpop.permute.xlu0 %431 }
  0x9f   : > { %v436_v21 = vsel %vm435_vm6, %v432_v20, %v434_v19  ;;  %v437_v22 = vsel %vm435_vm6, %v434_v19, %v432_v20 }
  0xa0   : > { %v451_v26 = vmul.f32 %v444_v16, %v436_v21  ;;  %v452_v27 = vmul.f32 %v448_v17, %v437_v22 }
  0xa2   : > { %v458_v29 = vpop.permute.xlu1 %457  ;;  %v3475_v30 = vpack.c.bf16 %v452_v27, %v428_v25  ;;  %v456_v31 = vpop.permute.xlu0 %455  ;;  %v3477_v32 = vpack.c.bf16 %v451_v26, %v427_v24 }
  0xa3   : > { %v460_v33 = vsel %vm459_vm7, %v456_v31, %v458_v29  ;;  %v461_v34 = vsel %vm459_vm7, %v458_v29, %v456_v31 }
  0xa4   : > { %3476 = vmatprep.subr.bf16.mxu0 %v3475_v30  ;;  %v476_v35 = vmul.f32 %v472_v23, %v461_v34  ;;  %v475_v36 = vmul.f32 %v468_v28, %v460_v33  ;;  %v659_v23 = vld [vmem:[%s6271_s1] ss:$8 sm:$0x3] }
  0xa5   : > { %3478 = vmatpush1.bf16.msra.mxu0 %v3477_v32  ;;  %v668_v26 = vrot.slane %v659_v23, %v3998_v12  ;;  %v664_v27 = vrot.slane %v659_v23, %v3996_v11 }
  0xa6   : > { %554 = vmatprep.subr.mxu0 %v476_v35 }
  0xa9   : > { %555 = vmatpush1.msra.mxu0 %v475_v36 }
  0xaa   : > { %3423 = vmatmul.mubr.msk.f32.vlgmr.msra.gmra.mrb[0].mxu0 %vm525_vm8, %v479_v37 }
  0xab   : > { %608 = vmatprep.mubr.f32.mxu0 %v6278_v2 }
  0xae   : > { %3424 = vmatmul.mubr.msk.f32.gmra.mrb[2].mxu0 %vm525_vm8, %v480_v38 }
  0xaf   : > { %614 = vmatprep.mubr.f32.mxu0 %v6278_v2 }
  0xb2   : > { %3425 = vmatmul.mubr.msk.f32.gmra.mrb[4].mxu0 %vm525_vm8, %v481_v39 }
  0xb3   : > { %620 = vmatprep.mubr.f32.mxu0 %v6278_v2  ;;  %v508_v41 = vpop.permute.xlu0 %507  ;;  %v513_v46 = vpop.permute.xlu1 %512 }
  0xb6   : > { %3426 = vmatmul.mubr.msk.f32.gmra.mrb[6].mxu0 %vm525_vm8, %v482_v40 }
  0xb7   : > { %v518_v59 = vpop.permute.xlu1 %517  ;;  %v523_v61 = vpop.permute.xlu0 %522 }
 0x17d   : > { %v604_v42 = vpop.f32.mrb[0].mxu0 }
 0x17e   : > { %v605_v43 = vadd.f32 %v604_v42, %v508_v41  ;;  %v606_v44 = vpop.f32.mrb[1].mxu0 }
 0x17f   : > { %v607_v55 = vadd.f32 %v606_v44, %v508_v41 }
 0x180   : > { %v4097_v45 = vmax.f32 %v605_v43, 0.0 }
 0x181   : > { %v610_v47 = vpop.f32.mrb[2].mxu0  ;;  %v4119_v56 = vmax.f32 %v607_v55, 0.0 }
 0x182   : > { %v611_v48 = vadd.f32 %v610_v47, %v513_v46  ;;  %v612_v49 = vpop.f32.mrb[3].mxu0  ;;  %635 = vrot.lane.b32.xlu1 %v4097_v45, %s3865_s9 }
 0x183   : > { %v613_v57 = vadd.f32 %v612_v49, %v513_v46 }
 0x184   : > { %v4101_v50 = vmax.f32 %v611_v48, 0.0 }
 0x185   : > { %v616_v51 = vpop.f32.mrb[4].mxu0  ;;  %v4125_v58 = vmax.f32 %v613_v57, 0.0 }
 0x186   : > { %v618_v52 = vpop.f32.mrb[5].mxu0  ;;  %637 = vrot.lane.b32.xlu0 %v4101_v50, %s3865_s9  ;;  %687 = vrot.lane.b32.xlu1 %v4097_v45, %s3864_s8  ;;  %v617_v60 = vadd.f32 %v616_v51, %v518_v59 }
 0x187   : > { %v619_v8 = vadd.f32 %v618_v52, %v518_v59 }
 0x188   : > { %v4139_v62 = vmax.f32 %v617_v60, 0.0 }
 0x189   : > { %v622_v53 = vpop.f32.mrb[6].mxu0  ;;  %v4159_v9 = vmax.f32 %v619_v8, 0.0  ;;  %v3874_v8 = vmov 1  }
 0x18a   : > { %v624_v54 = vpop.f32.mrb[7].mxu0  ;;  %689 = vrot.lane.b32.xlu0 %v4101_v50, %s3864_s8  ;;  %739 = vrot.lane.b32.xlu1 %v4097_v45, %s3866_s10  ;;  %v623_v63 = vadd.f32 %v622_v53, %v523_v61 }
 0x18b   : > { %v625_v13 = vadd.f32 %v624_v54, %v523_v61  ;;  %v3427_v54 = vld [vmem:[%s6271_s1 + $0x1] ss:$8 sm:$0x3]  ;;  %3852 = vset.pattern.permute.xlu1 %v3874_v8  ;;  %3853 = vset.pattern.permute.xlu0 %v3874_v8 }
 0x18c   : > { %v4145_v5 = vmax.f32 %v623_v63, 0.0  ;;  %v720_v60 = vrot.slane %v3427_v54, %v3998_v12 }
 0x18d   : > { %v4165_v14 = vmax.f32 %v625_v13, 0.0  ;;  %v716_v13 = vrot.slane %v3427_v54, %v3996_v11 }
 0x18e   : > { %741 = vrot.lane.b32.xlu0 %v4101_v50, %s3866_s10  ;;  %791 = vrot.lane.b32.xlu1 %v4097_v45, %s3867_s11 }
 0x192   : > { %793 = vrot.lane.b32.xlu0 %v4101_v50, %s3867_s11  ;;  %851 = vrot.lane.b32.xlu1 %v4097_v45, %s3868_s12 }
 0x196   : > { %853 = vrot.lane.b32.xlu0 %v4101_v50, %s3868_s12  ;;  %643 = vrot.lane.b32.xlu1 %v4119_v56, %s3865_s9 }
 0x19a   : > { %645 = vrot.lane.b32.xlu0 %v4125_v58, %s3865_s9  ;;  %695 = vrot.lane.b32.xlu1 %v4119_v56, %s3864_s8 }
 0x19e   : > { %697 = vrot.lane.b32.xlu0 %v4125_v58, %s3864_s8  ;;  %747 = vrot.lane.b32.xlu1 %v4119_v56, %s3866_s10 }
 0x1a2   : > { %749 = vrot.lane.b32.xlu0 %v4125_v58, %s3866_s10  ;;  %799 = vrot.lane.b32.xlu1 %v4119_v56, %s3867_s11 }
 0x1a6   : > { %801 = vrot.lane.b32.xlu0 %v4125_v58, %s3867_s11  ;;  %639 = vrot.lane.b32.xlu1 %v4139_v62, %s3865_s9 }
 0x1aa   : > { %691 = vrot.lane.b32.xlu1 %v4139_v62, %s3864_s8  ;;  %641 = vrot.lane.b32.xlu0 %v4145_v5, %s3865_s9 }
 0x1ae   : > { %743 = vrot.lane.b32.xlu1 %v4139_v62, %s3866_s10  ;;  %693 = vrot.lane.b32.xlu0 %v4145_v5, %s3864_s8 }
 0x1b2   : > { %795 = vrot.lane.b32.xlu1 %v4139_v62, %s3867_s11  ;;  %745 = vrot.lane.b32.xlu0 %v4145_v5, %s3866_s10 }
 0x1b6   : > { %647 = vrot.lane.b32.xlu1 %v4159_v9, %s3865_s9  ;;  %797 = vrot.lane.b32.xlu0 %v4145_v5, %s3867_s11 }
 0x1ba   : > { %859 = vrot.lane.b32.xlu1 %v4119_v56, %s3868_s12  ;;  %649 = vrot.lane.b32.xlu0 %v4165_v14, %s3865_s9 }
 0x1be   : > { %699 = vrot.lane.b32.xlu1 %v4159_v9, %s3864_s8  ;;  %861 = vrot.lane.b32.xlu0 %v4125_v58, %s3868_s12 }
 0x1c2   : > { %751 = vrot.lane.b32.xlu1 %v4159_v9, %s3866_s10  ;;  %701 = vrot.lane.b32.xlu0 %v4165_v14, %s3864_s8 }
 0x1c6   : > { %803 = vrot.lane.b32.xlu1 %v4159_v9, %s3867_s11  ;;  %857 = vrot.lane.b32.xlu0 %v4145_v5, %s3868_s12 }
 0x1ca   : > { %855 = vrot.lane.b32.xlu1 %v4139_v62, %s3868_s12  ;;  %753 = vrot.lane.b32.xlu0 %v4165_v14, %s3866_s10 }
 0x1ce   : > { %863 = vrot.lane.b32.xlu1 %v4159_v9, %s3868_s12  ;;  %905 = vrot.lane.b32.xlu0 %v4101_v50, %s3869_s13 }
 0x1d2   : > { %903 = vrot.lane.b32.xlu1 %v4097_v45, %s3869_s13  ;;  %805 = vrot.lane.b32.xlu0 %v4165_v14, %s3867_s11 }
 0x1d6   : > { %911 = vrot.lane.b32.xlu1 %v4119_v56, %s3869_s13  ;;  %913 = vrot.lane.b32.xlu0 %v4125_v58, %s3869_s13 }
 0x1da   : > { %907 = vrot.lane.b32.xlu1 %v4139_v62, %s3869_s13  ;;  %909 = vrot.lane.b32.xlu0 %v4145_v5, %s3869_s13 }
 0x1de   : > { %915 = vrot.lane.b32.xlu1 %v4159_v9, %s3869_s13  ;;  %957 = vrot.lane.b32.xlu0 %v4101_v50, %s3871_s14 }
 0x1e2   : > { %955 = vrot.lane.b32.xlu1 %v4097_v45, %s3871_s14  ;;  %865 = vrot.lane.b32.xlu0 %v4165_v14, %s3868_s12 }
 0x1e6   : > { %963 = vrot.lane.b32.xlu1 %v4119_v56, %s3871_s14  ;;  %965 = vrot.lane.b32.xlu0 %v4125_v58, %s3871_s14 }
 0x1ea   : > { %959 = vrot.lane.b32.xlu1 %v4139_v62, %s3871_s14  ;;  %917 = vrot.lane.b32.xlu0 %v4165_v14, %s3869_s13 }
 0x1ee   : > { %967 = vrot.lane.b32.xlu1 %v4159_v9, %s3871_s14  ;;  %961 = vrot.lane.b32.xlu0 %v4145_v5, %s3871_s14 }
 0x1f2   : > { %1007 = vrot.lane.b32.xlu1 %v4097_v45, %s3872_s15  ;;  %969 = vrot.lane.b32.xlu0 %v4165_v14, %s3871_s14 }
 0x1f4   : > { %v636_v16 = vpop.permute.xlu1 %635 }
 0x1f6   : > { %1015 = vrot.lane.b32.xlu1 %v4119_v56, %s3872_s15  ;;  %1009 = vrot.lane.b32.xlu0 %v4101_v50, %s3872_s15 }
 0x1f8   : > { %v4234_v17 = vpop.permute.xlu1 %687  ;;  %v638_v18 = vpop.permute.xlu0 %637 }
 0x1fa   : > { %1011 = vrot.lane.b32.xlu1 %v4139_v62, %s3872_s15  ;;  %1017 = vrot.lane.b32.xlu0 %v4125_v58, %s3872_s15 }
 0x1fc   : > { %v4240_v1 = vpop.permute.xlu1 %739  ;;  %v690_v0 = vpop.permute.xlu0 %689 }
 0x1fe   : > { %1019 = vrot.lane.b32.xlu1 %v4159_v9, %s3872_s15  ;;  %1013 = vrot.lane.b32.xlu0 %v4145_v5, %s3872_s15 }
 0x200   : > { %v4246_v19 = vpop.permute.xlu1 %791  ;;  %v4248_v20 = vpop.permute.xlu0 %741 }
 0x202   : > { %1021 = vrot.lane.b32.xlu0 %v4165_v14, %s3872_s15  ;;  %1165 = vperm.xlu1 %3852, %v3978_v4  }
 0x204   : > { %v4252_v21 = vpop.permute.xlu1 %851  ;;  %v4254_v22 = vpop.permute.xlu0 %793 }
 0x206   : > { %1170 = vperm.xlu0 %3853, %v3973_v3   ;;  %1175 = vperm.xlu1 %3852, %v3985_v6  }
 0x208   : > { %v644_v24 = vpop.permute.xlu1 %643  ;;  %v4259_v25 = vpop.permute.xlu0 %853 }
 0x209   : > { %v655_v28 = vsel %vm290_vm1, %v644_v24, %v636_v16  ;;  %v651_v29 = vsel %vm290_vm1, %v636_v16, %v644_v24 }
 0x20a   : > { %v672_v34 = vmul.f32 %v668_v26, %v651_v29  ;;  %v671_v36 = vmul.f32 %v664_v27, %v655_v28  ;;  %1180 = vperm.xlu1 %3852, %v3990_v7  }
 0x20c   : > { %v696_v30 = vpop.permute.xlu1 %695  ;;  %v646_v31 = vpop.permute.xlu0 %645 }
 0x20d   : > { %v656_v32 = vsel %vm290_vm1, %v646_v31, %v638_v18  ;;  %v652_v33 = vsel %vm290_vm1, %v638_v18, %v646_v31  ;;  %v703_v15 = vsel %vm313_vm0, %v4234_v17, %v696_v30  ;;  %v1159_v31 = vld [vmem:[%s6276_s6 + $0x20] sm:$0xff]  ;;  %v707_v3 = vsel %vm313_vm0, %v696_v30, %v4234_v17  ;;  %v1161_v30 = vld [vmem:[%s6276_s6 + $0x30] sm:$0xff] }
 0x20e   : > { %v674_v35 = vmul.f32 %v668_v26, %v652_v33  ;;  %v673_v37 = vmul.f32 %v664_v27, %v656_v32  ;;  %1185 = vperm.xlu0 %3853, %v1159_v31  }
 0x210   : > { %v4271_v38 = vpop.permute.xlu1 %747  ;;  %v698_v39 = vpop.permute.xlu0 %697  ;;  %v3479_v40 = vpack.c.bf16 %v674_v35, %v672_v34  ;;  %v3481_v41 = vpack.c.bf16 %v673_v37, %v671_v36  ;;  %v3428_v35 = vld [vmem:[%s6271_s1 + $0x2] ss:$8 sm:$0x3] }
 0x211   : > { %v704_v59 = vsel %vm313_vm0, %v690_v0, %v698_v39  ;;  %v708_v23 = vsel %vm313_vm0, %v698_v39, %v690_v0  ;;  %v724_v0 = vmul.f32 %v720_v60, %v703_v15  ;;  %v768_v54 = vrot.slane %v3428_v35, %v3996_v11 }
 0x212   : > { %3480 = vmatprep.subr.bf16.mxu1 %v3479_v40  ;;  %v726_v24 = vmul.f32 %v720_v60, %v704_v59  ;;  %v725_v36 = vmul.f32 %v716_v13, %v708_v23  ;;  %v1160_v23 = vld [vmem:[%s6276_s6 + $0x28] sm:$0xff]  ;;  %1195 = vperm.xlu0 %3853, %v1161_v30  }
 0x213   : > { %3482 = vmatpush1.bf16.msra.mxu1 %v3481_v41  ;;  %1190 = vperm.xlu1 %3852, %v1160_v23  }
 0x214   : > { %v4273_v42 = vpop.permute.xlu1 %799  ;;  %v750_v43 = vpop.permute.xlu0 %749  ;;  %v3487_v17 = vpack.c.bf16 %v726_v24, %v724_v0 }
 0x215   : > { %v760_v8 = vsel %vm337_vm2, %v750_v43, %v4248_v20 }
 0x216   : > { %v777_v31 = vmul.f32 %v768_v54, %v760_v8 }
 0x218   : > { %v640_v44 = vpop.permute.xlu1 %639  ;;  %v4275_v46 = vpop.permute.xlu0 %801 }
 0x21c   : > { %v692_v47 = vpop.permute.xlu1 %691  ;;  %v642_v48 = vpop.permute.xlu0 %641 }
 0x220   : > { %v4277_v49 = vpop.permute.xlu1 %743  ;;  %v694_v51 = vpop.permute.xlu0 %693 }
 0x224   : > { %v4279_v52 = vpop.permute.xlu1 %795  ;;  %v4281_v53 = vpop.permute.xlu0 %745 }
 0x228   : > { %v648_v55 = vpop.permute.xlu1 %647  ;;  %v4286_v57 = vpop.permute.xlu0 %797 }
 0x229   : > { %v653_v61 = vsel %vm290_vm1, %v640_v44, %v648_v55  ;;  %v657_v63 = vsel %vm290_vm1, %v648_v55, %v640_v44  ;;  %v772_v44 = vrot.slane %v3428_v35, %v3998_v12  ;;  %v755_v55 = vsel %vm337_vm2, %v4240_v1, %v4271_v38 }
 0x22a   : > { %v675_v32 = vmul.f32 %v664_v27, %v657_v63  ;;  %v676_v33 = vmul.f32 %v668_v26, %v653_v61 }
 0x22c   : > { %v4299_v16 = vpop.permute.xlu1 %859  ;;  %v650_v18 = vpop.permute.xlu0 %649 }
 0x22d   : > { %v654_v28 = vsel %vm290_vm1, %v642_v48, %v650_v18  ;;  %v658_v29 = vsel %vm290_vm1, %v650_v18, %v642_v48 }
 0x22e   : > { %v677_v34 = vmul.f32 %v664_v27, %v658_v29  ;;  %v678_v4 = vmul.f32 %v668_v26, %v654_v28  ;;  %v723_v27 = vmul.f32 %v716_v13, %v707_v3  ;;  %v756_v26 = vsel %vm337_vm2, %v4248_v20, %v750_v43 }
 0x22f   : > { %v778_v15 = vmul.f32 %v772_v44, %v756_v26  ;;  %v759_v20 = vsel %vm337_vm2, %v4271_v38, %v4240_v1  ;;  %v776_v43 = vmul.f32 %v772_v44, %v755_v55  ;;  %v808_v1 = vsel %vm361_vm3, %v4254_v22, %v4275_v46 }
 0x230   : > { %v700_v37 = vpop.permute.xlu1 %699  ;;  %v4318_v39 = vpop.permute.xlu0 %861  ;;  %v3483_v40 = vpack.c.bf16 %v678_v4, %v676_v33  ;;  %v3485_v41 = vpack.c.bf16 %v677_v34, %v675_v32  ;;  %v3489_v63 = vpack.c.bf16 %v725_v36, %v723_v27  ;;  %v807_v36 = vsel %vm361_vm3, %v4246_v19, %v4273_v42 }
 0x231   : > { %v705_v48 = vsel %vm313_vm0, %v692_v47, %v700_v37  ;;  %v709_v6 = vsel %vm313_vm0, %v700_v37, %v692_v47  ;;  %v3495_v38 = vpack.c.bf16 %v778_v15, %v776_v43  ;;  %v812_v27 = vsel %vm361_vm3, %v4275_v46, %v4254_v22 }
 0x232   : > { %3484 = vmatprep.subr.bf16.mxu1 %v3483_v40  ;;  %v727_v24 = vmul.f32 %v716_v13, %v709_v6  ;;  %v728_v28 = vmul.f32 %v720_v60, %v705_v48  ;;  %v811_v22 = vsel %vm361_vm3, %v4273_v42, %v4246_v19 }
 0x233   : > { %3486 = vmatpush1.bf16.msra.mxu1 %v3485_v41 }
 0x234   : > { %v752_v59 = vpop.permute.xlu1 %751  ;;  %3488 = vmatprep.subr.bf16.mxu1 %v3487_v17  ;;  %v702_v61 = vpop.permute.xlu0 %701 }
 0x235   : > { %v706_v47 = vsel %vm313_vm0, %v694_v51, %v702_v61  ;;  %v710_v18 = vsel %vm313_vm0, %v702_v61, %v694_v51  ;;  %v3429_v51 = vld [vmem:[%s6271_s1 + $0x3] ss:$8 sm:$0x3]  ;;  %v757_v0 = vsel %vm337_vm2, %v4277_v49, %v752_v59  ;;  %v761_v35 = vsel %vm337_vm2, %v752_v59, %v4277_v49 }
 0x236   : > { %v729_v29 = vmul.f32 %v716_v13, %v710_v18  ;;  %v730_v7 = vmul.f32 %v720_v60, %v706_v47  ;;  %v1162_v60 = vld [vmem:[%s6276_s6 + $0x38] sm:$0xff]  ;;  %v775_v13 = vmul.f32 %v768_v54, %v759_v20  ;;  %v824_v3 = vrot.slane %v3429_v51, %v3998_v12 }
 0x237   : > { %3490 = vmatpush1.bf16.msra.mxu1 %v3489_v63  ;;  %1200 = vperm.xlu1 %3852, %v1162_v60   ;;  %v779_v30 = vmul.f32 %v768_v54, %v761_v35  ;;  %v780_v48 = vmul.f32 %v772_v44, %v757_v0  ;;  %v820_v59 = vrot.slane %v3429_v51, %v3996_v11 }
 0x238   : > { %v804_v32 = vpop.permute.xlu1 %803  ;;  %v4355_v33 = vpop.permute.xlu0 %857  ;;  %v3491_v34 = vpack.c.bf16 %v730_v7, %v728_v28  ;;  %v3493_v4 = vpack.c.bf16 %v729_v29, %v727_v24  ;;  %v3497_v41 = vpack.c.bf16 %v777_v31, %v775_v13  ;;  %v830_v26 = vmul.f32 %v824_v3, %v808_v1 }
 0x239   : > { %v828_v46 = vmul.f32 %v824_v3, %v807_v36  ;;  %v829_v47 = vmul.f32 %v820_v59, %v812_v27  ;;  %v827_v18 = vmul.f32 %v820_v59, %v811_v22  ;;  %v3515_v35 = vpack.c.bf16 %v4165_v14, %v4159_v9 }
 0x23a   : > { %3492 = vmatprep.subr.bf16.mxu1 %v3491_v34  ;;  %v3430_v34 = vld [vmem:[%s6271_s1 + $0x4] ss:$8 sm:$0x3]  ;;  %v867_v36 = vsel %vm387_vm4, %v4252_v21, %v4299_v16  ;;  %v3517_v14 = vpack.c.bf16 %v4145_v5, %v4139_v62 }
 0x23b   : > { %3494 = vmatpush1.bf16.msra.mxu1 %v3493_v4  ;;  %v3505_v28 = vpack.c.bf16 %v829_v47, %v827_v18  ;;  %v3511_v4 = vpack.c.bf16 %v4125_v58, %v4119_v56  ;;  %v884_v60 = vrot.slane %v3430_v34, %v3998_v12  ;;  %v868_v56 = vsel %vm387_vm4, %v4259_v25, %v4318_v39  ;;  %v3432_v47 = vld [vmem:[%s6271_s1 + $0x6] ss:$8 sm:$0x3] }
 0x23c   : > { %v4375_v37 = vpop.permute.xlu1 %855  ;;  %3496 = vmatprep.subr.bf16.mxu1 %v3495_v38  ;;  %v754_v40 = vpop.permute.xlu0 %753  ;;  %v871_v38 = vsel %vm387_vm4, %v4299_v16, %v4252_v21  ;;  %v3513_v58 = vpack.c.bf16 %v4101_v50, %v4097_v45 }
 0x23d   : > { %v758_v49 = vsel %vm337_vm2, %v4281_v53, %v754_v40  ;;  %v762_v17 = vsel %vm337_vm2, %v754_v40, %v4281_v53  ;;  %v3503_v53 = vpack.c.bf16 %v830_v26, %v828_v46  ;;  %v3431_v40 = vld [vmem:[%s6271_s1 + $0x5] ss:$8 sm:$0x3] }
 0x23e   : > { %v781_v6 = vmul.f32 %v768_v54, %v762_v17  ;;  %v782_v55 = vmul.f32 %v772_v44, %v758_v49  ;;  %v809_v44 = vsel %vm361_vm3, %v4279_v52, %v804_v32  ;;  %v813_v54 = vsel %vm361_vm3, %v804_v32, %v4279_v52 }
 0x23f   : > { %3498 = vmatpush1.bf16.msra.mxu1 %v3497_v41  ;;  %v831_v29 = vmul.f32 %v820_v59, %v813_v54  ;;  %v832_v7 = vmul.f32 %v824_v3, %v809_v44  ;;  %v936_v16 = vrot.slane %v3431_v40, %v3998_v12 }
 0x240   : > { %v864_v61 = vpop.permute.xlu1 %863  ;;  %v4392_v63 = vpop.permute.xlu0 %905  ;;  %v3499_v8 = vpack.c.bf16 %v782_v55, %v780_v48  ;;  %v3501_v15 = vpack.c.bf16 %v781_v6, %v779_v30  ;;  %v932_v48 = vrot.slane %v3431_v40, %v3996_v11 }
 0x241   : > { %v869_v50 = vsel %vm387_vm4, %v4375_v37, %v864_v61  ;;  %v873_v9 = vsel %vm387_vm4, %v864_v61, %v4375_v37 }
 0x242   : > { %3500 = vmatprep.subr.bf16.mxu1 %v3499_v8  ;;  %v892_v30 = vmul.f32 %v884_v60, %v873_v9 }
 0x243   : > { %3502 = vmatpush1.bf16.msra.mxu1 %v3501_v15 }
 0x244   : > { %v904_v19 = vpop.permute.xlu1 %903  ;;  %3504 = vmatprep.subr.bf16.mxu1 %v3503_v53  ;;  %v806_v42 = vpop.permute.xlu0 %805 }
 0x245   : > { %v810_v23 = vsel %vm361_vm3, %v4286_v57, %v806_v42  ;;  %v814_v24 = vsel %vm361_vm3, %v806_v42, %v4286_v57  ;;  %v872_v57 = vsel %vm387_vm4, %v4318_v39, %v4259_v25  ;;  %v888_v25 = vmul.f32 %v884_v60, %v871_v38 }
 0x246   : > { %v833_v20 = vmul.f32 %v820_v59, %v814_v24  ;;  %v834_v43 = vmul.f32 %v824_v3, %v810_v23  ;;  %v880_v3 = vrot.slane %v3430_v34, %v3996_v11  ;;  %v890_v0 = vmul.f32 %v884_v60, %v872_v57 }
 0x247   : > { %3506 = vmatpush1.bf16.msra.mxu1 %v3505_v28  ;;  %v988_v23 = vrot.slane %v3432_v47, %v3998_v12 }
 0x248   : > { %v912_v51 = vpop.permute.xlu1 %911  ;;  %v914_v52 = vpop.permute.xlu0 %913  ;;  %v3507_v31 = vpack.c.bf16 %v834_v43, %v832_v7  ;;  %v3509_v32 = vpack.c.bf16 %v833_v20, %v831_v29  ;;  %v889_v39 = vmul.f32 %v880_v3, %v868_v56  ;;  %v887_v21 = vmul.f32 %v880_v3, %v867_v36 }
 0x249   : > { %v3519_v27 = vpack.c.bf16 %v890_v0, %v888_v25  ;;  %v923_v26 = vsel %vm411_vm5, %v912_v51, %v904_v19  ;;  %v924_v49 = vsel %vm411_vm5, %v914_v52, %v4392_v63  ;;  %v891_v17 = vmul.f32 %v880_v3, %v869_v50 }
 0x24a   : > { %3508 = vmatprep.subr.bf16.mxu1 %v3507_v31  ;;  %v3521_v62 = vpack.c.bf16 %v889_v39, %v887_v21  ;;  %v919_v5 = vsel %vm411_vm5, %v904_v19, %v912_v51  ;;  %v920_v55 = vsel %vm411_vm5, %v4392_v63, %v914_v52  ;;  %v940_v46 = vmul.f32 %v936_v16, %v923_v26 }
 0x24b   : > { %3510 = vmatpush1.bf16.msra.mxu1 %v3509_v32  ;;  %v942_v61 = vmul.f32 %v936_v16, %v924_v49  ;;  %v939_v53 = vmul.f32 %v932_v48, %v919_v5  ;;  %v941_v18 = vmul.f32 %v932_v48, %v920_v55  ;;  %v984_v43 = vrot.slane %v3432_v47, %v3996_v11  ;;  %v3433_v49 = vld [vmem:[%s6271_s1 + $0x7] ss:$8 sm:$0x3] }
 0x24c   : > { %v908_v13 = vpop.permute.xlu1 %907  ;;  %3512 = vmatprep.subr.bf16.mxu1 %v3511_v4  ;;  %v4416_v1 = vpop.permute.xlu0 %909 }
 0x24d   : > { %v3527_v24 = vpack.c.bf16 %v942_v61, %v940_v46  ;;  %v3529_v31 = vpack.c.bf16 %v941_v18, %v939_v53  ;;  %v1063_v61 = vld [vmem:[%s6273_s3 + $0x20] sm:$0xff] }
 0x24f   : > { %3514 = vmatpush1.bf16.msra.mxu1 %v3513_v58 }
 0x250   : > { %v916_v41 = vpop.permute.xlu1 %915  ;;  %3516 = vmatprep.subr.bf16.mxu1 %v3515_v35  ;;  %v958_v45 = vpop.permute.xlu0 %957 }
 0x251   : > { %v921_v42 = vsel %vm411_vm5, %v908_v13, %v916_v41 }
 0x252   : > { %v943_v7 = vmul.f32 %v932_v48, %v921_v42 }
 0x253   : > { %3518 = vmatpush1.bf16.msra.mxu1 %v3517_v14 }
 0x254   : > { %v956_v37 = vpop.permute.xlu1 %955  ;;  %3520 = vmatprep.subr.bf16.mxu1 %v3519_v27  ;;  %v866_v6 = vpop.permute.xlu0 %865 }
 0x255   : > { %v870_v59 = vsel %vm387_vm4, %v4355_v33, %v866_v6  ;;  %v874_v22 = vsel %vm387_vm4, %v866_v6, %v4355_v33  ;;  %v925_v33 = vsel %vm411_vm5, %v916_v41, %v908_v13  ;;  %v1036_v6 = vrot.slane %v3433_v49, %v3996_v11 }
 0x256   : > { %v893_v8 = vmul.f32 %v880_v3, %v870_v59  ;;  %v894_v15 = vmul.f32 %v884_v60, %v874_v22  ;;  %v944_v20 = vmul.f32 %v936_v16, %v925_v33  ;;  %v1059_v59 = vld [vmem:[%s6273_s3] sm:$0xff] }
 0x257   : > { %3522 = vmatpush1.bf16.msra.mxu1 %v3521_v62  ;;  %v1040_v62 = vrot.slane %v3433_v49, %v3998_v12 }
 0x258   : > { %v964_v63 = vpop.permute.xlu1 %963  ;;  %v966_v44 = vpop.permute.xlu0 %965  ;;  %v3523_v54 = vpack.c.bf16 %v894_v15, %v892_v30  ;;  %v3525_v19 = vpack.c.bf16 %v893_v8, %v891_v17 }
 0x259   : > { %v975_v28 = vsel %vm435_vm6, %v964_v63, %v956_v37  ;;  %v976_v29 = vsel %vm435_vm6, %v966_v44, %v958_v45  ;;  %v971_v32 = vsel %vm435_vm6, %v956_v37, %v964_v63  ;;  %v972_v34 = vsel %vm435_vm6, %v958_v45, %v966_v44  ;;  %v1062_v44 = vld [vmem:[%s6273_s3 + $0x18] sm:$0xff] }
 0x25a   : > { %3524 = vmatprep.subr.bf16.mxu1 %v3523_v54  ;;  %v992_v60 = vmul.f32 %v988_v23, %v975_v28  ;;  %v994_v13 = vmul.f32 %v988_v23, %v976_v29  ;;  %v991_v36 = vmul.f32 %v984_v43, %v971_v32  ;;  %v993_v40 = vmul.f32 %v984_v43, %v972_v34  ;;  %v1065_v29 = vld [vmem:[%s6273_s3 + $0x30] sm:$0xff] }
 0x25b   : > { %3526 = vmatpush1.bf16.msra.mxu1 %v3525_v19 }
 0x25c   : > { %v960_v51 = vpop.permute.xlu1 %959  ;;  %3528 = vmatprep.subr.bf16.mxu1 %v3527_v24  ;;  %v918_v52 = vpop.permute.xlu0 %917  ;;  %v3535_v25 = vpack.c.bf16 %v994_v13, %v992_v60  ;;  %v3537_v14 = vpack.c.bf16 %v993_v40, %v991_v36  ;;  %v1072_v13 = vld [vmem:[%s6273_s3 + $0x68] sm:$0xff]  ;;  %v1061_v40 = vld [vmem:[%s6273_s3 + $0x10] sm:$0xff] }
 0x25d   : > { %v922_v4 = vsel %vm411_vm5, %v4416_v1, %v918_v52  ;;  %v926_v57 = vsel %vm411_vm5, %v918_v52, %v4416_v1  ;;  %v1080_v36 = vld [vmem:[%s6273_s3 + $0xa8] sm:$0xff] }
 0x25e   : > { %v945_v38 = vmul.f32 %v932_v48, %v922_v4  ;;  %v946_v56 = vmul.f32 %v936_v16, %v926_v57  ;;  %v1068_v4 = vld [vmem:[%s6273_s3 + $0x48] sm:$0xff] }
 0x25f   : > { %3530 = vmatpush1.bf16.msra.mxu1 %v3529_v31 }
 0x260   : > { %v968_v58 = vpop.permute.xlu1 %967  ;;  %v962_v3 = vpop.permute.xlu0 %961  ;;  %v3531_v0 = vpack.c.bf16 %v946_v56, %v944_v20  ;;  %v3533_v35 = vpack.c.bf16 %v945_v38, %v943_v7  ;;  %v1069_v20 = vld [vmem:[%s6273_s3 + $0x50] sm:$0xff]  ;;  %v1071_v38 = vld [vmem:[%s6273_s3 + $0x60] sm:$0xff] }
 0x261   : > { %v973_v39 = vsel %vm435_vm6, %v960_v51, %v968_v58  ;;  %v977_v41 = vsel %vm435_vm6, %v968_v58, %v960_v51  ;;  %v1075_v56 = vld [vmem:[%s6273_s3 + $0x80] sm:$0xff]  ;;  %v1074_v58 = vld [vmem:[%s6273_s3 + $0x78] sm:$0xff] }
 0x262   : > { %3532 = vmatprep.subr.bf16.mxu1 %v3531_v0  ;;  %v995_v21 = vmul.f32 %v984_v43, %v973_v39  ;;  %v996_v16 = vmul.f32 %v988_v23, %v977_v41  ;;  %v1077_v0 = vld [vmem:[%s6273_s3 + $0x90] sm:$0xff]  ;;  %v1067_v39 = vld [vmem:[%s6273_s3 + $0x40] sm:$0xff]  ;;  %v1070_v41 = vld [vmem:[%s6273_s3 + $0x58] sm:$0xff] }
 0x263   : > { %3534 = vmatpush1.bf16.msra.mxu1 %v3533_v35  ;;  %v1081_v35 = vld [vmem:[%s6273_s3 + $0xb0] sm:$0xff] }
 0x264   : > { %v1008_v1 = vpop.permute.xlu1 %1007  ;;  %3536 = vmatprep.subr.bf16.mxu1 %v3535_v25  ;;  %v970_v45 = vpop.permute.xlu0 %969  ;;  %v1064_v25 = vld [vmem:[%s6273_s3 + $0x28] sm:$0xff] }
 0x265   : > { %v974_v50 = vsel %vm435_vm6, %v962_v3, %v970_v45  ;;  %v978_v9 = vsel %vm435_vm6, %v970_v45, %v962_v3  ;;  %v1078_v3 = vld [vmem:[%s6273_s3 + $0x98] sm:$0xff]  ;;  %v1076_v45 = vld [vmem:[%s6273_s3 + $0x88] sm:$0xff] }
 0x266   : > { %v997_v27 = vmul.f32 %v984_v43, %v974_v50  ;;  %v998_v26 = vmul.f32 %v988_v23, %v978_v9  ;;  %v1066_v23 = vld [vmem:[%s6273_s3 + $0x38] sm:$0xff]  ;;  %v1079_v50 = vld [vmem:[%s6273_s3 + $0xa0] sm:$0xff] }
 0x267   : > { %3538 = vmatpush1.bf16.msra.mxu1 %v3537_v14  ;;  %v1082_v9 = vld [vmem:[%s6273_s3 + $0xb8] sm:$0xff] }
 0x268   : > { %v1016_v17 = vpop.permute.xlu1 %1015  ;;  %v1010_v30 = vpop.permute.xlu0 %1009  ;;  %v3539_v48 = vpack.c.bf16 %v998_v26, %v996_v16  ;;  %v3541_v37 = vpack.c.bf16 %v997_v27, %v995_v21 }
 0x269   : > { %v1023_v5 = vsel %vm459_vm7, %v1008_v1, %v1016_v17  ;;  %v1027_v55 = vsel %vm459_vm7, %v1016_v17, %v1008_v1  ;;  %v1073_v1 = vld [vmem:[%s6273_s3 + $0x70] sm:$0xff] }
 0x26a   : > { %3540 = vmatprep.subr.bf16.mxu1 %v3539_v48  ;;  %v1043_v47 = vmul.f32 %v1036_v6, %v1023_v5  ;;  %v1044_v53 = vmul.f32 %v1040_v62, %v1027_v55 }
 0x26b   : > { %3542 = vmatpush1.bf16.msra.mxu1 %v3541_v37 }
 0x26c   : > { %v1012_v22 = vpop.permute.xlu1 %1011  ;;  %v1018_v46 = vpop.permute.xlu0 %1017 }
 0x26d   : > { %v1024_v8 = vsel %vm459_vm7, %v1010_v30, %v1018_v46  ;;  %v1028_v15 = vsel %vm459_vm7, %v1018_v46, %v1010_v30 }
 0x26e   : > { %v1045_v18 = vmul.f32 %v1036_v6, %v1024_v8  ;;  %v1046_v63 = vmul.f32 %v1040_v62, %v1028_v15  ;;  %1293 = vmatmul.mubr.f32.vlgmr.msra.gmra.mrb[0].mxu1 %v1059_v59 }
 0x26f   : > { %1298 = vmatprep.mubr.f32.mxu1 %v1063_v61 }
 0x270   : > { %v3545_v54 = vpack.c.bf16 %v1045_v18, %v1043_v47  ;;  %v1020_v19 = vpop.permute.xlu1 %1019  ;;  %v1014_v42 = vpop.permute.xlu0 %1013  ;;  %v3543_v33 = vpack.c.bf16 %v1046_v63, %v1044_v53 }
 0x271   : > { %v1025_v24 = vsel %vm459_vm7, %v1012_v22, %v1020_v19  ;;  %v1029_v28 = vsel %vm459_vm7, %v1020_v19, %v1012_v22 }
 0x272   : > { %1299 = vmatmul.mubr.f32.gmra.mrb[2].mxu1 %v1062_v44  ;;  %3544 = vmatprep.subr.bf16.mxu1 %v3543_v33  ;;  %v1047_v52 = vmul.f32 %v1036_v6, %v1025_v24  ;;  %v1048_v31 = vmul.f32 %v1040_v62, %v1029_v28 }
 0x273   : > { %3546 = vmatpush1.bf16.msra.mxu1 %v3545_v54  ;;  %1304 = vmatprep.mubr.f32.mxu1 %v1066_v23 }
 0x274   : > { %v1022_v7 = vpop.permute.xlu0 %1021 }
 0x275   : > { %v1026_v43 = vsel %vm459_vm7, %v1014_v42, %v1022_v7  ;;  %v1030_v51 = vsel %vm459_vm7, %v1022_v7, %v1014_v42 }
 0x276   : > { %v1049_v32 = vmul.f32 %v1036_v6, %v1026_v43  ;;  %v1050_v34 = vmul.f32 %v1040_v62, %v1030_v51  ;;  %1305 = vmatmul.mubr.f32.gmra.mrb[4].mxu1 %v1065_v29 }
 0x277   : > { %1310 = vmatprep.mubr.f32.mxu1 %v1069_v20 }
 0x278   : > { %v3549_v57 = vpack.c.bf16 %v1049_v32, %v1047_v52  ;;  %v3547_v60 = vpack.c.bf16 %v1050_v34, %v1048_v31 }
 0x27a   : > { %1311 = vmatmul.mubr.f32.gmra.mrb[6].mxu1 %v1068_v4  ;;  %3548 = vmatprep.subr.bf16.mxu1 %v3547_v60 }
 0x27b   : > { %3550 = vmatpush1.bf16.msra.mxu1 %v3549_v57  ;;  %1316 = vmatprep.mubr.f32.mxu1 %v1072_v13 }
 0x27e   : > { %1317 = vmatmul.mubr.f32.gmra.mrb[8].mxu1 %v1071_v38 }
 0x27f   : > { %1322 = vmatprep.mubr.f32.mxu1 %v1075_v56 }
 0x281   : > { %v1166_v14 = vpop.permute.xlu1 %1165 }
 0x282   : > { %1323 = vmatmul.mubr.f32.gmra.mrb[10].mxu1 %v1074_v58 }
 0x283   : > { %1328 = vmatprep.mubr.f32.mxu1 %v1078_v3 }
 0x285   : > { %v1171_v49 = vpop.permute.xlu0 %1170  ;;  %v1176_v19 = vpop.permute.xlu1 %1175 }
 0x286   : > { %1329 = vmatmul.mubr.f32.gmra.mrb[12].mxu1 %v1077_v0 }
 0x287   : > { %1334 = vmatprep.mubr.f32.mxu1 %v1081_v35 }
 0x289   : > { %v1181_v33 = vpop.permute.xlu1 %1180 }
 0x28a   : > { %1335 = vmatmul.mubr.f32.gmra.mrb[14].mxu1 %v1080_v36 }
 0x28b   : > { %1405 = vmatprep.mubr.f32.mxu1 %v6278_v2 }
 0x28d   : > { %v1186_v51 = vpop.permute.xlu0 %1185 }
 0x28e   : > { %3434 = vmatmul.mubr.msk.f32.vlgmr.msra.gmra.mrb[0].mxu1 %vm1203_vm9, %v1061_v40 }
 0x28f   : > { %1411 = vmatprep.mubr.f32.mxu1 %v6278_v2 }
 0x291   : > { %v1196_v56 = vpop.permute.xlu0 %1195 }
 0x292   : > { %3435 = vmatmul.mubr.msk.f32.gmra.mrb[2].mxu1 %vm1203_vm9, %v1064_v25  ;;  %v1191_v31 = vpop.permute.xlu1 %1190 }
 0x293   : > { %1417 = vmatprep.mubr.f32.mxu1 %v6278_v2 }
 0x296   : > { %3436 = vmatmul.mubr.msk.f32.gmra.mrb[4].mxu1 %vm1203_vm9, %v1067_v39 }
 0x297   : > { %1423 = vmatprep.mubr.f32.mxu1 %v6278_v2 }
 0x29a   : > { %3437 = vmatmul.mubr.msk.f32.gmra.mrb[6].mxu1 %vm1203_vm9, %v1070_v41 }
 0x29b   : > { %1429 = vmatprep.mubr.f32.mxu1 %v6278_v2 }
 0x29e   : > { %3438 = vmatmul.mubr.msk.f32.gmra.mrb[8].mxu1 %vm1203_vm9, %v1073_v1 }
 0x29f   : > { %1435 = vmatprep.mubr.f32.mxu1 %v6278_v2 }
 0x2a2   : > { %3439 = vmatmul.mubr.msk.f32.gmra.mrb[10].mxu1 %vm1203_vm9, %v1076_v45 }
 0x2a3   : > { %1441 = vmatprep.mubr.f32.mxu1 %v6278_v2 }
 0x2a6   : > { %3440 = vmatmul.mubr.msk.f32.gmra.mrb[12].mxu1 %vm1203_vm9, %v1079_v50 }
 0x2a7   : > { %1447 = vmatprep.mubr.f32.mxu1 %v6278_v2 }
 0x2aa   : > { %3441 = vmatmul.mubr.msk.f32.gmra.mrb[14].mxu1 %vm1203_vm9, %v1082_v9 }
 0x2b6   : > { %v1201_v3 = vpop.permute.xlu1 %1200 }
 0x361   : > { %v1407_v21 = vpop.f32.mrb[0].mxu1 }
 0x362   : > { %v3767_v16 = vadd.f32 %v1407_v21, %v1166_v14  ;;  %v1409_v27 = vpop.f32.mrb[1].mxu1 }
 0x363   : > { %v3768_v46 = vadd.f32 %v1409_v27, %v1166_v14 }
 0x364   : > { %v4601_v26 = vmax.f32 %v3767_v16, 0.0 }
 0x365   : > { %v1413_v17 = vpop.f32.mrb[2].mxu1  ;;  %v4627_v15 = vmax.f32 %v3768_v46, 0.0 }
 0x366   : > { %6304 = vst [vmem:[#allocation3_spill] sm:$0xff] %v4601_v26  ;;  %v3769_v30 = vadd.f32 %v1413_v17, %v1171_v49  ;;  %v1415_v48 = vpop.f32.mrb[3].mxu1  ;;  %1470 = vrot.lane.b32.xlu0 %v4601_v26, %s3865_s9  ;;  %v1518_v17 = vld [vmem:[%s6271_s1] ss:$8 sm:$0x3] }
 0x367   : > { %6306 = vst [vmem:[#allocation5_spill] sm:$0xff] %v4627_v15  ;;  %v3770_v47 = vadd.f32 %v1415_v48, %v1171_v49 }
 0x368   : > { %v4605_v37 = vmax.f32 %v3769_v30, 0.0 }
 0x369   : > { %v1419_v6 = vpop.f32.mrb[4].mxu1  ;;  %v4637_v63 = vmax.f32 %v3770_v47, 0.0 }
 0x36a   : > { %6305 = vst [vmem:[#allocation4_spill] sm:$0xff] %v4605_v37  ;;  %v1421_v62 = vpop.f32.mrb[5].mxu1  ;;  %1562 = vrot.lane.b32.xlu0 %v4601_v26, %s3864_s8  ;;  %1472 = vrot.lane.b32.xlu1 %v4605_v37, %s3865_s9  ;;  %v3771_v42 = vadd.f32 %v1419_v6, %v1176_v19  ;;  %v4805_v6 = vrot.slane %v1518_v17, %v3996_v11 }
 0x36b   : > { %6307 = vst [vmem:[#allocation6_spill] sm:$0xff] %v4637_v63  ;;  %v3772_v29 = vadd.f32 %v1421_v62, %v1176_v19  ;;  %v4808_v62 = vrot.slane %v1518_v17, %v3998_v12 }
 0x36c   : > { %v4659_v23 = vmax.f32 %v3771_v42, 0.0 }
 0x36d   : > { %v1425_v5 = vpop.f32.mrb[6].mxu1  ;;  %v4683_v7 = vmax.f32 %v3772_v29, 0.0 }
 0x36e   : > { %v1427_v55 = vpop.f32.mrb[7].mxu1  ;;  %1654 = vrot.lane.b32.xlu0 %v4601_v26, %s3866_s10  ;;  %1564 = vrot.lane.b32.xlu1 %v4605_v37, %s3864_s8  ;;  %6308 = vst [vmem:[#allocation7_spill] sm:$0xff] %v4659_v23  ;;  %v3773_v24 = vadd.f32 %v1425_v5, %v1181_v33 }
 0x36f   : > { %6310 = vst [vmem:[#allocation9_spill] sm:$0xff] %v4683_v7  ;;  %v3774_v20 = vadd.f32 %v1427_v55, %v1181_v33 }
 0x370   : > { %v4665_v28 = vmax.f32 %v3773_v24, 0.0 }
 0x371   : > { %v1431_v59 = vpop.f32.mrb[8].mxu1  ;;  %v4689_v43 = vmax.f32 %v3774_v20, 0.0 }
 0x372   : > { %v4615_v22 = vpop.f32.mrb[9].mxu1  ;;  %1746 = vrot.lane.b32.xlu0 %v4601_v26, %s3867_s11  ;;  %1656 = vrot.lane.b32.xlu1 %v4605_v37, %s3866_s10  ;;  %6309 = vst [vmem:[#allocation8_spill] sm:$0xff] %v4665_v28  ;;  %v3775_v52 = vadd.f32 %v1431_v59, %v1186_v51 }
 0x373   : > { %6311 = vst [vmem:[#allocation10_spill] sm:$0xff] %v4689_v43  ;;  %v3776_v57 = vadd.f32 %v4615_v22, %v1186_v51 }
 0x374   : > { %v4703_v32 = vmax.f32 %v3775_v52, 0.0 }
 0x375   : > { %v1437_v61 = vpop.f32.mrb[10].mxu1  ;;  %v4724_v60 = vmax.f32 %v3776_v57, 0.0 }
 0x376   : > { %v4621_v8 = vpop.f32.mrb[11].mxu1  ;;  %1854 = vrot.lane.b32.xlu0 %v4601_v26, %s3868_s12  ;;  %1748 = vrot.lane.b32.xlu1 %v4605_v37, %s3867_s11  ;;  %6312 = vst [vmem:[#allocation11_spill] sm:$0xff] %v4703_v32  ;;  %v3777_v34 = vadd.f32 %v1437_v61, %v1191_v31 }
 0x377   : > { %v3778_v13 = vadd.f32 %v4621_v8, %v1191_v31 }
 0x378   : > { %v4709_v4 = vmax.f32 %v3777_v34, 0.0 }
 0x379   : > { %v4629_v53 = vpop.f32.mrb[12].mxu1  ;;  %v4731_v38 = vmax.f32 %v3778_v13, 0.0 }
 0x37a   : > { %v4631_v18 = vpop.f32.mrb[13].mxu1  ;;  %1486 = vrot.lane.b32.xlu0 %v4627_v15, %s3865_s9  ;;  %1856 = vrot.lane.b32.xlu1 %v4605_v37, %s3868_s12  ;;  %v3779_v58 = vadd.f32 %v4629_v53, %v1196_v56 }
 0x37b   : > { %v3780_v25 = vadd.f32 %v4631_v18, %v1196_v56 }
 0x37c   : > { %v4746_v0 = vmax.f32 %v3779_v58, 0.0 }
 0x37d   : > { %v4639_v44 = vpop.f32.mrb[14].mxu1  ;;  %v4770_v1 = vmax.f32 %v3780_v25, 0.0 }
 0x37e   : > { %v4641_v54 = vpop.f32.mrb[15].mxu1  ;;  %1578 = vrot.lane.b32.xlu0 %v4627_v15, %s3864_s8  ;;  %1488 = vrot.lane.b32.xlu1 %v4637_v63, %s3865_s9  ;;  %v3781_v35 = vadd.f32 %v4639_v44, %v1201_v3 }
 0x37f   : > { %v3782_v45 = vadd.f32 %v4641_v54, %v1201_v3 }
 0x380   : > { %v4753_v36 = vmax.f32 %v3781_v35, 0.0 }
 0x381   : > { %v4781_v14 = vmax.f32 %v3782_v45, 0.0 }
 0x382   : > { %1670 = vrot.lane.b32.xlu0 %v4627_v15, %s3866_s10  ;;  %1580 = vrot.lane.b32.xlu1 %v4637_v63, %s3864_s8 }
 0x386   : > { %1762 = vrot.lane.b32.xlu0 %v4627_v15, %s3867_s11  ;;  %1672 = vrot.lane.b32.xlu1 %v4637_v63, %s3866_s10 }
 0x38a   : > { %1870 = vrot.lane.b32.xlu0 %v4627_v15, %s3868_s12  ;;  %1764 = vrot.lane.b32.xlu1 %v4637_v63, %s3867_s11 }
 0x38e   : > { %1474 = vrot.lane.b32.xlu0 %v4659_v23, %s3865_s9  ;;  %1872 = vrot.lane.b32.xlu1 %v4637_v63, %s3868_s12 }
 0x392   : > { %1566 = vrot.lane.b32.xlu0 %v4659_v23, %s3864_s8  ;;  %1476 = vrot.lane.b32.xlu1 %v4665_v28, %s3865_s9 }
 0x396   : > { %1658 = vrot.lane.b32.xlu0 %v4659_v23, %s3866_s10  ;;  %1568 = vrot.lane.b32.xlu1 %v4665_v28, %s3864_s8 }
 0x39a   : > { %1750 = vrot.lane.b32.xlu0 %v4659_v23, %s3867_s11  ;;  %1660 = vrot.lane.b32.xlu1 %v4665_v28, %s3866_s10 }
 0x39e   : > { %1858 = vrot.lane.b32.xlu0 %v4659_v23, %s3868_s12  ;;  %1752 = vrot.lane.b32.xlu1 %v4665_v28, %s3867_s11 }
 0x3a2   : > { %1490 = vrot.lane.b32.xlu0 %v4683_v7, %s3865_s9  ;;  %1860 = vrot.lane.b32.xlu1 %v4665_v28, %s3868_s12 }
 0x3a6   : > { %1582 = vrot.lane.b32.xlu0 %v4683_v7, %s3864_s8  ;;  %1492 = vrot.lane.b32.xlu1 %v4689_v43, %s3865_s9 }
 0x3aa   : > { %1674 = vrot.lane.b32.xlu0 %v4683_v7, %s3866_s10  ;;  %1584 = vrot.lane.b32.xlu1 %v4689_v43, %s3864_s8 }
 0x3ae   : > { %1766 = vrot.lane.b32.xlu0 %v4683_v7, %s3867_s11  ;;  %1676 = vrot.lane.b32.xlu1 %v4689_v43, %s3866_s10 }
 0x3b2   : > { %1768 = vrot.lane.b32.xlu1 %v4689_v43, %s3867_s11  ;;  %1478 = vrot.lane.b32.xlu0 %v4703_v32, %s3865_s9 }
 0x3b6   : > { %1480 = vrot.lane.b32.xlu1 %v4709_v4, %s3865_s9  ;;  %1570 = vrot.lane.b32.xlu0 %v4703_v32, %s3864_s8 }
 0x3ba   : > { %1572 = vrot.lane.b32.xlu1 %v4709_v4, %s3864_s8  ;;  %1662 = vrot.lane.b32.xlu0 %v4703_v32, %s3866_s10 }
 0x3be   : > { %1664 = vrot.lane.b32.xlu1 %v4709_v4, %s3866_s10  ;;  %1754 = vrot.lane.b32.xlu0 %v4703_v32, %s3867_s11 }
 0x3c2   : > { %1756 = vrot.lane.b32.xlu1 %v4709_v4, %s3867_s11  ;;  %1494 = vrot.lane.b32.xlu0 %v4724_v60, %s3865_s9 }
 0x3c6   : > { %1496 = vrot.lane.b32.xlu1 %v4731_v38, %s3865_s9  ;;  %1586 = vrot.lane.b32.xlu0 %v4724_v60, %s3864_s8 }
 0x3ca   : > { %1588 = vrot.lane.b32.xlu1 %v4731_v38, %s3864_s8  ;;  %1678 = vrot.lane.b32.xlu0 %v4724_v60, %s3866_s10 }
 0x3ce   : > { %1680 = vrot.lane.b32.xlu1 %v4731_v38, %s3866_s10  ;;  %1770 = vrot.lane.b32.xlu0 %v4724_v60, %s3867_s11 }
 0x3d2   : > { %1772 = vrot.lane.b32.xlu1 %v4731_v38, %s3867_s11  ;;  %1482 = vrot.lane.b32.xlu0 %v4746_v0, %s3865_s9 }
 0x3d6   : > { %1484 = vrot.lane.b32.xlu1 %v4753_v36, %s3865_s9  ;;  %1574 = vrot.lane.b32.xlu0 %v4746_v0, %s3864_s8 }
 0x3d8   : > { %v1471_v40 = vpop.permute.xlu0 %1470 }
 0x3da   : > { %1576 = vrot.lane.b32.xlu1 %v4753_v36, %s3864_s8  ;;  %1666 = vrot.lane.b32.xlu0 %v4746_v0, %s3866_s10 }
 0x3dc   : > { %v1473_v39 = vpop.permute.xlu1 %1472  ;;  %v4764_v41 = vpop.permute.xlu0 %1562 }
 0x3de   : > { %1668 = vrot.lane.b32.xlu1 %v4753_v36, %s3866_s10  ;;  %1758 = vrot.lane.b32.xlu0 %v4746_v0, %s3867_s11 }
 0x3e0   : > { %v4773_v50 = vpop.permute.xlu1 %1564  ;;  %v4775_v9 = vpop.permute.xlu0 %1654 }
 0x3e2   : > { %1760 = vrot.lane.b32.xlu1 %v4753_v36, %s3867_s11  ;;  %1498 = vrot.lane.b32.xlu0 %v4770_v1, %s3865_s9 }
 0x3e4   : > { %v4783_v21 = vpop.permute.xlu1 %1656  ;;  %v4785_v16 = vpop.permute.xlu0 %1746 }
 0x3e6   : > { %1500 = vrot.lane.b32.xlu1 %v4781_v14, %s3865_s9  ;;  %1874 = vrot.lane.b32.xlu0 %v4683_v7, %s3868_s12 }
 0x3e8   : > { %v4791_v27 = vpop.permute.xlu1 %1748  ;;  %v4793_v49 = vpop.permute.xlu0 %1854 }
 0x3e9   : > { %6313 = vst [vmem:[#allocation12_spill] sm:$0xff] %v4793_v49 }
 0x3ea   : > { %1876 = vrot.lane.b32.xlu1 %v4689_v43, %s3868_s12  ;;  %1590 = vrot.lane.b32.xlu0 %v4770_v1, %s3864_s8 }
 0x3ec   : > { %v4802_v30 = vpop.permute.xlu1 %1856  ;;  %v1487_v48 = vpop.permute.xlu0 %1486 }
 0x3ed   : > { %6314 = vst [vmem:[#allocation13_spill] sm:$0xff] %v4802_v30  ;;  %v1502_v5 = vsel %vm290_vm1, %v1471_v40, %v1487_v48  ;;  %v1510_v55 = vsel %vm290_vm1, %v1487_v48, %v1471_v40  ;;  %v2223_v40 = vld [vmem:[%s6274_s4 + $0x8] sm:$0xff] }
 0x3ee   : > { %1864 = vrot.lane.b32.xlu1 %v4709_v4, %s3868_s12  ;;  %1682 = vrot.lane.b32.xlu0 %v4770_v1, %s3866_s10  ;;  %v1530_v8 = vmul.f32 %v4805_v6, %v1510_v55  ;;  %v1531_v47 = vmul.f32 %v4808_v62, %v1502_v5 }
 0x3ef   : > { %2487 = vmatprep.mubr.f32.mxu0 %v2223_v40 }
 0x3f0   : > { %v1489_v59 = vpop.permute.xlu1 %1488  ;;  %v4818_v22 = vpop.permute.xlu0 %1578 }
 0x3f1   : > { %v1503_v46 = vsel %vm290_vm1, %v1473_v39, %v1489_v59  ;;  %v1511_v61 = vsel %vm290_vm1, %v1489_v59, %v1473_v39 }
 0x3f2   : > { %v1532_v53 = vmul.f32 %v4805_v6, %v1511_v61  ;;  %v1533_v18 = vmul.f32 %v4808_v62, %v1503_v46  ;;  %1880 = vrot.lane.b32.xlu1 %v4731_v38, %s3868_s12  ;;  %1774 = vrot.lane.b32.xlu0 %v4770_v1, %s3867_s11 }
 0x3f4   : > { %v3553_v44 = vpack.c.bf16 %v1532_v53, %v1530_v8  ;;  %v4832_v54 = vpop.permute.xlu1 %1580  ;;  %v4834_v19 = vpop.permute.xlu0 %1670  ;;  %v3551_v42 = vpack.c.bf16 %v1533_v18, %v1531_v47 }
 0x3f6   : > { %1592 = vrot.lane.b32.xlu1 %v4781_v14, %s3864_s8  ;;  %1862 = vrot.lane.b32.xlu0 %v4703_v32, %s3868_s12 }
 0x3f7   : > { %3552 = vmatprep.subr.bf16.mxu0 %v3551_v42 }
 0x3f8   : > { %3554 = vmatpush1.bf16.msra.mxu0 %v3553_v44  ;;  %v4840_v33 = vpop.permute.xlu1 %1672  ;;  %v4842_v24 = vpop.permute.xlu0 %1762 }
 0x3fa   : > { %1868 = vrot.lane.b32.xlu1 %v4753_v36, %s3868_s12  ;;  %1878 = vrot.lane.b32.xlu0 %v4724_v60, %s3868_s12 }
 0x3fc   : > { %v4848_v29 = vpop.permute.xlu1 %1764  ;;  %v4850_v20 = vpop.permute.xlu0 %1870 }
 0x3fd   : > { %6315 = vst [vmem:[#allocation14_spill] sm:$0xff] %v4850_v20 }
 0x3fe   : > { %1948 = vrot.lane.b32.xlu1 %v4605_v37, %s3869_s13  ;;  %1866 = vrot.lane.b32.xlu0 %v4746_v0, %s3868_s12 }
 0x400   : > { %v4856_v51 = vpop.permute.xlu1 %1872  ;;  %v1475_v52 = vpop.permute.xlu0 %1474 }
 0x401   : > { %6316 = vst [vmem:[#allocation15_spill] sm:$0xff] %v4856_v51 }
 0x402   : > { %1964 = vrot.lane.b32.xlu1 %v4637_v63, %s3869_s13  ;;  %1882 = vrot.lane.b32.xlu0 %v4770_v1, %s3868_s12 }
 0x404   : > { %v1477_v31 = vpop.permute.xlu1 %1476  ;;  %v4862_v34 = vpop.permute.xlu0 %1566 }
 0x406   : > { %1684 = vrot.lane.b32.xlu1 %v4781_v14, %s3866_s10  ;;  %1946 = vrot.lane.b32.xlu0 %v4601_v26, %s3869_s13 }
 0x408   : > { %v4868_v57 = vpop.permute.xlu1 %1568  ;;  %v4870_v13 = vpop.permute.xlu0 %1658 }
 0x40a   : > { %1952 = vrot.lane.b32.xlu1 %v4665_v28, %s3869_s13  ;;  %1962 = vrot.lane.b32.xlu0 %v4627_v15, %s3869_s13 }
 0x40c   : > { %v4876_v56 = vpop.permute.xlu1 %1660  ;;  %v4878_v58 = vpop.permute.xlu0 %1750 }
 0x40e   : > { %1968 = vrot.lane.b32.xlu1 %v4689_v43, %s3869_s13  ;;  %1950 = vrot.lane.b32.xlu0 %v4659_v23, %s3869_s13 }
 0x410   : > { %v4884_v3 = vpop.permute.xlu1 %1752  ;;  %v4886_v35 = vpop.permute.xlu0 %1858 }
 0x411   : > { %6317 = vst [vmem:[#allocation16_spill] sm:$0xff] %v4886_v35 }
 0x412   : > { %1956 = vrot.lane.b32.xlu1 %v4709_v4, %s3869_s13  ;;  %1966 = vrot.lane.b32.xlu0 %v4683_v7, %s3869_s13 }
 0x414   : > { %v4895_v25 = vpop.permute.xlu1 %1860  ;;  %v1491_v39 = vpop.permute.xlu0 %1490 }
 0x415   : > { %6318 = vst [vmem:[#allocation17_spill] sm:$0xff] %v4895_v25  ;;  %v1504_v45 = vsel %vm290_vm1, %v1475_v52, %v1491_v39  ;;  %v1512_v17 = vsel %vm290_vm1, %v1491_v39, %v1475_v52 }
 0x416   : > { %1776 = vrot.lane.b32.xlu1 %v4781_v14, %s3867_s11  ;;  %1954 = vrot.lane.b32.xlu0 %v4703_v32, %s3869_s13  ;;  %v1534_v46 = vmul.f32 %v4805_v6, %v1512_v17  ;;  %v1535_v61 = vmul.f32 %v4808_v62, %v1504_v45 }
 0x418   : > { %v1493_v48 = vpop.permute.xlu1 %1492  ;;  %v4905_v5 = vpop.permute.xlu0 %1582 }
 0x419   : > { %v1505_v55 = vsel %vm290_vm1, %v1477_v31, %v1493_v48  ;;  %v1513_v59 = vsel %vm290_vm1, %v1493_v48, %v1477_v31 }
 0x41a   : > { %v1536_v8 = vmul.f32 %v4805_v6, %v1513_v59  ;;  %v1537_v47 = vmul.f32 %v4808_v62, %v1505_v55  ;;  %1972 = vrot.lane.b32.xlu1 %v4731_v38, %s3869_s13  ;;  %1970 = vrot.lane.b32.xlu0 %v4724_v60, %s3869_s13 }
 0x41c   : > { %v3557_v53 = vpack.c.bf16 %v1536_v8, %v1534_v46  ;;  %v4919_v18 = vpop.permute.xlu1 %1584  ;;  %v4921_v44 = vpop.permute.xlu0 %1674  ;;  %v3555_v42 = vpack.c.bf16 %v1537_v47, %v1535_v61 }
 0x41e   : > { %1960 = vrot.lane.b32.xlu1 %v4753_v36, %s3869_s13  ;;  %1958 = vrot.lane.b32.xlu0 %v4746_v0, %s3869_s13 }
 0x41f   : > { %3556 = vmatprep.subr.bf16.mxu0 %v3555_v42 }
 0x420   : > { %3558 = vmatpush1.bf16.msra.mxu0 %v3557_v53  ;;  %v4927_v52 = vpop.permute.xlu1 %1676  ;;  %v4929_v31 = vpop.permute.xlu0 %1766 }
 0x422   : > { %2040 = vrot.lane.b32.xlu1 %v4605_v37, %s3871_s14  ;;  %1974 = vrot.lane.b32.xlu0 %v4770_v1, %s3869_s13 }
 0x424   : > { %v4935_v40 = vpop.permute.xlu1 %1768  ;;  %v1479_v39 = vpop.permute.xlu0 %1478 }
 0x426   : > { %2056 = vrot.lane.b32.xlu1 %v4637_v63, %s3871_s14  ;;  %2038 = vrot.lane.b32.xlu0 %v4601_v26, %s3871_s14 }
 0x428   : > { %v1481_v45 = vpop.permute.xlu1 %1480  ;;  %v4941_v17 = vpop.permute.xlu0 %1570 }
 0x42a   : > { %2044 = vrot.lane.b32.xlu1 %v4665_v28, %s3871_s14  ;;  %2054 = vrot.lane.b32.xlu0 %v4627_v15, %s3871_s14 }
 0x42c   : > { %v4947_v48 = vpop.permute.xlu1 %1572  ;;  %v4949_v55 = vpop.permute.xlu0 %1662 }
 0x42e   : > { %2060 = vrot.lane.b32.xlu1 %v4689_v43, %s3871_s14  ;;  %2042 = vrot.lane.b32.xlu0 %v4659_v23, %s3871_s14 }
 0x430   : > { %v4955_v59 = vpop.permute.xlu1 %1664  ;;  %v4957_v46 = vpop.permute.xlu0 %1754 }
 0x431   : > { %6319 = vst [vmem:[#allocation18_spill] sm:$0xff] %v4957_v46 }
 0x432   : > { %2048 = vrot.lane.b32.xlu1 %v4709_v4, %s3871_s14  ;;  %2058 = vrot.lane.b32.xlu0 %v4683_v7, %s3871_s14 }
 0x434   : > { %v4963_v61 = vpop.permute.xlu1 %1756  ;;  %v1495_v8 = vpop.permute.xlu0 %1494 }
 0x435   : > { %6320 = vst [vmem:[#allocation19_spill] sm:$0xff] %v4963_v61  ;;  %v1506_v47 = vsel %vm290_vm1, %v1479_v39, %v1495_v8  ;;  %v1514_v53 = vsel %vm290_vm1, %v1495_v8, %v1479_v39  ;;  %v1603_v61 = vsel %vm313_vm0, %v4832_v54, %v4773_v50 }
 0x436   : > { %1884 = vrot.lane.b32.xlu1 %v4781_v14, %s3868_s12  ;;  %2046 = vrot.lane.b32.xlu0 %v4703_v32, %s3871_s14  ;;  %v1538_v20 = vmul.f32 %v4805_v6, %v1514_v53  ;;  %v1539_v49 = vmul.f32 %v4808_v62, %v1506_v47 }
 0x438   : > { %v1497_v42 = vpop.permute.xlu1 %1496  ;;  %v4973_v2 = vpop.permute.xlu0 %1586 }
 0x439   : > { %v1507_v35 = vsel %vm290_vm1, %v1481_v45, %v1497_v42  ;;  %v1515_v25 = vsel %vm290_vm1, %v1497_v42, %v1481_v45 }
 0x43a   : > { %v1540_v51 = vmul.f32 %v4805_v6, %v1515_v25  ;;  %v1541_v39 = vmul.f32 %v4808_v62, %v1507_v35  ;;  %2064 = vrot.lane.b32.xlu1 %v4731_v38, %s3871_s14  ;;  %2062 = vrot.lane.b32.xlu0 %v4724_v60, %s3871_s14 }
 0x43c   : > { %v3561_v8 = vpack.c.bf16 %v1540_v51, %v1538_v20  ;;  %v4987_v30 = vpop.permute.xlu1 %1588  ;;  %v4989_v46 = vpop.permute.xlu0 %1678  ;;  %v3559_v45 = vpack.c.bf16 %v1541_v39, %v1539_v49 }
 0x43e   : > { %2052 = vrot.lane.b32.xlu1 %v4753_v36, %s3871_s14  ;;  %2050 = vrot.lane.b32.xlu0 %v4746_v0, %s3871_s14 }
 0x43f   : > { %3560 = vmatprep.subr.bf16.mxu0 %v3559_v45 }
 0x440   : > { %3562 = vmatpush1.bf16.msra.mxu0 %v3561_v8  ;;  %v4995_v35 = vpop.permute.xlu1 %1680  ;;  %v4997_v25 = vpop.permute.xlu0 %1770 }
 0x441   : > { %6321 = vst [vmem:[#allocation20_spill] sm:$0xff] %v4997_v25 }
 0x442   : > { %2132 = vrot.lane.b32.xlu1 %v4605_v37, %s3872_s15  ;;  %2066 = vrot.lane.b32.xlu0 %v4770_v1, %s3871_s14 }
 0x444   : > { %v5003_v20 = vpop.permute.xlu1 %1772  ;;  %v1483_v49 = vpop.permute.xlu0 %1482 }
 0x445   : > { %6322 = vst [vmem:[#allocation21_spill] sm:$0xff] %v5003_v20 }
 0x446   : > { %1976 = vrot.lane.b32.xlu1 %v4781_v14, %s3869_s13  ;;  %2130 = vrot.lane.b32.xlu0 %v4601_v26, %s3872_s15 }
 0x448   : > { %v1485_v51 = vpop.permute.xlu1 %1484  ;;  %v5009_v47 = vpop.permute.xlu0 %1574 }
 0x44a   : > { %2148 = vrot.lane.b32.xlu1 %v4637_v63, %s3872_s15  ;;  %2146 = vrot.lane.b32.xlu0 %v4627_v15, %s3872_s15 }
 0x44c   : > { %v5015_v53 = vpop.permute.xlu1 %1576  ;;  %v5017_v42 = vpop.permute.xlu0 %1666 }
 0x44e   : > { %2136 = vrot.lane.b32.xlu1 %v4665_v28, %s3872_s15  ;;  %2134 = vrot.lane.b32.xlu0 %v4659_v23, %s3872_s15  ;;  %v3442_v28 = vld [vmem:[%s6271_s1 + $0x1] ss:$8 sm:$0x3] }
 0x44f   : > { %v5051_v15 = vrot.slane %v3442_v28, %v3998_v12 }
 0x450   : > { %v5023_v39 = vpop.permute.xlu1 %1668  ;;  %v5025_v8 = vpop.permute.xlu0 %1758 }
 0x451   : > { %6323 = vst [vmem:[#allocation22_spill] sm:$0xff] %v5025_v8 }
 0x452   : > { %2152 = vrot.lane.b32.xlu1 %v4689_v43, %s3872_s15  ;;  %2150 = vrot.lane.b32.xlu0 %v4683_v7, %s3872_s15  ;;  %v1595_v43 = vsel %vm313_vm0, %v4773_v50, %v4832_v54 }
 0x453   : > { %v1625_v20 = vmul.f32 %v5051_v15, %v1595_v43  ;;  %v1602_v43 = vsel %vm313_vm0, %v4818_v22, %v4764_v41 }
 0x454   : > { %v5031_v45 = vpop.permute.xlu1 %1760  ;;  %v1499_v37 = vpop.permute.xlu0 %1498 }
 0x455   : > { %6324 = vst [vmem:[#allocation23_spill] sm:$0xff] %v5031_v45  ;;  %v1508_v23 = vsel %vm290_vm1, %v1483_v49, %v1499_v37  ;;  %v1516_v26 = vsel %vm290_vm1, %v1499_v37, %v1483_v49  ;;  %v1594_v45 = vsel %vm313_vm0, %v4764_v41, %v4818_v22 }
 0x456   : > { %2068 = vrot.lane.b32.xlu1 %v4781_v14, %s3871_s14  ;;  %2138 = vrot.lane.b32.xlu0 %v4703_v32, %s3872_s15  ;;  %v1542_v32 = vmul.f32 %v4805_v6, %v1516_v26  ;;  %v1543_v8 = vmul.f32 %v4808_v62, %v1508_v23  ;;  %v1615_v26 = vrot.slane %v3442_v28, %v3996_v11 }
 0x457   : > { %v1597_v23 = vsel %vm313_vm0, %v4868_v57, %v4919_v18  ;;  %v1623_v50 = vmul.f32 %v5051_v15, %v1594_v45  ;;  %v1596_v28 = vsel %vm313_vm0, %v4862_v34, %v4905_v5 }
 0x458   : > { %v1501_v7 = vpop.permute.xlu1 %1500  ;;  %v5048_v63 = vpop.permute.xlu0 %1874  ;;  %v1624_v54 = vmul.f32 %v1615_v26, %v1603_v61  ;;  %v1622_v22 = vmul.f32 %v1615_v26, %v1602_v43  ;;  %v1599_v61 = vsel %vm313_vm0, %v4947_v48, %v4987_v30 }
 0x459   : > { %6325 = vst [vmem:[#allocation24_spill] sm:$0xff] %v5048_v63  ;;  %v1509_v37 = vsel %vm290_vm1, %v1485_v51, %v1501_v7  ;;  %v1517_v49 = vsel %vm290_vm1, %v1501_v7, %v1485_v51  ;;  %v3567_v41 = vpack.c.bf16 %v1625_v20, %v1623_v50 }
 0x45a   : > { %v1544_v63 = vmul.f32 %v4805_v6, %v1517_v49  ;;  %v1545_v25 = vmul.f32 %v4808_v62, %v1509_v37  ;;  %2140 = vrot.lane.b32.xlu1 %v4709_v4, %s3872_s15  ;;  %2154 = vrot.lane.b32.xlu0 %v4724_v60, %s3872_s15  ;;  %v3569_v20 = vpack.c.bf16 %v1624_v54, %v1622_v22 }
 0x45b   : > { %v1598_v37 = vsel %vm313_vm0, %v4941_v17, %v4973_v2  ;;  %v1607_v49 = vsel %vm313_vm0, %v4987_v30, %v4947_v48  ;;  %v3443_v30 = vld [vmem:[%s6271_s1 + $0x2] ss:$8 sm:$0x3] }
 0x45c   : > { %v3565_v7 = vpack.c.bf16 %v1544_v63, %v1542_v32  ;;  %v5079_v6 = vpop.permute.xlu1 %1876  ;;  %v1591_v62 = vpop.permute.xlu0 %1590  ;;  %v3563_v51 = vpack.c.bf16 %v1545_v25, %v1543_v8  ;;  %v1605_v63 = vsel %vm313_vm0, %v4919_v18, %v4868_v57  ;;  %v1629_v32 = vmul.f32 %v5051_v15, %v1597_v23 }
 0x45d   : > { %v1604_v57 = vsel %vm313_vm0, %v4905_v5, %v4862_v34  ;;  %v1627_v18 = vmul.f32 %v5051_v15, %v1596_v28  ;;  %v1628_v45 = vmul.f32 %v1615_v26, %v1605_v63  ;;  %v1633_v34 = vmul.f32 %v5051_v15, %v1599_v61 }
 0x45e   : > { %2156 = vrot.lane.b32.xlu1 %v4731_v38, %s3872_s15  ;;  %2142 = vrot.lane.b32.xlu0 %v4746_v0, %s3872_s15  ;;  %v1626_v23 = vmul.f32 %v1615_v26, %v1604_v57  ;;  %v1631_v48 = vmul.f32 %v5051_v15, %v1598_v37  ;;  %v1632_v43 = vmul.f32 %v1615_v26, %v1607_v49 }
 0x45f   : > { %3564 = vmatprep.subr.bf16.mxu0 %v3563_v51  ;;  %v3571_v5 = vpack.c.bf16 %v1629_v32, %v1627_v18  ;;  %v5146_v32 = vrot.slane %v3443_v30, %v3998_v12  ;;  %v1686_v61 = vsel %vm337_vm2, %v4775_v9, %v4834_v19 }
 0x460   : > { %3566 = vmatpush1.bf16.msra.mxu0 %v3565_v7  ;;  %v5103_v25 = vpop.permute.xlu1 %1864  ;;  %v5105_v8 = vpop.permute.xlu0 %1682  ;;  %v1606_v7 = vsel %vm313_vm0, %v4973_v2, %v4941_v17  ;;  %v3573_v54 = vpack.c.bf16 %v1628_v45, %v1626_v23  ;;  %v1600_v2 = vsel %vm313_vm0, %v5009_v47, %v1591_v62  ;;  %v1608_v17 = vsel %vm313_vm0, %v1591_v62, %v5009_v47 }
 0x461   : > { %3568 = vmatprep.subr.bf16.mxu0 %v3567_v41  ;;  %v1630_v28 = vmul.f32 %v1615_v26, %v1606_v7  ;;  %v3575_v63 = vpack.c.bf16 %v1633_v34, %v1631_v48  ;;  %v1687_v41 = vsel %vm337_vm2, %v4783_v21, %v4840_v33  ;;  %v1635_v45 = vmul.f32 %v5051_v15, %v1600_v2 }
 0x462   : > { %2144 = vrot.lane.b32.xlu1 %v4753_v36, %s3872_s15  ;;  %2158 = vrot.lane.b32.xlu0 %v4770_v1, %s3872_s15  ;;  %v1695_v34 = vsel %vm337_vm2, %v4840_v33, %v4783_v21  ;;  %v5172_v23 = vrot.slane %v3443_v30, %v3996_v11  ;;  %v1694_v21 = vsel %vm337_vm2, %v4834_v19, %v4775_v9  ;;  %v2386_v19 = vld [vmem:[%s6276_s6] sm:$0xff] }
 0x463   : > { %v3577_v57 = vpack.c.bf16 %v1632_v43, %v1630_v28  ;;  %v1715_v33 = vmul.f32 %v5146_v32, %v1686_v61  ;;  %v1688_v43 = vsel %vm337_vm2, %v4870_v13, %v4921_v44 }
 0x464   : > { %3570 = vmatpush1.bf16.msra.mxu0 %v3569_v20  ;;  %v5129_v51 = vpop.permute.xlu1 %1880  ;;  %v5135_v50 = vpop.permute.xlu0 %1774  ;;  %v1634_v20 = vmul.f32 %v1615_v26, %v1608_v17  ;;  %v1716_v30 = vmul.f32 %v5172_v23, %v1695_v34  ;;  %v1714_v2 = vmul.f32 %v5172_v23, %v1694_v21  ;;  %v1691_v17 = vsel %vm337_vm2, %v4955_v59, %v4995_v35 }
 0x465   : > { %3572 = vmatprep.subr.bf16.mxu0 %v3571_v5  ;;  %v1717_v5 = vmul.f32 %v5146_v32, %v1687_v41  ;;  %v3875_v41 = vmov 2   ;;  %v1700_v21 = vsel %vm337_vm2, %v5105_v8, %v5017_v42 }
 0x466   : > { %2160 = vrot.lane.b32.xlu1 %v4781_v14, %s3872_s15  ;;  %3854 = vset.pattern.permute.xlu0 %v3875_v41 }
 0x467   : > { %v3583_v9 = vpack.c.bf16 %v1717_v5, %v1715_v33  ;;  %2392 = vperm.xlu0 %3854, %v2386_v19   ;;  %3855 = vset.pattern.permute.xlu1 %v3875_v41 }
 0x468   : > { %3574 = vmatpush1.bf16.msra.mxu0 %v3573_v54  ;;  %v1593_v22 = vpop.permute.xlu1 %1592  ;;  %v5162_v18 = vpop.permute.xlu0 %1862  ;;  %v1697_v54 = vsel %vm337_vm2, %v4927_v52, %v4876_v56 }
 0x469   : > { %v1601_v47 = vsel %vm313_vm0, %v5015_v53, %v1593_v22  ;;  %v1609_v62 = vsel %vm313_vm0, %v1593_v22, %v5015_v53  ;;  %3576 = vmatprep.subr.bf16.mxu0 %v3575_v63  ;;  %v1689_v53 = vsel %vm337_vm2, %v4876_v56, %v4927_v52  ;;  %v2387_v56 = vld [vmem:[%s6276_s6 + $0x8] sm:$0xff]  ;;  %v1696_v52 = vsel %vm337_vm2, %v4921_v44, %v4870_v13  ;;  %v2389_v13 = vld [vmem:[%s6276_s6 + $0x18] sm:$0xff] }
 0x46a   : > { %v1636_v37 = vmul.f32 %v1615_v26, %v1609_v62  ;;  %v1637_v49 = vmul.f32 %v5051_v15, %v1601_v47  ;;  %v1721_v28 = vmul.f32 %v5146_v32, %v1689_v53  ;;  %v1719_v22 = vmul.f32 %v5146_v32, %v1688_v43  ;;  %2397 = vperm.xlu1 %3855, %v2387_v56  }
 0x46b   : > { %v1720_v47 = vmul.f32 %v5172_v23, %v1697_v54  ;;  %v1690_v62 = vsel %vm337_vm2, %v4949_v55, %v4989_v46  ;;  %v1725_v44 = vmul.f32 %v5146_v32, %v1691_v17  ;;  %2407 = vperm.xlu0 %3854, %v2389_v13   ;;  %v1779_v43 = vsel %vm361_vm3, %v4791_v27, %v4848_v29 }
 0x46c   : > { %v3581_v7 = vpack.c.bf16 %v1636_v37, %v1634_v20  ;;  %3578 = vmatpush1.bf16.msra.mxu0 %v3577_v57  ;;  %v5178_v26 = vpop.permute.xlu1 %1868  ;;  %v3579_v15 = vpack.c.bf16 %v1637_v49, %v1635_v45  ;;  %v5185_v48 = vpop.permute.xlu0 %1878  ;;  %v3585_v57 = vpack.c.bf16 %v1716_v30, %v1714_v2  ;;  %v1699_v20 = vsel %vm337_vm2, %v4995_v35, %v4955_v59  ;;  %v2388_v59 = vld [vmem:[%s6276_s6 + $0x10] sm:$0xff]  ;;  %v3444_v35 = vld [vmem:[%s6271_s1 + $0x3] ss:$8 sm:$0x3] }
 0x46d   : > { %v3587_v45 = vpack.c.bf16 %v1721_v28, %v1719_v22  ;;  %v1718_v37 = vmul.f32 %v5172_v23, %v1696_v52  ;;  %v1698_v49 = vsel %vm337_vm2, %v4989_v46, %v4949_v55  ;;  %v1723_v5 = vmul.f32 %v5146_v32, %v1690_v62 }
 0x46e   : > { %3580 = vmatprep.subr.bf16.mxu0 %v3579_v15  ;;  %v1724_v53 = vmul.f32 %v5172_v23, %v1699_v20  ;;  %v1722_v46 = vmul.f32 %v5172_v23, %v1698_v49  ;;  %v1692_v15 = vsel %vm337_vm2, %v5017_v42, %v5105_v8  ;;  %2402 = vperm.xlu1 %3855, %v2388_v59   ;;  %v6327_v49 = vld [vmem:[#allocation19_spill] sm:$0xff] }
 0x46f   : > { %v3589_v55 = vpack.c.bf16 %v1720_v47, %v1718_v37  ;;  %v3591_v33 = vpack.c.bf16 %v1725_v44, %v1723_v5  ;;  %v5257_v30 = vrot.slane %v3444_v35, %v3998_v12  ;;  %v1778_v28 = vsel %vm361_vm3, %v4785_v16, %v4842_v24 }
 0x470   : > { %3582 = vmatpush1.bf16.msra.mxu0 %v3581_v7  ;;  %v5205_v63 = vpop.permute.xlu1 %1948  ;;  %v5215_v61 = vpop.permute.xlu0 %1866  ;;  %v1726_v2 = vmul.f32 %v5172_v23, %v1700_v21  ;;  %v1727_v17 = vmul.f32 %v5146_v32, %v1692_v15  ;;  %v1787_v52 = vsel %vm361_vm3, %v4848_v29, %v4791_v27  ;;  %v1780_v13 = vsel %vm361_vm3, %v4878_v58, %v4929_v31  ;;  %v6329_v15 = vld [vmem:[#allocation18_spill] sm:$0xff] }
 0x471   : > { %3584 = vmatprep.subr.bf16.mxu0 %v3583_v9  ;;  %v3593_v9 = vpack.c.bf16 %v1724_v53, %v1722_v46  ;;  %v1809_v22 = vmul.f32 %v5257_v30, %v1779_v43  ;;  %v1807_v27 = vmul.f32 %v5257_v30, %v1778_v28  ;;  %v1789_v44 = vsel %vm361_vm3, %v4935_v40, %v4884_v3  ;;  %v6328_v46 = vld [vmem:[#allocation20_spill] sm:$0xff] }
 0x472   : > { %v1788_v5 = vsel %vm361_vm3, %v4929_v31, %v4878_v58  ;;  %v1811_v53 = vmul.f32 %v5257_v30, %v1780_v13  ;;  %v1782_v21 = vsel %vm361_vm3, %v6329_v15, %v6328_v46 }
 0x473   : > { %v3599_v37 = vpack.c.bf16 %v1809_v22, %v1807_v27 }
 0x474   : > { %3586 = vmatpush1.bf16.msra.mxu0 %v3585_v57  ;;  %v5235_v34 = vpop.permute.xlu1 %1964  ;;  %v5245_v7 = vpop.permute.xlu0 %1882  ;;  %v1781_v57 = vsel %vm361_vm3, %v4884_v3, %v4935_v40 }
 0x475   : > { %3588 = vmatprep.subr.bf16.mxu0 %v3587_v45  ;;  %v1813_v45 = vmul.f32 %v5257_v30, %v1781_v57 }
 0x477   : > { %v3603_v58 = vpack.c.bf16 %v1813_v45, %v1811_v53 }
 0x478   : > { %3590 = vmatpush1.bf16.msra.mxu0 %v3589_v55  ;;  %v1685_v54 = vpop.permute.xlu1 %1684  ;;  %v5273_v19 = vpop.permute.xlu0 %1946 }
 0x479   : > { %v1693_v42 = vsel %vm337_vm2, %v5023_v39, %v1685_v54  ;;  %v1701_v8 = vsel %vm337_vm2, %v1685_v54, %v5023_v39  ;;  %3592 = vmatprep.subr.bf16.mxu0 %v3591_v33  ;;  %v1799_v39 = vrot.slane %v3444_v35, %v3996_v11  ;;  %v1790_v54 = vsel %vm361_vm3, %v6328_v46, %v6329_v15  ;;  %v6334_v46 = vld [vmem:[#allocation3_spill] sm:$0xff]  ;;  %v6335_v15 = vld [vmem:[#allocation4_spill] sm:$0xff] }
 0x47a   : > { %v1728_v41 = vmul.f32 %v5172_v23, %v1701_v8  ;;  %v1729_v56 = vmul.f32 %v5146_v32, %v1693_v42  ;;  %v1786_v32 = vsel %vm361_vm3, %v4842_v24, %v4785_v16  ;;  %v6326_v24 = vld [vmem:[#allocation21_spill] sm:$0xff] }
 0x47b   : > { %v1808_v20 = vmul.f32 %v1799_v39, %v1787_v52  ;;  %v1806_v16 = vmul.f32 %v1799_v39, %v1786_v32  ;;  %v1783_v59 = vsel %vm361_vm3, %v6327_v49, %v6326_v24  ;;  %v1812_v55 = vmul.f32 %v1799_v39, %v1789_v44 }
 0x47c   : > { %v3597_v47 = vpack.c.bf16 %v1728_v41, %v1726_v2  ;;  %3594 = vmatpush1.bf16.msra.mxu0 %v3593_v9  ;;  %v5289_v62 = vpop.permute.xlu1 %1952  ;;  %v3595_v23 = vpack.c.bf16 %v1729_v56, %v1727_v17  ;;  %v5296_v29 = vpop.permute.xlu0 %1962  ;;  %v1791_v33 = vsel %vm361_vm3, %v6326_v24, %v6327_v49  ;;  %v1817_v43 = vmul.f32 %v5257_v30, %v1783_v59  ;;  %v6330_v41 = vld [vmem:[#allocation22_spill] sm:$0xff]  ;;  %v6332_v59 = vld [vmem:[#allocation5_spill] sm:$0xff] }
 0x47d   : > { %v3601_v40 = vpack.c.bf16 %v1808_v20, %v1806_v16  ;;  %v1810_v31 = vmul.f32 %v1799_v39, %v1788_v5  ;;  %v1815_v9 = vmul.f32 %v5257_v30, %v1782_v21  ;;  %v1816_v42 = vmul.f32 %v1799_v39, %v1791_v33  ;;  %v6333_v5 = vld [vmem:[#allocation6_spill] sm:$0xff]  ;;  %v6336_v33 = vld [vmem:[#allocation9_spill] sm:$0xff] }
 0x47e   : > { %3596 = vmatprep.subr.bf16.mxu0 %v3595_v23  ;;  %v1814_v17 = vmul.f32 %v1799_v39, %v1790_v54  ;;  %v1784_v56 = vsel %vm361_vm3, %v6330_v41, %v5135_v50  ;;  %v1792_v52 = vsel %vm361_vm3, %v5135_v50, %v6330_v41  ;;  %v6331_v23 = vld [vmem:[#allocation23_spill] sm:$0xff]  ;;  %v3615_v53 = vpack.c.bf16 %v6333_v5, %v6332_v59  ;;  %v2227_v54 = vld [vmem:[%s6274_s4 + $0x28] sm:$0xff] }
 0x47f   : > { %v3605_v2 = vpack.c.bf16 %v1812_v55, %v1810_v31  ;;  %v3607_v22 = vpack.c.bf16 %v1817_v43, %v1815_v9  ;;  %v1818_v13 = vmul.f32 %v1799_v39, %v1792_v52  ;;  %v1819_v44 = vmul.f32 %v5257_v30, %v1784_v56  ;;  %v2228_v55 = vld [vmem:[%s6274_s4 + $0x30] sm:$0xff]  ;;  %v6337_v43 = vld [vmem:[#allocation10_spill] sm:$0xff]  ;;  %v6339_v41 = vld [vmem:[#allocation8_spill] sm:$0xff] }
 0x480   : > { %3598 = vmatpush1.bf16.msra.mxu0 %v3597_v47  ;;  %v5311_v35 = vpop.permute.xlu1 %1968  ;;  %v5318_v3 = vpop.permute.xlu0 %1950  ;;  %v3609_v47 = vpack.c.bf16 %v1816_v42, %v1814_v17  ;;  %v3617_v21 = vpack.c.bf16 %v6335_v15, %v6334_v46  ;;  %v2233_v42 = vld [vmem:[%s6274_s4 + $0x58] sm:$0xff]  ;;  %v6338_v17 = vld [vmem:[#allocation7_spill] sm:$0xff]  ;;  %v3623_v52 = vpack.c.bf16 %v4731_v38, %v4724_v60  ;;  %v6342_v38 = vld [vmem:[#allocation12_spill] sm:$0xff]  ;;  %v3627_v5 = vpack.c.bf16 %v4781_v14, %v4770_v1 }
 0x481   : > { %3600 = vmatprep.subr.bf16.mxu0 %v3599_v37  ;;  %v3621_v56 = vpack.c.bf16 %v6339_v41, %v6338_v17  ;;  %v2238_v60 = vld [vmem:[%s6274_s4 + $0x80] sm:$0xff]  ;;  %v2237_v46 = vld [vmem:[%s6274_s4 + $0x78] sm:$0xff] }
 0x484   : > { %3602 = vmatpush1.bf16.msra.mxu0 %v3601_v40  ;;  %v5333_v28 = vpop.permute.xlu1 %1956  ;;  %v5336_v8 = vpop.permute.xlu0 %1966 }
 0x485   : > { %3604 = vmatprep.subr.bf16.mxu0 %v3603_v58  ;;  %v3619_v58 = vpack.c.bf16 %v6337_v43, %v6336_v33  ;;  %v6346_v43 = vld [vmem:[#allocation16_spill] sm:$0xff] }
 0x488   : > { %3606 = vmatpush1.bf16.msra.mxu0 %v3605_v2  ;;  %v1777_v57 = vpop.permute.xlu1 %1776  ;;  %v5352_v20 = vpop.permute.xlu0 %1954  ;;  %v3445_v2 = vld [vmem:[%s6271_s1 + $0x4] ss:$8 sm:$0x3] }
 0x489   : > { %v1785_v32 = vsel %vm361_vm3, %v6331_v23, %v1777_v57  ;;  %v1793_v27 = vsel %vm361_vm3, %v1777_v57, %v6331_v23  ;;  %3608 = vmatprep.subr.bf16.mxu0 %v3607_v22  ;;  %v6340_v22 = vld [vmem:[#allocation13_spill] sm:$0xff]  ;;  %v6341_v57 = vld [vmem:[#allocation15_spill] sm:$0xff] }
 0x48a   : > { %v1820_v45 = vmul.f32 %v1799_v39, %v1793_v27  ;;  %v1821_v50 = vmul.f32 %v5257_v30, %v1785_v32  ;;  %v2222_v39 = vld [vmem:[%s6274_s4] sm:$0xff]  ;;  %v2232_v32 = vld [vmem:[%s6274_s4 + $0x50] sm:$0xff]  ;;  %v5403_v27 = vrot.slane %v3445_v2, %v3998_v12 }
 0x48c   : > { %v3613_v37 = vpack.c.bf16 %v1820_v45, %v1818_v13  ;;  %3610 = vmatpush1.bf16.msra.mxu0 %v3609_v47  ;;  %v5356_v16 = vpop.permute.xlu1 %1972  ;;  %v3611_v24 = vpack.c.bf16 %v1821_v50, %v1819_v44  ;;  %v5358_v49 = vpop.permute.xlu0 %1970  ;;  %v1895_v47 = vsel %vm387_vm4, %v6341_v57, %v6340_v22  ;;  %v6343_v44 = vld [vmem:[#allocation14_spill] sm:$0xff]  ;;  %v6344_v50 = vld [vmem:[#allocation11_spill] sm:$0xff] }
 0x48d   : > { %v1894_v45 = vsel %vm387_vm4, %v6343_v44, %v6342_v38  ;;  %v1917_v59 = vmul.f32 %v5403_v27, %v1895_v47  ;;  %v1886_v1 = vsel %vm387_vm4, %v6342_v38, %v6343_v44 }
 0x48e   : > { %3612 = vmatprep.subr.bf16.mxu0 %v3611_v24  ;;  %v1887_v24 = vsel %vm387_vm4, %v6340_v22, %v6341_v57  ;;  %v1915_v14 = vmul.f32 %v5403_v27, %v1894_v45 }
 0x490   : > { %3614 = vmatpush1.bf16.msra.mxu0 %v3613_v37  ;;  %v5362_v40 = vpop.permute.xlu1 %1960  ;;  %v5367_v30 = vpop.permute.xlu0 %1958  ;;  %v3625_v37 = vpack.c.bf16 %v4709_v4, %v6344_v50  ;;  %v3631_v41 = vpack.c.bf16 %v1917_v59, %v1915_v14  ;;  %v1891_v50 = vsel %vm387_vm4, %v5103_v25, %v5129_v51 }
 0x491   : > { %3616 = vmatprep.subr.bf16.mxu0 %v3615_v53  ;;  %v1907_v53 = vrot.slane %v3445_v2, %v3996_v11 }
 0x493   : > { %2488 = vmatmul.mubr.f32.vlgmr.msra.gmra.mrb[8].mxu0 %v2222_v39  ;;  %v6345_v39 = vld [vmem:[#allocation17_spill] sm:$0xff]  ;;  %v1916_v33 = vmul.f32 %v1907_v53, %v1887_v24 }
 0x494   : > { %3618 = vmatpush1.bf16.msra.mxu0 %v3617_v21  ;;  %v5376_v31 = vpop.permute.xlu1 %2040  ;;  %2493 = vmatprep.mubr.f32.mxu0 %v2228_v55  ;;  %v5381_v9 = vpop.permute.xlu0 %1974  ;;  %v1897_v55 = vsel %vm387_vm4, %v5079_v6, %v6345_v39  ;;  %v2225_v21 = vld [vmem:[%s6274_s4 + $0x18] sm:$0xff]  ;;  %v1889_v2 = vsel %vm387_vm4, %v6345_v39, %v5079_v6  ;;  %v1924_v39 = vmul.f32 %v1907_v53, %v1891_v50 }
 0x495   : > { %3620 = vmatprep.subr.bf16.mxu0 %v3619_v58  ;;  %v6347_v58 = vld [vmem:[#allocation24_spill] sm:$0xff]  ;;  %v1921_v17 = vmul.f32 %v5403_v27, %v1897_v55  ;;  %v1920_v47 = vmul.f32 %v1907_v53, %v1889_v2 }
 0x497   : > { %2494 = vmatmul.mubr.f32.gmra.mrb[10].mxu0 %v2227_v54  ;;  %v1896_v54 = vsel %vm387_vm4, %v6347_v58, %v6346_v43 }
 0x498   : > { %3622 = vmatpush1.bf16.msra.mxu0 %v3621_v56  ;;  %v5397_v23 = vpop.permute.xlu1 %2056  ;;  %2499 = vmatprep.mubr.f32.mxu0 %v2233_v42  ;;  %v5405_v13 = vpop.permute.xlu0 %2038  ;;  %v3629_v42 = vpack.c.bf16 %v4753_v36, %v4746_v0  ;;  %v1914_v56 = vmul.f32 %v1907_v53, %v1886_v1  ;;  %v1888_v0 = vsel %vm387_vm4, %v6346_v43, %v6347_v58 }
 0x499   : > { %3624 = vmatprep.subr.bf16.mxu0 %v3623_v52  ;;  %v1898_v52 = vsel %vm387_vm4, %v5185_v48, %v5162_v18  ;;  %v1919_v36 = vmul.f32 %v5403_v27, %v1896_v54  ;;  %v1918_v45 = vmul.f32 %v1907_v53, %v1888_v0  ;;  %v1986_v1 = vsel %vm411_vm5, %v5296_v29, %v5273_v19 }
 0x49a   : > { %v3633_v57 = vpack.c.bf16 %v1916_v33, %v1914_v56  ;;  %v1923_v38 = vmul.f32 %v5403_v27, %v1898_v52  ;;  %v1987_v33 = vsel %vm411_vm5, %v5235_v34, %v5205_v63 }
 0x49b   : > { %2500 = vmatmul.mubr.f32.gmra.mrb[12].mxu0 %v2232_v32  ;;  %v1899_v32 = vsel %vm387_vm4, %v5129_v51, %v5103_v25  ;;  %v3635_v44 = vpack.c.bf16 %v1921_v17, %v1919_v36  ;;  %v1892_v25 = vsel %vm387_vm4, %v5215_v61, %v5245_v7  ;;  %v1900_v51 = vsel %vm387_vm4, %v5245_v7, %v5215_v61 }
 0x49c   : > { %3626 = vmatpush1.bf16.msra.mxu0 %v3625_v37  ;;  %v5428_v4 = vpop.permute.xlu1 %2044  ;;  %2505 = vmatprep.mubr.f32.mxu0 %v2238_v60  ;;  %v5438_v15 = vpop.permute.xlu0 %2054  ;;  %v1890_v60 = vsel %vm387_vm4, %v5162_v18, %v5185_v48  ;;  %v1925_v24 = vmul.f32 %v5403_v27, %v1899_v32  ;;  %v3637_v48 = vpack.c.bf16 %v1920_v47, %v1918_v45 }
 0x49d   : > { %3628 = vmatprep.subr.bf16.mxu0 %v3627_v5  ;;  %v1922_v59 = vmul.f32 %v1907_v53, %v1890_v60  ;;  %v3446_v5 = vld [vmem:[%s6271_s1 + $0x5] ss:$8 sm:$0x3]  ;;  %v1926_v58 = vmul.f32 %v1907_v53, %v1892_v25  ;;  %v1927_v54 = vmul.f32 %v5403_v27, %v1900_v51  ;;  %v1978_v17 = vsel %vm411_vm5, %v5273_v19, %v5296_v29 }
 0x49e   : > { %v3639_v55 = vpack.c.bf16 %v1925_v24, %v1923_v38  ;;  %v1999_v56 = vrot.slane %v3446_v5, %v3996_v11  ;;  %v1980_v47 = vsel %vm411_vm5, %v5318_v3, %v5336_v8  ;;  %v1990_v38 = vsel %vm411_vm5, %v5358_v49, %v5352_v20 }
 0x49f   : > { %2506 = vmatmul.mubr.f32.gmra.mrb[14].mxu0 %v2237_v46  ;;  %v5497_v46 = vrot.slane %v3446_v5, %v3998_v12  ;;  %v1982_v5 = vsel %vm411_vm5, %v5352_v20, %v5358_v49  ;;  %v1984_v20 = vsel %vm411_vm5, %v5367_v30, %v5381_v9  ;;  %v1992_v49 = vsel %vm411_vm5, %v5381_v9, %v5367_v30 }
 0x4a0   : > { %3630 = vmatpush1.bf16.msra.mxu0 %v3629_v42  ;;  %v5458_v22 = vpop.permute.xlu1 %2060  ;;  %2576 = vmatprep.mubr.f32.mxu0 %v2225_v21  ;;  %v5465_v6 = vpop.permute.xlu0 %2042  ;;  %v3641_v21 = vpack.c.bf16 %v1924_v39, %v1922_v59  ;;  %v2006_v36 = vmul.f32 %v1999_v56, %v1978_v17  ;;  %v2010_v24 = vmul.f32 %v1999_v56, %v1980_v47 }
 0x4a1   : > { %3632 = vmatprep.subr.bf16.mxu0 %v3631_v41  ;;  %v2007_v41 = vmul.f32 %v5497_v46, %v1986_v1  ;;  %v2009_v19 = vmul.f32 %v5497_v46, %v1987_v33  ;;  %v1983_v59 = vsel %vm411_vm5, %v5333_v28, %v5356_v16  ;;  %v2078_v33 = vsel %vm435_vm6, %v5438_v15, %v5405_v13 }
 0x4a2   : > { %v2016_v51 = vmul.f32 %v1999_v56, %v1983_v59 }
 0x4a3   : > { %v3647_v60 = vpack.c.bf16 %v2009_v19, %v2007_v41 }
 0x4a4   : > { %3634 = vmatpush1.bf16.msra.mxu0 %v3633_v57  ;;  %v5480_v37 = vpop.permute.xlu1 %2048  ;;  %v5486_v18 = vpop.permute.xlu0 %2058  ;;  %v1989_v57 = vsel %vm411_vm5, %v5311_v35, %v5289_v62 }
 0x4a5   : > { %3636 = vmatprep.subr.bf16.mxu0 %v3635_v44  ;;  %v2072_v47 = vsel %vm435_vm6, %v5465_v6, %v5486_v18 }
 0x4a8   : > { %3638 = vmatpush1.bf16.msra.mxu0 %v3637_v48  ;;  %v1885_v14 = vpop.permute.xlu1 %1884  ;;  %v5513_v43 = vpop.permute.xlu0 %2046 }
 0x4a9   : > { %v1893_v61 = vsel %vm387_vm4, %v5178_v26, %v1885_v14  ;;  %v1901_v7 = vsel %vm387_vm4, %v1885_v14, %v5178_v26  ;;  %3640 = vmatprep.subr.bf16.mxu0 %v3639_v55  ;;  %v1988_v26 = vsel %vm411_vm5, %v5336_v8, %v5318_v3  ;;  %v1981_v3 = vsel %vm411_vm5, %v5289_v62, %v5311_v35 }
 0x4aa   : > { %v1928_v42 = vmul.f32 %v1907_v53, %v1893_v61  ;;  %v1929_v2 = vmul.f32 %v5403_v27, %v1901_v7  ;;  %v1979_v27 = vsel %vm411_vm5, %v5205_v63, %v5235_v34  ;;  %v2011_v32 = vmul.f32 %v5497_v46, %v1988_v26 }
 0x4ab   : > { %v2008_v63 = vmul.f32 %v1999_v56, %v1979_v27  ;;  %v1991_v34 = vsel %vm411_vm5, %v5356_v16, %v5333_v28  ;;  %v2013_v8 = vmul.f32 %v5497_v46, %v1989_v57  ;;  %v2015_v62 = vmul.f32 %v5497_v46, %v1990_v38  ;;  %v3447_v28 = vld [vmem:[%s6271_s1 + $0x6] ss:$8 sm:$0x3] }
 0x4ac   : > { %v3645_v52 = vpack.c.bf16 %v1928_v42, %v1926_v58  ;;  %3642 = vmatpush1.bf16.msra.mxu0 %v3641_v21  ;;  %v5527_v0 = vpop.permute.xlu1 %2064  ;;  %v3643_v53 = vpack.c.bf16 %v1929_v2, %v1927_v54  ;;  %v5534_v29 = vpop.permute.xlu0 %2062  ;;  %v2017_v48 = vmul.f32 %v5497_v46, %v1991_v34  ;;  %v2012_v39 = vmul.f32 %v1999_v56, %v1981_v3 }
 0x4ad   : > { %v3649_v50 = vpack.c.bf16 %v2008_v63, %v2006_v36  ;;  %v3651_v35 = vpack.c.bf16 %v2013_v8, %v2011_v32  ;;  %v2014_v55 = vmul.f32 %v1999_v56, %v1982_v5  ;;  %v5586_v21 = vrot.slane %v3447_v28, %v3998_v12 }
 0x4ae   : > { %3644 = vmatprep.subr.bf16.mxu0 %v3643_v53  ;;  %v3653_v1 = vpack.c.bf16 %v2012_v39, %v2010_v24  ;;  %v3655_v14 = vpack.c.bf16 %v2017_v48, %v2015_v62  ;;  %v2018_v58 = vmul.f32 %v1999_v56, %v1984_v20  ;;  %v2019_v42 = vmul.f32 %v5497_v46, %v1992_v49 }
 0x4af   : > { %v3657_v7 = vpack.c.bf16 %v2016_v51, %v2014_v55  ;;  %v2079_v2 = vsel %vm435_vm6, %v5397_v23, %v5376_v31  ;;  %v2070_v26 = vsel %vm435_vm6, %v5405_v13, %v5438_v15  ;;  %v2080_v53 = vsel %vm435_vm6, %v5486_v18, %v5465_v6 }
 0x4b0   : > { %3646 = vmatpush1.bf16.msra.mxu0 %v3645_v52  ;;  %v5553_v44 = vpop.permute.xlu1 %2052  ;;  %v5560_v45 = vpop.permute.xlu0 %2050  ;;  %v2091_v52 = vrot.slane %v3447_v28, %v3996_v11  ;;  %v2101_v13 = vmul.f32 %v5586_v21, %v2079_v2  ;;  %v2081_v57 = vsel %vm435_vm6, %v5458_v22, %v5428_v4  ;;  %v2103_v32 = vmul.f32 %v5586_v21, %v2080_v53 }
 0x4b1   : > { %3648 = vmatprep.subr.bf16.mxu0 %v3647_v60  ;;  %v2073_v6 = vsel %vm435_vm6, %v5428_v4, %v5458_v22  ;;  %v2105_v18 = vmul.f32 %v5586_v21, %v2081_v57  ;;  %v2075_v38 = vsel %vm435_vm6, %v5480_v37, %v5527_v0  ;;  %v2074_v3 = vsel %vm435_vm6, %v5513_v43, %v5534_v29  ;;  %v3448_v4 = vld [vmem:[%s6271_s1 + $0x7] ss:$8 sm:$0x3] }
 0x4b2   : > { %v2098_v36 = vmul.f32 %v2091_v52, %v2070_v26  ;;  %v2102_v24 = vmul.f32 %v2091_v52, %v2072_v47  ;;  %v2104_v48 = vmul.f32 %v2091_v52, %v2073_v6 }
 0x4b3   : > { %v3667_v5 = vpack.c.bf16 %v2105_v18, %v2103_v32  ;;  %v2230_v32 = vld [vmem:[%s6274_s4 + $0x40] sm:$0xff] }
 0x4b4   : > { %3650 = vmatpush1.bf16.msra.mxu0 %v3649_v50  ;;  %v5572_v25 = vpop.permute.xlu1 %2132  ;;  %v2067_v16 = vpop.permute.xlu0 %2066  ;;  %v3669_v51 = vpack.c.bf16 %v2104_v48, %v2102_v24 }
 0x4b5   : > { %3652 = vmatprep.subr.bf16.mxu0 %v3651_v35  ;;  %v5663_v35 = vrot.slane %v3448_v4, %v3998_v12 }
 0x4b8   : > { %3654 = vmatpush1.bf16.msra.mxu0 %v3653_v1  ;;  %v1977_v61 = vpop.permute.xlu1 %1976  ;;  %v5598_v9 = vpop.permute.xlu0 %2130 }
 0x4b9   : > { %v1985_v54 = vsel %vm411_vm5, %v5362_v40, %v1977_v61  ;;  %v1993_v30 = vsel %vm411_vm5, %v1977_v61, %v5362_v40  ;;  %3656 = vmatprep.subr.bf16.mxu0 %v3655_v14  ;;  %v2099_v40 = vmul.f32 %v5586_v21, %v2078_v33 }
 0x4ba   : > { %v2020_v17 = vmul.f32 %v1999_v56, %v1985_v54  ;;  %v2021_v41 = vmul.f32 %v5497_v46, %v1993_v30  ;;  %v2071_v46 = vsel %vm435_vm6, %v5376_v31, %v5397_v23  ;;  %v2083_v31 = vsel %vm435_vm6, %v5527_v0, %v5480_v37 }
 0x4bb   : > { %v3663_v60 = vpack.c.bf16 %v2101_v13, %v2099_v40  ;;  %v2100_v63 = vmul.f32 %v2091_v52, %v2071_v46  ;;  %v2082_v23 = vsel %vm435_vm6, %v5534_v29, %v5513_v43  ;;  %v2109_v22 = vmul.f32 %v5586_v21, %v2083_v31 }
 0x4bc   : > { %v3661_v27 = vpack.c.bf16 %v2020_v17, %v2018_v58  ;;  %3658 = vmatpush1.bf16.msra.mxu0 %v3657_v7  ;;  %v2149_v19 = vpop.permute.xlu1 %2148  ;;  %v3659_v56 = vpack.c.bf16 %v2021_v41, %v2019_v42  ;;  %v2147_v15 = vpop.permute.xlu0 %2146  ;;  %v2107_v59 = vmul.f32 %v5586_v21, %v2082_v23  ;;  %v2108_v37 = vmul.f32 %v2091_v52, %v2075_v38 }
 0x4bd   : > { %v3665_v50 = vpack.c.bf16 %v2100_v63, %v2098_v36  ;;  %v2106_v0 = vmul.f32 %v2091_v52, %v2074_v3  ;;  %v2076_v43 = vsel %vm435_vm6, %v5560_v45, %v2067_v16  ;;  %v2084_v29 = vsel %vm435_vm6, %v2067_v16, %v5560_v45  ;;  %v2229_v3 = vld [vmem:[%s6274_s4 + $0x38] sm:$0xff] }
 0x4be   : > { %3660 = vmatprep.subr.bf16.mxu0 %v3659_v56  ;;  %v2171_v55 = vsel %vm459_vm7, %v2149_v19, %v5572_v25  ;;  %v2170_v28 = vsel %vm459_vm7, %v2147_v15, %v5598_v9  ;;  %v3671_v1 = vpack.c.bf16 %v2109_v22, %v2107_v59  ;;  %v2110_v49 = vmul.f32 %v2091_v52, %v2076_v43 }
 0x4bf   : > { %v3673_v20 = vpack.c.bf16 %v2108_v37, %v2106_v0  ;;  %v2111_v14 = vmul.f32 %v5586_v21, %v2084_v29  ;;  %v5673_v45 = vrot.slane %v3448_v4, %v3996_v11  ;;  %v2163_v33 = vsel %vm459_vm7, %v5572_v25, %v2149_v19  ;;  %v2235_v4 = vld [vmem:[%s6274_s4 + $0x68] sm:$0xff] }
 0x4c0   : > { %3662 = vmatpush1.bf16.msra.mxu0 %v3661_v27  ;;  %v2137_v34 = vpop.permute.xlu1 %2136  ;;  %v2135_v8 = vpop.permute.xlu0 %2134  ;;  %v2193_v61 = vmul.f32 %v5663_v35, %v2171_v55  ;;  %v2162_v30 = vsel %vm459_vm7, %v5598_v9, %v2147_v15  ;;  %v2191_v42 = vmul.f32 %v5663_v35, %v2170_v28  ;;  %v2224_v15 = vld [vmem:[%s6274_s4 + $0x10] sm:$0xff] }
 0x4c1   : > { %3664 = vmatprep.subr.bf16.mxu0 %v3663_v60  ;;  %v2192_v53 = vmul.f32 %v5673_v45, %v2163_v33  ;;  %v2190_v27 = vmul.f32 %v5673_v45, %v2162_v30  ;;  %v6348_v33 = vmov 0.0  }
 0x4c2   : > { %v3679_v19 = vpack.c.bf16 %v2193_v61, %v2191_v42  ;;  %v2236_v61 = vld [vmem:[%s6274_s4 + $0x70] sm:$0xff] }
 0x4c3   : > { %v3681_v36 = vpack.c.bf16 %v2192_v53, %v2190_v27 }
 0x4c4   : > { %3666 = vmatpush1.bf16.msra.mxu0 %v3665_v50  ;;  %v2153_v62 = vpop.permute.xlu1 %2152  ;;  %v2151_v39 = vpop.permute.xlu0 %2150 }
 0x4c5   : > { %3668 = vmatprep.subr.bf16.mxu0 %v3667_v5  ;;  %v2173_v17 = vsel %vm459_vm7, %v2153_v62, %v2137_v34  ;;  %v2172_v41 = vsel %vm459_vm7, %v2151_v39, %v2135_v8  ;;  %v2164_v56 = vsel %vm459_vm7, %v2135_v8, %v2151_v39 }
 0x4c6   : > { %v2195_v46 = vmul.f32 %v5663_v35, %v2172_v41  ;;  %v2194_v63 = vmul.f32 %v5673_v45, %v2164_v56 }
 0x4c8   : > { %3670 = vmatpush1.bf16.msra.mxu0 %v3669_v51  ;;  %v2069_v16 = vpop.permute.xlu1 %2068  ;;  %v2139_v54 = vpop.permute.xlu0 %2138  ;;  %v2240_v51 = vld [vmem:[%s6274_s4 + $0x90] sm:$0xff] }
 0x4c9   : > { %v2077_v7 = vsel %vm435_vm6, %v5553_v44, %v2069_v16  ;;  %v2085_v58 = vsel %vm435_vm6, %v2069_v16, %v5553_v44  ;;  %3672 = vmatprep.subr.bf16.mxu0 %v3671_v1 }
 0x4ca   : > { %v2112_v2 = vmul.f32 %v2091_v52, %v2077_v7  ;;  %v2113_v25 = vmul.f32 %v5586_v21, %v2085_v58  ;;  %v2165_v21 = vsel %vm459_vm7, %v2137_v34, %v2153_v62  ;;  %v2197_v52 = vmul.f32 %v5663_v35, %v2173_v17  ;;  %v2234_v62 = vld [vmem:[%s6274_s4 + $0x60] sm:$0xff]  ;;  %v2241_v7 = vld [vmem:[%s6274_s4 + $0x98] sm:$0xff] }
 0x4cb   : > { %v2196_v60 = vmul.f32 %v5673_v45, %v2165_v21 }
 0x4cc   : > { %v3677_v26 = vpack.c.bf16 %v2112_v2, %v2110_v49  ;;  %3674 = vmatpush1.bf16.msra.mxu0 %v3673_v20  ;;  %v2141_v44 = vpop.permute.xlu1 %2140  ;;  %v3675_v40 = vpack.c.bf16 %v2113_v25, %v2111_v14  ;;  %v2155_v9 = vpop.permute.xlu0 %2154  ;;  %v3683_v6 = vpack.c.bf16 %v2197_v52, %v2195_v46  ;;  %v2239_v14 = vld [vmem:[%s6274_s4 + $0x88] sm:$0xff] }
 0x4cd   : > { %v2174_v31 = vsel %vm459_vm7, %v2155_v9, %v2139_v54  ;;  %v2166_v18 = vsel %vm459_vm7, %v2139_v54, %v2155_v9  ;;  %v3685_v22 = vpack.c.bf16 %v2196_v60, %v2194_v63 }
 0x4ce   : > { %3676 = vmatprep.subr.bf16.mxu0 %v3675_v40  ;;  %v2199_v8 = vmul.f32 %v5663_v35, %v2174_v31  ;;  %v2198_v59 = vmul.f32 %v5673_v45, %v2166_v18 }
 0x4d0   : > { %3678 = vmatpush1.bf16.msra.mxu0 %v3677_v26  ;;  %v2157_v13 = vpop.permute.xlu1 %2156  ;;  %v2143_v47 = vpop.permute.xlu0 %2142 }
 0x4d1   : > { %v2175_v57 = vsel %vm459_vm7, %v2157_v13, %v2141_v44  ;;  %3680 = vmatprep.subr.bf16.mxu0 %v3679_v19  ;;  %v2167_v23 = vsel %vm459_vm7, %v2141_v44, %v2157_v13 }
 0x4d2   : > { %v2201_v34 = vmul.f32 %v5663_v35, %v2175_v57  ;;  %v2200_v50 = vmul.f32 %v5673_v45, %v2167_v23 }
 0x4d3   : > { %2577 = vmatmul.mubr.f32.vlgmr.msra.gmra.mrb[8].mxu0 %v2224_v15 }
 0x4d4   : > { %3682 = vmatpush1.bf16.msra.mxu0 %v3681_v36  ;;  %v2145_v38 = vpop.permute.xlu1 %2144  ;;  %2582 = vmatprep.mubr.f32.mxu0 %v2230_v32  ;;  %v2159_v24 = vpop.permute.xlu0 %2158  ;;  %v3687_v37 = vpack.c.bf16 %v2201_v34, %v2199_v8  ;;  %v3689_v43 = vpack.c.bf16 %v2200_v50, %v2198_v59  ;;  %v3123_v34 = vld [vmem:[%s6275_s5 + $0x8] sm:$0xff]  ;;  %v3197_v8 = vld [vmem:[%s6276_s6] sm:$0x1] }
 0x4d5   : > { %3684 = vmatprep.subr.bf16.mxu0 %v3683_v6  ;;  %v2168_v5 = vsel %vm459_vm7, %v2143_v47, %v2159_v24  ;;  %v2176_v48 = vsel %vm459_vm7, %v2159_v24, %v2143_v47  ;;  %3271 = vmatprep.mubr.f32.mxu1 %v3123_v34  ;;  %v2722_v59 = vld [vmem:[%s6271_s1] ss:$8 sm:$0x3] }
 0x4d6   : > { %v2202_v55 = vmul.f32 %v5673_v45, %v2168_v5  ;;  %v2203_v28 = vmul.f32 %v5663_v35, %v2176_v48 }
 0x4d7   : > { %2583 = vmatmul.mubr.f32.gmra.mrb[10].mxu0 %v2229_v3 }
 0x4d8   : > { %3686 = vmatpush1.bf16.msra.mxu0 %v3685_v22  ;;  %v2161_v0 = vpop.permute.xlu1 %2160  ;;  %2588 = vmatprep.mubr.f32.mxu0 %v2235_v4 }
 0x4d9   : > { %v2169_v29 = vsel %vm459_vm7, %v2145_v38, %v2161_v0  ;;  %v2177_v39 = vsel %vm459_vm7, %v2161_v0, %v2145_v38  ;;  %3688 = vmatprep.subr.bf16.mxu0 %v3687_v37  ;;  %v5927_v37 = vrot.slane %v2722_v59, %v3996_v11  ;;  %v5930_v0 = vrot.slane %v2722_v59, %v3998_v12 }
 0x4da   : > { %v2204_v1 = vmul.f32 %v5673_v45, %v2169_v29  ;;  %v2205_v20 = vmul.f32 %v5663_v35, %v2177_v39  ;;  %v2226_v45 = vld [vmem:[%s6274_s4 + $0x20] sm:$0xff]  ;;  %v2231_v35 = vld [vmem:[%s6274_s4 + $0x48] sm:$0xff] }
 0x4db   : > { %2589 = vmatmul.mubr.f32.gmra.mrb[12].mxu0 %v2234_v62 }
 0x4dc   : > { %v3693_v49 = vpack.c.bf16 %v2204_v1, %v2202_v55  ;;  %3690 = vmatpush1.bf16.msra.mxu0 %v3689_v43  ;;  %2594 = vmatprep.mubr.f32.mxu0 %v2240_v51  ;;  %v3691_v16 = vpack.c.bf16 %v2205_v20, %v2203_v28 }
 0x4de   : > { %3692 = vmatprep.subr.bf16.mxu0 %v3691_v16 }
 0x4df   : > { %2595 = vmatmul.mubr.f32.gmra.mrb[14].mxu0 %v2239_v14  ;;  %v5949_v14 = vld [vmem:[%s6271_s1 + $0x2] ss:$8 sm:$0x3] }
 0x4e0   : > { %3694 = vmatpush1.bf16.msra.mxu0 %v3693_v49  ;;  %2665 = vmatprep.mubr.f32.mxu0 %v6348_v33 }
 0x4e3   : > { %3449 = vmatmul.mubr.msk.f32.vlgmr.msra.gmra.mrb[8].mxu0 %vm2410_vm10, %v2226_v45 }
 0x4e4   : > { %2671 = vmatprep.mubr.f32.mxu0 %v6348_v33 }
 0x4e6   : > { %v2393_v58 = vpop.permute.xlu0 %2392 }
 0x4e7   : > { %3450 = vmatmul.mubr.msk.f32.gmra.mrb[10].mxu0 %vm2410_vm10, %v2231_v35 }
 0x4e8   : > { %2677 = vmatprep.mubr.f32.mxu0 %v6348_v33 }
 0x4e9   : > { %v2398_v25 = vpop.permute.xlu1 %2397 }
 0x4ea   : > { %v2408_v15 = vpop.permute.xlu0 %2407 }
 0x4eb   : > { %3451 = vmatmul.mubr.msk.f32.gmra.mrb[12].mxu0 %vm2410_vm10, %v2236_v61 }
 0x4ec   : > { %2683 = vmatprep.mubr.f32.mxu0 %v6348_v33 }
 0x4ed   : > { %v2403_v46 = vpop.permute.xlu1 %2402 }
 0x4ef   : > { %3452 = vmatmul.mubr.msk.f32.gmra.mrb[14].mxu0 %vm2410_vm10, %v2241_v7  ;;  %v5955_v7 = vrot.slane %v5949_v14, %v3996_v11 }
 0x5b6   : > { %v2667_v54 = vpop.f32.mrb[8].mxu0 }
 0x5b7   : > { %v3783_v30 = vadd.f32 %v2667_v54, %v2393_v58  ;;  %v2669_v42 = vpop.f32.mrb[9].mxu0  ;;  %v3455_v54 = vld [vmem:[%s6271_s1 + $0x3] ss:$8 sm:$0x3] }
 0x5b8   : > { %v3784_v19 = vadd.f32 %v2669_v42, %v2393_v58 }
 0x5b9   : > { %v5765_v2 = vmax.f32 %v3783_v30, 0.0 }
 0x5ba   : > { %v2673_v17 = vpop.f32.mrb[10].mxu0  ;;  %v5787_v21 = vmax.f32 %v3784_v19, 0.0 }
 0x5bb   : > { %v3785_v41 = vadd.f32 %v2673_v17, %v2398_v25  ;;  %v2675_v26 = vpop.f32.mrb[11].mxu0  ;;  %2698 = vrot.lane.b32.xlu1 %v5765_v2, %s3865_s9  ;;  %v3456_v17 = vld [vmem:[%s6271_s1 + $0x4] ss:$8 sm:$0x3] }
 0x5bc   : > { %v3786_v52 = vadd.f32 %v2675_v26, %v2398_v25  ;;  %v5977_v26 = vrot.slane %v3455_v54, %v3996_v11 }
 0x5bd   : > { %v5769_v44 = vmax.f32 %v3785_v41, 0.0 }
 0x5be   : > { %v2679_v40 = vpop.f32.mrb[12].mxu0  ;;  %v5793_v56 = vmax.f32 %v3786_v52, 0.0  ;;  %v5992_v52 = vrot.slane %v3456_v17, %v3996_v11 }
 0x5bf   : > { %v2681_v53 = vpop.f32.mrb[13].mxu0  ;;  %2700 = vrot.lane.b32.xlu0 %v5769_v44, %s3865_s9  ;;  %2750 = vrot.lane.b32.xlu1 %v5765_v2, %s3864_s8  ;;  %v3787_v13 = vadd.f32 %v2679_v40, %v2403_v46  ;;  %v5980_v40 = vrot.slane %v3455_v54, %v3998_v12 }
 0x5c0   : > { %v3788_v32 = vadd.f32 %v2681_v53, %v2403_v46 }
 0x5c1   : > { %v5811_v36 = vmax.f32 %v3787_v13, 0.0 }
 0x5c2   : > { %v2685_v27 = vpop.f32.mrb[14].mxu0  ;;  %v5835_v60 = vmax.f32 %v3788_v32, 0.0 }
 0x5c3   : > { %v2687_v9 = vpop.f32.mrb[15].mxu0  ;;  %2752 = vrot.lane.b32.xlu0 %v5769_v44, %s3864_s8  ;;  %2802 = vrot.lane.b32.xlu1 %v5765_v2, %s3866_s10  ;;  %v3789_v57 = vadd.f32 %v2685_v27, %v2408_v15 }
 0x5c4   : > { %v3790_v63 = vadd.f32 %v2687_v9, %v2408_v15  ;;  %v5995_v15 = vrot.slane %v3456_v17, %v3998_v12  ;;  %v3453_v17 = vld [vmem:[%s6271_s1 + $0x1] ss:$8 sm:$0x3] }
 0x5c5   : > { %v5817_v47 = vmax.f32 %v3789_v57, 0.0  ;;  %v2779_v19 = vrot.slane %v3453_v17, %v3996_v11 }
 0x5c6   : > { %v5841_v31 = vmax.f32 %v3790_v63, 0.0 }
 0x5c7   : > { %2804 = vrot.lane.b32.xlu0 %v5769_v44, %s3866_s10  ;;  %2854 = vrot.lane.b32.xlu1 %v5765_v2, %s3867_s11 }
 0x5cb   : > { %2856 = vrot.lane.b32.xlu0 %v5769_v44, %s3867_s11  ;;  %2914 = vrot.lane.b32.xlu1 %v5765_v2, %s3868_s12 }
 0x5cf   : > { %2916 = vrot.lane.b32.xlu0 %v5769_v44, %s3868_s12  ;;  %2706 = vrot.lane.b32.xlu1 %v5787_v21, %s3865_s9 }
 0x5d3   : > { %2708 = vrot.lane.b32.xlu0 %v5793_v56, %s3865_s9  ;;  %2758 = vrot.lane.b32.xlu1 %v5787_v21, %s3864_s8 }
 0x5d7   : > { %2760 = vrot.lane.b32.xlu0 %v5793_v56, %s3864_s8  ;;  %2810 = vrot.lane.b32.xlu1 %v5787_v21, %s3866_s10 }
 0x5db   : > { %2812 = vrot.lane.b32.xlu0 %v5793_v56, %s3866_s10  ;;  %2862 = vrot.lane.b32.xlu1 %v5787_v21, %s3867_s11 }
 0x5df   : > { %2864 = vrot.lane.b32.xlu0 %v5793_v56, %s3867_s11  ;;  %2922 = vrot.lane.b32.xlu1 %v5787_v21, %s3868_s12 }
 0x5e3   : > { %2924 = vrot.lane.b32.xlu0 %v5793_v56, %s3868_s12  ;;  %2702 = vrot.lane.b32.xlu1 %v5811_v36, %s3865_s9 }
 0x5e7   : > { %2754 = vrot.lane.b32.xlu1 %v5811_v36, %s3864_s8  ;;  %2704 = vrot.lane.b32.xlu0 %v5817_v47, %s3865_s9 }
 0x5eb   : > { %2806 = vrot.lane.b32.xlu1 %v5811_v36, %s3866_s10  ;;  %2756 = vrot.lane.b32.xlu0 %v5817_v47, %s3864_s8 }
 0x5ef   : > { %2858 = vrot.lane.b32.xlu1 %v5811_v36, %s3867_s11  ;;  %2808 = vrot.lane.b32.xlu0 %v5817_v47, %s3866_s10 }
 0x5f3   : > { %2918 = vrot.lane.b32.xlu1 %v5811_v36, %s3868_s12  ;;  %2860 = vrot.lane.b32.xlu0 %v5817_v47, %s3867_s11 }
 0x5f7   : > { %2710 = vrot.lane.b32.xlu1 %v5835_v60, %s3865_s9  ;;  %2920 = vrot.lane.b32.xlu0 %v5817_v47, %s3868_s12 }
 0x5fb   : > { %2966 = vrot.lane.b32.xlu1 %v5765_v2, %s3869_s13  ;;  %2712 = vrot.lane.b32.xlu0 %v5841_v31, %s3865_s9 }
 0x5ff   : > { %2762 = vrot.lane.b32.xlu1 %v5835_v60, %s3864_s8  ;;  %2968 = vrot.lane.b32.xlu0 %v5769_v44, %s3869_s13 }
 0x603   : > { %2814 = vrot.lane.b32.xlu1 %v5835_v60, %s3866_s10  ;;  %2764 = vrot.lane.b32.xlu0 %v5841_v31, %s3864_s8 }
 0x607   : > { %2866 = vrot.lane.b32.xlu1 %v5835_v60, %s3867_s11  ;;  %2976 = vrot.lane.b32.xlu0 %v5793_v56, %s3869_s13 }
 0x60b   : > { %2926 = vrot.lane.b32.xlu1 %v5835_v60, %s3868_s12  ;;  %2816 = vrot.lane.b32.xlu0 %v5841_v31, %s3866_s10 }
 0x60f   : > { %2974 = vrot.lane.b32.xlu1 %v5787_v21, %s3869_s13  ;;  %2972 = vrot.lane.b32.xlu0 %v5817_v47, %s3869_s13 }
 0x613   : > { %2970 = vrot.lane.b32.xlu1 %v5811_v36, %s3869_s13  ;;  %2868 = vrot.lane.b32.xlu0 %v5841_v31, %s3867_s11 }
 0x617   : > { %2978 = vrot.lane.b32.xlu1 %v5835_v60, %s3869_s13  ;;  %3020 = vrot.lane.b32.xlu0 %v5769_v44, %s3871_s14 }
 0x61b   : > { %3018 = vrot.lane.b32.xlu1 %v5765_v2, %s3871_s14  ;;  %3028 = vrot.lane.b32.xlu0 %v5793_v56, %s3871_s14 }
 0x61f   : > { %3026 = vrot.lane.b32.xlu1 %v5787_v21, %s3871_s14  ;;  %3024 = vrot.lane.b32.xlu0 %v5817_v47, %s3871_s14 }
 0x623   : > { %3022 = vrot.lane.b32.xlu1 %v5811_v36, %s3871_s14  ;;  %2928 = vrot.lane.b32.xlu0 %v5841_v31, %s3868_s12  ;;  %s3876_s12 = smov 125  }
 0x627   : > { %3030 = vrot.lane.b32.xlu1 %v5835_v60, %s3871_s14  ;;  %3072 = vrot.lane.b32.xlu0 %v5769_v44, %s3872_s15 }
 0x62b   : > { %3070 = vrot.lane.b32.xlu1 %v5765_v2, %s3872_s15  ;;  %2980 = vrot.lane.b32.xlu0 %v5841_v31, %s3869_s13 }
 0x62d   : > { %v2699_v23 = vpop.permute.xlu1 %2698 }
 0x62f   : > { %3078 = vrot.lane.b32.xlu1 %v5787_v21, %s3872_s15  ;;  %3080 = vrot.lane.b32.xlu0 %v5793_v56, %s3872_s15 }
 0x631   : > { %v5902_v6 = vpop.permute.xlu1 %2750  ;;  %v2701_v18 = vpop.permute.xlu0 %2700 }
 0x633   : > { %3074 = vrot.lane.b32.xlu1 %v5811_v36, %s3872_s15  ;;  %3032 = vrot.lane.b32.xlu0 %v5841_v31, %s3871_s14 }
 0x635   : > { %v5908_v38 = vpop.permute.xlu1 %2802  ;;  %v5910_v3 = vpop.permute.xlu0 %2752 }
 0x637   : > { %3082 = vrot.lane.b32.xlu1 %v5835_v60, %s3872_s15  ;;  %3076 = vrot.lane.b32.xlu0 %v5817_v47, %s3872_s15 }
 0x639   : > { %v2855_v50 = vpop.permute.xlu1 %2854  ;;  %v5919_v24 = vpop.permute.xlu0 %2804 }
 0x63b   : > { %3084 = vrot.lane.b32.xlu0 %v5841_v31, %s3872_s15  ;;  %3199 = vrot.lane.b32.xlu1 %v3197_v8, %s3876_s12 }
 0x63d   : > { %v2915_v4 = vpop.permute.xlu1 %2914  ;;  %v2857_v22 = vpop.permute.xlu0 %2856 }
 0x641   : > { %v2707_v5 = vpop.permute.xlu1 %2706  ;;  %v2917_v48 = vpop.permute.xlu0 %2916 }
 0x642   : > { %v2714_v62 = vsel %vm290_vm1, %v2699_v23, %v2707_v5  ;;  %v2718_v43 = vsel %vm290_vm1, %v2707_v5, %v2699_v23 }
 0x643   : > { %v2734_v28 = vmul.f32 %v5927_v37, %v2718_v43  ;;  %v2735_v1 = vmul.f32 %v5930_v0, %v2714_v62 }
 0x645   : > { %v5936_v29 = vpop.permute.xlu1 %2758  ;;  %v2709_v39 = vpop.permute.xlu0 %2708 }
 0x646   : > { %v2715_v51 = vsel %vm290_vm1, %v2701_v18, %v2709_v39  ;;  %v2719_v55 = vsel %vm290_vm1, %v2709_v39, %v2701_v18 }
 0x647   : > { %v2736_v20 = vmul.f32 %v5927_v37, %v2719_v55  ;;  %v2737_v49 = vmul.f32 %v5930_v0, %v2715_v51 }
 0x649   : > { %v3697_v16 = vpack.c.bf16 %v2736_v20, %v2734_v28  ;;  %v5951_v45 = vpop.permute.xlu1 %2810  ;;  %v2761_v35 = vpop.permute.xlu0 %2760  ;;  %v3695_v61 = vpack.c.bf16 %v2737_v49, %v2735_v1 }
 0x64a   : > { %v2822_v58 = vsel %vm337_vm2, %v5951_v45, %v5908_v38 }
 0x64b   : > { %3696 = vmatprep.subr.bf16.mxu1 %v3695_v61  ;;  %v5974_v41 = vmul.f32 %v5955_v7, %v2822_v58 }
 0x64c   : > { %3698 = vmatpush1.bf16.msra.mxu1 %v3697_v16 }
 0x64d   : > { %v2863_v30 = vpop.permute.xlu1 %2862  ;;  %v5964_v42 = vpop.permute.xlu0 %2812 }
 0x64e   : > { %v2823_v25 = vsel %vm337_vm2, %v5964_v42, %v5919_v24  ;;  %v2870_v27 = vsel %vm361_vm3, %v2855_v50, %v2863_v30  ;;  %v2874_v9 = vsel %vm361_vm3, %v2863_v30, %v2855_v50 }
 0x64f   : > { %v5983_v53 = vmul.f32 %v5955_v7, %v2823_v25  ;;  %v6004_v23 = vmul.f32 %v5977_v26, %v2874_v9  ;;  %v6007_v34 = vmul.f32 %v5980_v40, %v2870_v27 }
 0x651   : > { %v2923_v46 = vpop.permute.xlu1 %2922  ;;  %v2865_v13 = vpop.permute.xlu0 %2864 }
 0x652   : > { %v2930_v57 = vsel %vm387_vm4, %v2915_v4, %v2923_v46  ;;  %v2871_v32 = vsel %vm361_vm3, %v2857_v22, %v2865_v13  ;;  %v2875_v63 = vsel %vm361_vm3, %v2865_v13, %v2857_v22  ;;  %v2934_v50 = vsel %vm387_vm4, %v2923_v46, %v2915_v4 }
 0x653   : > { %v6010_v18 = vmul.f32 %v5977_v26, %v2875_v63  ;;  %v6013_v8 = vmul.f32 %v5980_v40, %v2871_v32  ;;  %v6026_v51 = vmul.f32 %v5992_v52, %v2930_v57  ;;  %v6029_v55 = vmul.f32 %v5995_v15, %v2934_v50 }
 0x654   : > { %v2767_v46 = vsel %vm313_vm0, %v5910_v3, %v2761_v35  ;;  %v2783_v13 = vrot.slane %v3453_v17, %v3998_v12  ;;  %v2766_v63 = vsel %vm313_vm0, %v5902_v6, %v5936_v29 }
 0x655   : > { %v2703_v5 = vpop.permute.xlu1 %2702  ;;  %v2925_v22 = vpop.permute.xlu0 %2924  ;;  %6349 = vst [vmem:[#allocation21_spill] sm:$0xff] %v6026_v51 }
 0x656   : > { %v2931_v43 = vsel %vm387_vm4, %v2917_v48, %v2925_v22  ;;  %v2935_v39 = vsel %vm387_vm4, %v2925_v22, %v2917_v48 }
 0x657   : > { %v6032_v4 = vmul.f32 %v5992_v52, %v2931_v43  ;;  %v6035_v28 = vmul.f32 %v5995_v15, %v2935_v39  ;;  %v2771_v43 = vsel %vm313_vm0, %v2761_v35, %v5910_v3  ;;  %v2789_v39 = vmul.f32 %v2783_v13, %v2767_v46 }
 0x658   : > { %v2770_v3 = vsel %vm313_vm0, %v5936_v29, %v5902_v6  ;;  %v2787_v35 = vmul.f32 %v2783_v13, %v2766_v63 }
 0x659   : > { %v2755_v20 = vpop.permute.xlu1 %2754  ;;  %v2705_v49 = vpop.permute.xlu0 %2704 }
 0x65d   : > { %v2807_v16 = vpop.permute.xlu1 %2806  ;;  %v2757_v61 = vpop.permute.xlu0 %2756 }
 0x661   : > { %v6041_v58 = vpop.permute.xlu1 %2858  ;;  %v6043_v54 = vpop.permute.xlu0 %2808 }
 0x665   : > { %v6045_v30 = vpop.permute.xlu1 %2918  ;;  %v6047_v25 = vpop.permute.xlu0 %2860 }
 0x669   : > { %v2711_v27 = vpop.permute.xlu1 %2710  ;;  %v6052_v9 = vpop.permute.xlu0 %2920 }
 0x66a   : > { %v2716_v57 = vsel %vm290_vm1, %v2703_v5, %v2711_v27  ;;  %v2720_v32 = vsel %vm290_vm1, %v2711_v27, %v2703_v5 }
 0x66b   : > { %v2738_v5 = vmul.f32 %v5927_v37, %v2720_v32  ;;  %v2739_v27 = vmul.f32 %v5930_v0, %v2716_v57  ;;  %v2788_v32 = vmul.f32 %v2779_v19, %v2771_v43 }
 0x66d   : > { %v6066_v50 = vpop.permute.xlu1 %2966  ;;  %v2713_v22 = vpop.permute.xlu0 %2712 }
 0x66e   : > { %v2717_v1 = vsel %vm290_vm1, %v2705_v49, %v2713_v22  ;;  %v2721_v48 = vsel %vm290_vm1, %v2713_v22, %v2705_v49 }
 0x66f   : > { %v2740_v59 = vmul.f32 %v5927_v37, %v2721_v48  ;;  %v2741_v62 = vmul.f32 %v5930_v0, %v2717_v1  ;;  %v2819_v37 = vsel %vm337_vm2, %v5919_v24, %v5964_v42  ;;  %v3703_v0 = vpack.c.bf16 %v2789_v39, %v2787_v35 }
 0x670   : > { %v2786_v1 = vmul.f32 %v2779_v19, %v2770_v3  ;;  %v2835_v48 = vrot.slane %v5949_v14, %v3998_v12 }
 0x671   : > { %v3701_v46 = vpack.c.bf16 %v2740_v59, %v2738_v5  ;;  %v2763_v33 = vpop.permute.xlu1 %2762  ;;  %v6084_v51 = vpop.permute.xlu0 %2968  ;;  %v3699_v49 = vpack.c.bf16 %v2741_v62, %v2739_v27  ;;  %v2818_v59 = vsel %vm337_vm2, %v5908_v38, %v5951_v45 }
 0x672   : > { %v2768_v6 = vsel %vm313_vm0, %v2755_v20, %v2763_v33  ;;  %v2772_v29 = vsel %vm313_vm0, %v2763_v33, %v2755_v20  ;;  %v3705_v42 = vpack.c.bf16 %v2788_v32, %v2786_v1  ;;  %v2841_v17 = vmul.f32 %v2835_v48, %v2819_v37 }
 0x673   : > { %3700 = vmatprep.subr.bf16.mxu1 %v3699_v49  ;;  %v2790_v63 = vmul.f32 %v2779_v19, %v2772_v29  ;;  %v2791_v22 = vmul.f32 %v2783_v13, %v2768_v6  ;;  %v2839_v43 = vmul.f32 %v2835_v48, %v2818_v59 }
 0x674   : > { %3702 = vmatpush1.bf16.msra.mxu1 %v3701_v46 }
 0x675   : > { %v2815_v62 = vpop.permute.xlu1 %2814  ;;  %3704 = vmatprep.subr.bf16.mxu1 %v3703_v0  ;;  %v2765_v24 = vpop.permute.xlu0 %2764  ;;  %v3711_v27 = vpack.c.bf16 %v2841_v17, %v2839_v43  ;;  %v3457_v43 = vld [vmem:[%s6271_s1 + $0x5] ss:$8 sm:$0x3] }
 0x676   : > { %v2769_v14 = vsel %vm313_vm0, %v2757_v61, %v2765_v24  ;;  %v2773_v57 = vsel %vm313_vm0, %v2765_v24, %v2757_v61  ;;  %v2820_v3 = vsel %vm337_vm2, %v2807_v16, %v2815_v62  ;;  %v2824_v35 = vsel %vm337_vm2, %v2815_v62, %v2807_v16 }
 0x677   : > { %v2792_v33 = vmul.f32 %v2779_v19, %v2773_v57  ;;  %v2793_v20 = vmul.f32 %v2783_v13, %v2769_v14  ;;  %v2842_v49 = vmul.f32 %v5955_v7, %v2824_v35  ;;  %v2843_v32 = vmul.f32 %v2835_v48, %v2820_v3 }
 0x678   : > { %3706 = vmatpush1.bf16.msra.mxu1 %v3705_v42  ;;  %v6350_v16 = vpack.c.bf16 %v5983_v53, %v5974_v41  ;;  %v6351_v41 = vpack.c.bf16 %v6013_v8, %v6007_v34  ;;  %v6352_v34 = vpack.c.bf16 %v6010_v18, %v6004_v23 }
 0x679   : > { %v3709_v39 = vpack.c.bf16 %v2792_v33, %v2790_v63  ;;  %v2867_v5 = vpop.permute.xlu1 %2866  ;;  %v6104_v38 = vpop.permute.xlu0 %2976  ;;  %v3707_v45 = vpack.c.bf16 %v2793_v20, %v2791_v22 }
 0x67a   : > { %v2876_v62 = vsel %vm361_vm3, %v2867_v5, %v6041_v58 }
 0x67b   : > { %3708 = vmatprep.subr.bf16.mxu1 %v3707_v45  ;;  %v2894_v42 = vmul.f32 %v5977_v26, %v2876_v62 }
 0x67c   : > { %3710 = vmatpush1.bf16.msra.mxu1 %v3709_v39  ;;  %v6353_v39 = vpack.c.bf16 %v6035_v28, %v6029_v55 }
 0x67d   : > { %v2927_v61 = vpop.permute.xlu1 %2926  ;;  %3712 = vmatprep.subr.bf16.mxu1 %v3711_v27  ;;  %v2817_v19 = vpop.permute.xlu0 %2816 }
 0x67e   : > { %v2821_v13 = vsel %vm337_vm2, %v6043_v54, %v2817_v19  ;;  %v2825_v46 = vsel %vm337_vm2, %v2817_v19, %v6043_v54  ;;  %v2872_v54 = vsel %vm361_vm3, %v6041_v58, %v2867_v5  ;;  %v6354_v19 = vld [vmem:[#allocation21_spill] sm:$0xff] }
 0x67f   : > { %v2844_v37 = vmul.f32 %v5955_v7, %v2825_v46  ;;  %v2845_v0 = vmul.f32 %v2835_v48, %v2821_v13  ;;  %v2895_v17 = vmul.f32 %v5980_v40, %v2872_v54  ;;  %v6355_v13 = vpack.c.bf16 %v6032_v4, %v6354_v19 }
 0x680   : > { %3714 = vmatpush1.bf16.msra.mxu1 %v6350_v16 }
 0x681   : > { %v3717_v1 = vpack.c.bf16 %v2844_v37, %v2842_v49  ;;  %v2975_v6 = vpop.permute.xlu1 %2974  ;;  %v6121_v29 = vpop.permute.xlu0 %2972  ;;  %v3715_v59 = vpack.c.bf16 %v2845_v0, %v2843_v32 }
 0x682   : > { %v2982_v45 = vsel %vm411_vm5, %v6066_v50, %v2975_v6 }
 0x683   : > { %3716 = vmatprep.subr.bf16.mxu1 %v3715_v59 }
 0x684   : > { %3718 = vmatpush1.bf16.msra.mxu1 %v3717_v1 }
 0x685   : > { %v2971_v7 = vpop.permute.xlu1 %2970  ;;  %3720 = vmatprep.subr.bf16.mxu1 %v6351_v41  ;;  %v2869_v53 = vpop.permute.xlu0 %2868 }
 0x686   : > { %v2873_v48 = vsel %vm361_vm3, %v6047_v25, %v2869_v53  ;;  %v2877_v24 = vsel %vm361_vm3, %v2869_v53, %v6047_v25  ;;  %v3727_v25 = vpack.c.bf16 %v5793_v56, %v5787_v21  ;;  %v3733_v21 = vpack.c.bf16 %v5817_v47, %v5811_v36 }
 0x687   : > { %v2896_v58 = vmul.f32 %v5977_v26, %v2877_v24  ;;  %v2897_v14 = vmul.f32 %v5980_v40, %v2873_v48  ;;  %v3729_v26 = vpack.c.bf16 %v5769_v44, %v5765_v2  ;;  %v3731_v40 = vpack.c.bf16 %v5841_v31, %v5835_v60 }
 0x688   : > { %3722 = vmatpush1.bf16.msra.mxu1 %v6352_v34  ;;  %v2932_v56 = vsel %vm387_vm4, %v6045_v30, %v2927_v61  ;;  %v2936_v2 = vsel %vm387_vm4, %v2927_v61, %v6045_v30  ;;  %v2986_v44 = vsel %vm411_vm5, %v2975_v6, %v6066_v50  ;;  %v2995_v60 = vrot.slane %v3457_v43, %v3996_v11 }
 0x689   : > { %v3725_v8 = vpack.c.bf16 %v2896_v58, %v2894_v42  ;;  %v2979_v57 = vpop.permute.xlu1 %2978  ;;  %v6145_v63 = vpop.permute.xlu0 %3020  ;;  %v3723_v22 = vpack.c.bf16 %v2897_v14, %v2895_v17  ;;  %v2999_v31 = vrot.slane %v3457_v43, %v3998_v12  ;;  %v2987_v36 = vsel %vm411_vm5, %v6104_v38, %v6084_v51 }
 0x68a   : > { %v2954_v5 = vmul.f32 %v5992_v52, %v2932_v56  ;;  %v2955_v35 = vmul.f32 %v5995_v15, %v2936_v2  ;;  %v2983_v50 = vsel %vm411_vm5, %v6084_v51, %v6104_v38  ;;  %v3002_v49 = vmul.f32 %v2995_v60, %v2982_v45 }
 0x68b   : > { %3724 = vmatprep.subr.bf16.mxu1 %v3723_v22  ;;  %v3003_v61 = vmul.f32 %v2999_v31, %v2986_v44  ;;  %v3005_v46 = vmul.f32 %v2999_v31, %v2987_v36  ;;  %v3004_v16 = vmul.f32 %v2995_v60, %v2983_v50  ;;  %v2988_v4 = vsel %vm411_vm5, %v2979_v57, %v2971_v7 }
 0x68c   : > { %3726 = vmatpush1.bf16.msra.mxu1 %v3725_v8  ;;  %v3007_v42 = vmul.f32 %v2999_v31, %v2988_v4  ;;  %v3459_v8 = vld [vmem:[%s6271_s1 + $0x7] ss:$8 sm:$0x3] }
 0x68d   : > { %v3019_v33 = vpop.permute.xlu1 %3018  ;;  %3728 = vmatprep.subr.bf16.mxu1 %v3727_v25  ;;  %v3029_v20 = vpop.permute.xlu0 %3028  ;;  %v3743_v51 = vpack.c.bf16 %v3005_v46, %v3003_v61  ;;  %v3745_v1 = vpack.c.bf16 %v3004_v16, %v3002_v49 }
 0x68e   : > { %v3039_v53 = vsel %vm435_vm6, %v3029_v20, %v6145_v63  ;;  %v3035_v34 = vsel %vm435_vm6, %v6145_v63, %v3029_v20  ;;  %v3103_v63 = vrot.slane %v3459_v8, %v3998_v12 }
 0x690   : > { %3730 = vmatpush1.bf16.msra.mxu1 %v3729_v26 }
 0x691   : > { %v3027_v23 = vpop.permute.xlu1 %3026  ;;  %3732 = vmatprep.subr.bf16.mxu1 %v3731_v40  ;;  %v6153_v18 = vpop.permute.xlu0 %3024 }
 0x692   : > { %v3038_v38 = vsel %vm435_vm6, %v3027_v23, %v3019_v33 }
 0x694   : > { %3734 = vmatpush1.bf16.msra.mxu1 %v3733_v21 }
 0x695   : > { %v3023_v47 = vpop.permute.xlu1 %3022  ;;  %3736 = vmatprep.subr.bf16.mxu1 %v6353_v39  ;;  %v2929_v30 = vpop.permute.xlu0 %2928 }
 0x696   : > { %v2933_v27 = vsel %vm387_vm4, %v6052_v9, %v2929_v30  ;;  %v2937_v3 = vsel %vm387_vm4, %v2929_v30, %v6052_v9 }
 0x697   : > { %v2956_v55 = vmul.f32 %v5992_v52, %v2933_v27  ;;  %v2957_v28 = vmul.f32 %v5995_v15, %v2937_v3  ;;  %v2984_v52 = vsel %vm411_vm5, %v2971_v7, %v2979_v57  ;;  %v3458_v15 = vld [vmem:[%s6271_s1 + $0x6] ss:$8 sm:$0x3]  ;;  %v3034_v7 = vsel %vm435_vm6, %v3019_v33, %v3027_v23 }
 0x698   : > { %3738 = vmatpush1.bf16.msra.mxu1 %v6355_v13  ;;  %v3006_v6 = vmul.f32 %v2995_v60, %v2984_v52  ;;  %v3047_v59 = vrot.slane %v3458_v15, %v3996_v11  ;;  %v3051_v54 = vrot.slane %v3458_v15, %v3998_v12 }
 0x699   : > { %v3741_v32 = vpack.c.bf16 %v2956_v55, %v2954_v5  ;;  %v3031_v9 = vpop.permute.xlu1 %3030  ;;  %v3073_v37 = vpop.permute.xlu0 %3072  ;;  %v3739_v0 = vpack.c.bf16 %v2957_v28, %v2955_v35 }
 0x69a   : > { %v3055_v17 = vmul.f32 %v3051_v54, %v3038_v38  ;;  %v3057_v57 = vmul.f32 %v3051_v54, %v3039_v53  ;;  %v3054_v22 = vmul.f32 %v3047_v59, %v3034_v7  ;;  %v3040_v23 = vsel %vm435_vm6, %v3031_v9, %v3023_v47 }
 0x69b   : > { %3740 = vmatprep.subr.bf16.mxu1 %v3739_v0  ;;  %v3056_v43 = vmul.f32 %v3047_v59, %v3035_v34  ;;  %v6356_v38 = vmov 0.0  }
 0x69c   : > { %3742 = vmatpush1.bf16.msra.mxu1 %v3741_v32  ;;  %v3751_v20 = vpack.c.bf16 %v3057_v57, %v3055_v17 }
 0x69d   : > { %v3071_v62 = vpop.permute.xlu1 %3070  ;;  %3744 = vmatprep.subr.bf16.mxu1 %v3743_v51  ;;  %v2981_v41 = vpop.permute.xlu0 %2980  ;;  %v3753_v2 = vpack.c.bf16 %v3056_v43, %v3054_v22 }
 0x69e   : > { %v2985_v48 = vsel %vm411_vm5, %v6121_v29, %v2981_v41  ;;  %v2989_v24 = vsel %vm411_vm5, %v2981_v41, %v6121_v29  ;;  %v3036_v29 = vsel %vm435_vm6, %v3023_v47, %v3031_v9 }
 0x69f   : > { %v3008_v58 = vmul.f32 %v2995_v60, %v2985_v48  ;;  %v3009_v14 = vmul.f32 %v2999_v31, %v2989_v24  ;;  %v3058_v44 = vmul.f32 %v3047_v59, %v3036_v29  ;;  %v3059_v60 = vmul.f32 %v3051_v54, %v3040_v23 }
 0x6a0   : > { %3746 = vmatpush1.bf16.msra.mxu1 %v3745_v1  ;;  %v3099_v31 = vrot.slane %v3459_v8, %v3996_v11 }
 0x6a1   : > { %v3749_v25 = vpack.c.bf16 %v3008_v58, %v3006_v6  ;;  %v3079_v33 = vpop.permute.xlu1 %3078  ;;  %v3081_v26 = vpop.permute.xlu0 %3080  ;;  %v3747_v40 = vpack.c.bf16 %v3009_v14, %v3007_v42 }
 0x6a2   : > { %v3090_v21 = vsel %vm459_vm7, %v3079_v33, %v3071_v62  ;;  %v3091_v56 = vsel %vm459_vm7, %v3081_v26, %v3073_v37  ;;  %v3086_v12 = vsel %vm459_vm7, %v3071_v62, %v3079_v33  ;;  %v3087_v39 = vsel %vm459_vm7, %v3073_v37, %v3081_v26 }
 0x6a3   : > { %3748 = vmatprep.subr.bf16.mxu1 %v3747_v40  ;;  %v3107_v45 = vmul.f32 %v3103_v63, %v3090_v21  ;;  %v3109_v27 = vmul.f32 %v3103_v63, %v3091_v56  ;;  %v3106_v50 = vmul.f32 %v3099_v31, %v3086_v12  ;;  %v3108_v19 = vmul.f32 %v3099_v31, %v3087_v39 }
 0x6a4   : > { %3750 = vmatpush1.bf16.msra.mxu1 %v3749_v25 }
 0x6a5   : > { %v3075_v36 = vpop.permute.xlu1 %3074  ;;  %3752 = vmatprep.subr.bf16.mxu1 %v3751_v20  ;;  %v3033_v47 = vpop.permute.xlu0 %3032  ;;  %v3759_v13 = vpack.c.bf16 %v3109_v27, %v3107_v45  ;;  %v3761_v37 = vpack.c.bf16 %v3108_v19, %v3106_v50 }
 0x6a6   : > { %v3037_v30 = vsel %vm435_vm6, %v6153_v18, %v3033_v47  ;;  %v3041_v5 = vsel %vm435_vm6, %v3033_v47, %v6153_v18  ;;  %v3122_v18 = vld [vmem:[%s6275_s5] sm:$0xff] }
 0x6a7   : > { %v3060_v11 = vmul.f32 %v3047_v59, %v3037_v30  ;;  %v3061_v3 = vmul.f32 %v3051_v54, %v3041_v5  ;;  %v3124_v59 = vld [vmem:[%s6275_s5 + $0x10] sm:$0xff] }
 0x6a8   : > { %3754 = vmatpush1.bf16.msra.mxu1 %v3753_v2 }
 0x6a9   : > { %v3757_v35 = vpack.c.bf16 %v3060_v11, %v3058_v44  ;;  %v3083_v61 = vpop.permute.xlu1 %3082  ;;  %v3077_v55 = vpop.permute.xlu0 %3076  ;;  %v3755_v28 = vpack.c.bf16 %v3061_v3, %v3059_v60 }
 0x6aa   : > { %v3088_v46 = vsel %vm459_vm7, %v3075_v36, %v3083_v61  ;;  %v3092_v49 = vsel %vm459_vm7, %v3083_v61, %v3075_v36 }
 0x6ab   : > { %3756 = vmatprep.subr.bf16.mxu1 %v3755_v28  ;;  %v3110_v15 = vmul.f32 %v3099_v31, %v3088_v46  ;;  %v3111_v16 = vmul.f32 %v3103_v63, %v3092_v49 }
 0x6ac   : > { %3758 = vmatpush1.bf16.msra.mxu1 %v3757_v35 }
 0x6ad   : > { %3760 = vmatprep.subr.bf16.mxu1 %v3759_v13  ;;  %v3085_v32 = vpop.permute.xlu0 %3084  ;;  %v3200_v9 = vpop.permute.xlu1 %3199 }
 0x6ae   : > { %v3089_v0 = vsel %vm459_vm7, %v3077_v55, %v3085_v32  ;;  %v3093_v52 = vsel %vm459_vm7, %v3085_v32, %v3077_v55  ;;  %3827 = vpush %v3200_v9 }
 0x6af   : > { %v3112_v51 = vmul.f32 %v3099_v31, %v3089_v0  ;;  %v3113_v4 = vmul.f32 %v3103_v63, %v3093_v52  ;;  %3272 = vmatmul.mubr.f32.vlgmr.msra.gmra.mrb[16].mxu1 %v3122_v18 }
 0x6b0   : > { %3762 = vmatpush1.bf16.msra.mxu1 %v3761_v37  ;;  %3342 = vmatprep.mubr.f32.mxu1 %v6356_v38 }
 0x6b1   : > { %v3765_v1 = vpack.c.bf16 %v3112_v51, %v3110_v15  ;;  %v3763_v6 = vpack.c.bf16 %v3113_v4, %v3111_v16 }
 0x6b3   : > { %3764 = vmatprep.subr.bf16.mxu1 %v3763_v6 }
 0x6b4   : > { %3766 = vmatpush1.bf16.msra.mxu1 %v3765_v1 }
 0x6b7   : > { %3460 = vmatmul.mubr.msk.f32.vlgmr.msra.gmra.mrb[16].mxu1 %vm1203_vm9, %v3124_v59 }
 0x6df   : > { %s3828_s13 = spop %3827 }
 0x6e0   : > { %v3202_v10 = vstv %s3828_s13 }
 0x78a   : > { %v3344_v54 = vpop.f32.mrb[16].mxu1 }
 0x78b   : > { %v3791_v62 = vadd.f32 %v3344_v54, %v3202_v10  ;;  %v3346_v41 = vpop.f32.mrb[17].mxu1 }
 0x78c   : > { %v3792_v53 = vadd.f32 %v3346_v41, %v3202_v10 }
 0x78d   : > { %3349 = vst [vmem:[%s280_s16] sm:$0xff] %v3791_v62 }
 0x78e   : > { %3350 = vst [vmem:[%s280_s16 + $0x8] sm:$0xff] %v3792_v53 }
 0x78f PF: > { %s17_s24 = sadd.s32 1, %s3862_s24  }
 0x790   : > { %p14_p4 = scmp.ge.s32.totalorder %s17_s24, 4  }
 0x792   :  { %16 = sbr.rel (!%p14_p4) target bundleno = 1 (0x1), region = 85 }

</bundles_post_ra>
